<compile_context>
chip_gen: v7x
topology: tpu7x:2x2x1
jax: 0.10.0
libtpu: 0.0.40
codegen_flags: <defaults>
</compile_context>

<pallas_src>
import functools

import jax
import jax.numpy as jnp
from jax.experimental import pallas as pl
from jax.experimental.pallas import tpu as pltpu


def _rup(n, m):
    return ((n + m - 1) // m) * m


def _pad2(a, rows, cols):
    r, c = a.shape
    return jnp.pad(a, ((0, rows - r), (0, cols - c)))


def medusa_kernel(x1_ref, x2_ref,
                  w1_ref, b1_ref, w2_ref, b2_ref,
                  wf_ref, bf_ref, wm1_ref, bm1_ref, wm2_ref, bm2_ref,
                  out_ref, *, tb, s1, s2):
    f32 = jnp.float32

    # ---------- branch 1 (CNN1D): one im2col matmul over the whole (TB*S1) row block ----------
    x1 = x1_ref[...].reshape(tb * s1, x1_ref.shape[-1])               # (TB*S1, CK1p) bf16
    a1 = jnp.dot(x1, w1_ref[...], preferred_element_type=f32)         # (TB*S1, 128) f32 acc
    a1 = jnp.maximum(a1 + b1_ref[...], 0.0)                           # bias + ReLU (f32 VPU)
    p1 = jnp.sum(a1.reshape(tb, s1, a1.shape[-1]), axis=1)            # (TB, 128) GAP-sum (1/S1 folded into wf)

    # ---------- branch 2 (MobileNetV2-style 2D conv): one im2col matmul ----------
    x2 = x2_ref[...].reshape(tb * s2, x2_ref.shape[-1])               # (TB*S2, CK2p)
    a2 = jnp.dot(x2, w2_ref[...], preferred_element_type=f32)
    a2 = jnp.maximum(a2 + b2_ref[...], 0.0)
    p2 = jnp.sum(a2.reshape(tb, s2, a2.shape[-1]), axis=1)            # (TB, 128)

    # ---------- fused branch FCs: [p1 | p2] @ blockdiag(wf1/S1, wf2/S2) (256-wide MXU) ----------
    p = jnp.concatenate([p1, p2], axis=1)                             # (TB, 256)
    f = jnp.dot(p, wf_ref[...], preferred_element_type=f32) + bf_ref[...]   # (TB, 256) = [f1 | f2]

    # ---------- Medusa head: concat (implicit) + L2-normalize over dim=1 + MLP ----------
    # padded feature columns are exactly zero, so the norm over real features is exact
    sumsq = jnp.sum(f * f, axis=1, keepdims=True)                     # (TB, 1)
    inv = jax.lax.rsqrt(jnp.maximum(sumsq, 1e-24))                    # EUP rsqrt; eps guards all-zero rows
    fn = f * inv
    h = jnp.maximum(jnp.dot(fn, wm1_ref[...], preferred_element_type=f32) + bm1_ref[...], 0.0)
    out = jnp.dot(h, wm2_ref[...], preferred_element_type=f32) + bm2_ref[...]
    out_ref[...] = out.astype(out_ref.dtype)                          # (TB, 128) dense store


def medusa_forward(x1_ncl, x2_nchw, params, *, tb=8):
    f32, bf16 = jnp.float32, jnp.bfloat16

    B, C1, L = x1_ncl.shape
    _, C2, H, W = x2_nchw.shape
    H1, _, K1 = params["conv1_w"].shape            # torch Conv1d weight: (out, in, K)
    H2, _, K2, _ = params["conv2_w"].shape         # torch Conv2d weight: (out, in, kH, kW)
    D1 = params["fc1_w"].shape[0]                  # torch Linear weight: (out, in)
    D2 = params["fc2_w"].shape[0]
    HM, DIN = params["mlp_w1"].shape
    DOUT = params["mlp_w2"].shape[0]
    assert DIN == D1 + D2
    assert B % tb == 0 and tb >= 8, "TB must divide B and be >= 8 for dense stores"

    S1, S2 = L, H * W
    CK1, CK2 = K1 * C1, K2 * K2 * C2
    CK1p, CK2p = _rup(CK1, 8), _rup(CK2, 8)        # activations: pad K to sublane multiple only
    HP = 128                                       # per-branch channel / feature lane width
    HMp, DOUTp = _rup(HM, 128), _rup(DOUT, 128)
    assert H1 <= HP and H2 <= HP and D1 <= HP and D2 <= HP and S1 % 8 == 0 and S2 % 8 == 0

    # ---- layouts: NCL -> NLC, NCHW -> NHWC; 'same' padding; im2col (channels-last tap order) ----
    x1 = jnp.transpose(x1_ncl, (0, 2, 1)).astype(f32)
    x2 = jnp.transpose(x2_nchw, (0, 2, 3, 1)).astype(f32)
    p1a, p1b = (K1 - 1) // 2, K1 - 1 - (K1 - 1) // 2
    p2a, p2b = (K2 - 1) // 2, K2 - 1 - (K2 - 1) // 2
    x1p = jnp.pad(x1, ((0, 0), (p1a, p1b), (0, 0)))
    x2p = jnp.pad(x2, ((0, 0), (p2a, p2b), (p2a, p2b), (0, 0)))
    x1_col = jnp.concatenate([x1p[:, k:k + L, :] for k in range(K1)], axis=-1)            # (B, S1, CK1)
    x2_col = jnp.concatenate(
        [x2p[:, i:i + H, j:j + W, :] for i in range(K2) for j in range(K2)], axis=-1
    ).reshape(B, S2, CK2)                                                                  # (B, S2, CK2)
    x1c = jnp.pad(x1_col, ((0, 0), (0, 0), (0, CK1p - CK1))).astype(bf16)
    x2c = jnp.pad(x2_col, ((0, 0), (0, 0), (0, CK2p - CK2))).astype(bf16)

    # ---- conv weights: torch (out, in, k...) -> (k..., in, out) -> (K*C, out); pad; bf16 ----
    w1 = _pad2(jnp.transpose(params["conv1_w"], (2, 1, 0)).reshape(CK1, H1), CK1p, HP).astype(bf16)
    b1 = _pad2(params["conv1_b"][None, :], 1, HP).astype(f32)
    w2 = _pad2(jnp.transpose(params["conv2_w"], (2, 3, 1, 0)).reshape(CK2, H2), CK2p, HP).astype(bf16)
    b2 = _pad2(params["conv2_b"][None, :], 1, HP).astype(f32)

    # ---- branch FCs fused as blockdiag; GAP mean (1/S) folded into the weights; head kept f32 ----
    wf1 = _pad2(params["fc1_w"].T.astype(f32) * (1.0 / S1), HP, HP)
    wf2 = _pad2(params["fc2_w"].T.astype(f32) * (1.0 / S2), HP, HP)
    wf_blk = jnp.zeros((2 * HP, 2 * HP), f32).at[:HP, :HP].set(wf1).at[HP:, HP:].set(wf2)
    bf_cat = jnp.concatenate([_pad2(params["fc1_b"][None, :], 1, HP),
                              _pad2(params["fc2_b"][None, :], 1, HP)], axis=1).astype(f32)

    # ---- MLP: wm1 rows split/placed to match the padded [f1 | f2] feature layout ----
    wm1_t = params["mlp_w1"].T.astype(f32)                           # (DIN, HM)
    wm1 = (jnp.zeros((2 * HP, HMp), f32)
           .at[:D1, :HM].set(wm1_t[:D1])
           .at[HP:HP + D2, :HM].set(wm1_t[D1:]))
    bm1 = _pad2(params["mlp_b1"][None, :], 1, HMp).astype(f32)
    wm2 = _pad2(params["mlp_w2"].T.astype(f32), HMp, DOUTp)
    bm2 = _pad2(params["mlp_b2"][None, :], 1, DOUTp).astype(f32)

    weights = (w1, b1, w2, b2, wf_blk, bf_cat, wm1, bm1, wm2, bm2)
    args = (x1c, x2c) + weights

    batch3 = lambda b: (b, 0, 0)
    const2 = lambda b: (0, 0)
    in_specs = [
        pl.BlockSpec((tb, S1, CK1p), batch3),
        pl.BlockSpec((tb, S2, CK2p), batch3),
    ] + [pl.BlockSpec(w.shape, const2) for w in weights]   # constant index_map: weights stay resident

    # cost estimate from the real operand shapes (no 128-padded contraction dims)
    flops = 2 * B * (S1 * CK1p * HP + S2 * CK2p * HP
                     + (2 * HP) * (2 * HP) + (2 * HP) * HMp + HMp * DOUTp)
    bytes_accessed = sum(int(a.size) * a.dtype.itemsize for a in args) + B * DOUTp * 4
    cost = pl.CostEstimate(flops=flops, transcendentals=B, bytes_accessed=bytes_accessed)

    # per-step VMEM: double-buffered activation streams + (double-buffered) weights +
    # f32 conv intermediates + output; clamp for v7x's 64 MiB physical VMEM
    step_bytes = (2 * (tb * S1 * CK1p + tb * S2 * CK2p) * 2
                  + 2 * sum(int(w.size) * w.dtype.itemsize for w in weights)
                  + (tb * S1 + tb * S2) * HP * 4
                  + 2 * tb * DOUTp * 4)
    vmem_limit = int(min(max(2 * step_bytes, 16 * 1024 * 1024), 48 * 1024 * 1024))

    kern = functools.partial(medusa_kernel, tb=tb, s1=S1, s2=S2)
    out = pl.pallas_call(
        kern,
        out_shape=jax.ShapeDtypeStruct((B, DOUTp), f32),
        grid=(B // tb,),
        in_specs=in_specs,
        out_specs=pl.BlockSpec((tb, DOUTp), lambda b: (b, 0)),
        compiler_params=pltpu.CompilerParams(
            dimension_semantics=("parallel",),      # B//TB >= 2 so both v7x TCs get work
            vmem_limit_bytes=vmem_limit,
        ),
        cost_estimate=cost,
    )(*args)

    return out[:, :DOUT]


def medusa_reference(x1_ncl, x2_nchw, p):
    """Pure-JAX f32 reference of the same simplified Medusa forward."""
    f32 = jnp.float32
    B, C1, L = x1_ncl.shape
    _, C2, H, W = x2_nchw.shape
    H1, _, K1 = p["conv1_w"].shape
    H2, _, K2, _ = p["conv2_w"].shape
    x1 = jnp.transpose(x1_ncl, (0, 2, 1)).astype(f32)
    x2 = jnp.transpose(x2_nchw, (0, 2, 3, 1)).astype(f32)
    p1a, p1b = (K1 - 1) // 2, K1 - 1 - (K1 - 1) // 2
    p2a, p2b = (K2 - 1) // 2, K2 - 1 - (K2 - 1) // 2
    x1p = jnp.pad(x1, ((0, 0), (p1a, p1b), (0, 0)))
    x2p = jnp.pad(x2, ((0, 0), (p2a, p2b), (p2a, p2b), (0, 0)))
    x1c = jnp.concatenate([x1p[:, k:k + L, :] for k in range(K1)], axis=-1)
    x2c = jnp.concatenate([x2p[:, i:i + H, j:j + W, :] for i in range(K2) for j in range(K2)],
                          axis=-1).reshape(B, H * W, K2 * K2 * C2)
    w1 = jnp.transpose(p["conv1_w"], (2, 1, 0)).reshape(K1 * C1, H1)
    w2 = jnp.transpose(p["conv2_w"], (2, 3, 1, 0)).reshape(K2 * K2 * C2, H2)
    a1 = jax.nn.relu(x1c @ w1 + p["conv1_b"])
    a2 = jax.nn.relu(x2c @ w2 + p["conv2_b"])
    f1 = jnp.mean(a1, axis=1) @ p["fc1_w"].T + p["fc1_b"]
    f2 = jnp.mean(a2, axis=1) @ p["fc2_w"].T + p["fc2_b"]
    x = jnp.concatenate([f1, f2], axis=1)
    x = x / jnp.linalg.norm(x, axis=1, keepdims=True)
    h = jax.nn.relu(x @ p["mlp_w1"].T + p["mlp_b1"])
    return h @ p["mlp_w2"].T + p["mlp_b2"]


if __name__ == "__main__":
    # small, deterministic shapes; B=16, TB=8 -> grid of 2 batch-blocks
    B, TB = 16, 8
    C1, L, K1, H1, D1 = 4, 16, 3, 16, 16            # CNN1D branch
    C2, HH, WW, K2, H2, D2 = 3, 16, 16, 3, 16, 16   # MobileNetV2-style branch
    DIN, HM, DOUT = D1 + D2, 32, 8                  # MLP head

    key = jax.random.PRNGKey(0)
    ks = jax.random.split(key, 14)
    x1 = jax.random.normal(ks[0], (B, C1, L), jnp.float32)        # PyTorch NCL input
    x2 = jax.random.normal(ks[1], (B, C2, HH, WW), jnp.float32)   # PyTorch NCHW input

    # parameters in native PyTorch layouts (conv: (out,in,k...), linear: (out,in), bias: (out,))
    params = dict(
        conv1_w=0.2 * jax.random.normal(ks[2], (H1, C1, K1), jnp.float32),
        conv1_b=0.1 * jax.random.normal(ks[3], (H1,), jnp.float32),
        fc1_w=0.2 * jax.random.normal(ks[4], (D1, H1), jnp.float32),
        fc1_b=0.1 * jax.random.normal(ks[5], (D1,), jnp.float32),
        conv2_w=0.2 * jax.random.normal(ks[6], (H2, C2, K2, K2), jnp.float32),
        conv2_b=0.1 * jax.random.normal(ks[7], (H2,), jnp.float32),
        fc2_w=0.2 * jax.random.normal(ks[8], (D2, H2), jnp.float32),
        fc2_b=0.1 * jax.random.normal(ks[9], (D2,), jnp.float32),
        mlp_w1=0.2 * jax.random.normal(ks[10], (HM, DIN), jnp.float32),
        mlp_b1=0.1 * jax.random.normal(ks[11], (HM,), jnp.float32),
        mlp_w2=0.2 * jax.random.normal(ks[12], (DOUT, HM), jnp.float32),
        mlp_b2=0.1 * jax.random.normal(ks[13], (DOUT,), jnp.float32),
    )

    out = medusa_forward(x1, x2, params, tb=TB)
    jax.block_until_ready(out)
    ref = medusa_reference(x1, x2, params)

    assert out.shape == (B, DOUT)
    assert bool(jnp.all(jnp.isfinite(out)))
    max_err = float(jnp.max(jnp.abs(out - ref)))
    assert max_err < 5e-2, f"max abs err vs reference: {max_err}"
    print("KERNEL_OK")
</pallas_src>

<mosaic_0001>
module attributes {stable_mosaic.version = 11 : i64} {
  func.func @medusa_kernel(%arg0: i32, %arg1: memref<8x16x16xbf16, #tpu.memory_space<vmem>>, %arg2: memref<8x256x32xbf16, #tpu.memory_space<vmem>>, %arg3: memref<16x128xbf16, #tpu.memory_space<vmem>>, %arg4: memref<1x128xf32, #tpu.memory_space<vmem>>, %arg5: memref<32x128xbf16, #tpu.memory_space<vmem>>, %arg6: memref<1x128xf32, #tpu.memory_space<vmem>>, %arg7: memref<256x256xf32, #tpu.memory_space<vmem>>, %arg8: memref<1x256xf32, #tpu.memory_space<vmem>>, %arg9: memref<256x128xf32, #tpu.memory_space<vmem>>, %arg10: memref<1x128xf32, #tpu.memory_space<vmem>>, %arg11: memref<128x128xf32, #tpu.memory_space<vmem>>, %arg12: memref<1x128xf32, #tpu.memory_space<vmem>>, %arg13: memref<8x128xf32, #tpu.memory_space<vmem>>) attributes {dimension_semantics = [#tpu.dimension_semantics<parallel>], iteration_bounds = array<i64: 2>, scalar_prefetch = 0 : i64, scratch_operands = 0 : i64, tpu.core_type = #tpu.core_type<tc>, window_params = [{transform_indices = @transform_0, window_bounds = array<i64: 8, 16, 16>}, {transform_indices = @transform_1, window_bounds = array<i64: 8, 256, 32>}, {pipeline_mode = #tpu.pipeline_mode<synchronous>, transform_indices = @transform_2, window_bounds = array<i64: 16, 128>}, {pipeline_mode = #tpu.pipeline_mode<synchronous>, transform_indices = @transform_3, window_bounds = array<i64: 1, 128>}, {pipeline_mode = #tpu.pipeline_mode<synchronous>, transform_indices = @transform_4, window_bounds = array<i64: 32, 128>}, {pipeline_mode = #tpu.pipeline_mode<synchronous>, transform_indices = @transform_5, window_bounds = array<i64: 1, 128>}, {pipeline_mode = #tpu.pipeline_mode<synchronous>, transform_indices = @transform_6, window_bounds = array<i64: 256, 256>}, {pipeline_mode = #tpu.pipeline_mode<synchronous>, transform_indices = @transform_7, window_bounds = array<i64: 1, 256>}, {pipeline_mode = #tpu.pipeline_mode<synchronous>, transform_indices = @transform_8, window_bounds = array<i64: 256, 128>}, {pipeline_mode = #tpu.pipeline_mode<synchronous>, transform_indices = @transform_9, window_bounds = array<i64: 1, 128>}, {pipeline_mode = #tpu.pipeline_mode<synchronous>, transform_indices = @transform_10, window_bounds = array<i64: 128, 128>}, {pipeline_mode = #tpu.pipeline_mode<synchronous>, transform_indices = @transform_11, window_bounds = array<i64: 1, 128>}, {transform_indices = @transform_12, window_bounds = array<i64: 8, 128>}]} {
    %c0 = arith.constant 0 : index
    %c0_0 = arith.constant 0 : index
    %c0_1 = arith.constant 0 : index
    %0 = vector.load %arg1[%c0, %c0_0, %c0_1] : memref<8x16x16xbf16, #tpu.memory_space<vmem>>, vector<8x16x16xbf16>
    %1 = vector.shape_cast %0 : vector<8x16x16xbf16> to vector<128x16xbf16>
    %c0_2 = arith.constant 0 : index
    %c0_3 = arith.constant 0 : index
    %2 = vector.load %arg3[%c0_2, %c0_3] : memref<16x128xbf16, #tpu.memory_space<vmem>>, vector<16x128xbf16>
    %cst = arith.constant dense<0.000000e+00> : vector<128x128xf32>
    %3 = tpu.matmul %1, %2, %cst {dimension_numbers = #tpu.dot_dimension_numbers<[1], [0], [0], [1], [0, 0, 1, 1], [], []>} : vector<128x16xbf16>, vector<16x128xbf16>, vector<128x128xf32> -> vector<128x128xf32>
    %c0_4 = arith.constant 0 : index
    %c0_5 = arith.constant 0 : index
    %4 = vector.load %arg4[%c0_4, %c0_5] : memref<1x128xf32, #tpu.memory_space<vmem>>, vector<1x128xf32>
    %5 = vector.broadcast %4 : vector<1x128xf32> to vector<128x128xf32>
    %6 = arith.addf %3, %5 : vector<128x128xf32>
    %cst_6 = arith.constant 0.000000e+00 : f32
    %7 = vector.broadcast %cst_6 : f32 to vector<128x128xf32>
    %8 = arith.maximumf %6, %7 : vector<128x128xf32>
    %9 = vector.shape_cast %8 : vector<128x128xf32> to vector<8x16x128xf32>
    %cst_7 = arith.constant dense<0.000000e+00> : vector<8x128xf32>
    %10 = vector.multi_reduction <add>, %9, %cst_7 [1] : vector<8x16x128xf32> to vector<8x128xf32>
    %c0_8 = arith.constant 0 : index
    %c0_9 = arith.constant 0 : index
    %c0_10 = arith.constant 0 : index
    %11 = vector.load %arg2[%c0_8, %c0_9, %c0_10] : memref<8x256x32xbf16, #tpu.memory_space<vmem>>, vector<8x256x32xbf16>
    %12 = vector.shape_cast %11 : vector<8x256x32xbf16> to vector<2048x32xbf16>
    %c0_11 = arith.constant 0 : index
    %c0_12 = arith.constant 0 : index
    %13 = vector.load %arg5[%c0_11, %c0_12] : memref<32x128xbf16, #tpu.memory_space<vmem>>, vector<32x128xbf16>
    %cst_13 = arith.constant dense<0.000000e+00> : vector<2048x128xf32>
    %14 = tpu.matmul %12, %13, %cst_13 {dimension_numbers = #tpu.dot_dimension_numbers<[1], [0], [0], [1], [0, 0, 1, 1], [], []>} : vector<2048x32xbf16>, vector<32x128xbf16>, vector<2048x128xf32> -> vector<2048x128xf32>
    %c0_14 = arith.constant 0 : index
    %c0_15 = arith.constant 0 : index
    %15 = vector.load %arg6[%c0_14, %c0_15] : memref<1x128xf32, #tpu.memory_space<vmem>>, vector<1x128xf32>
    %16 = vector.broadcast %15 : vector<1x128xf32> to vector<2048x128xf32>
    %17 = arith.addf %14, %16 : vector<2048x128xf32>
    %cst_16 = arith.constant 0.000000e+00 : f32
    %18 = vector.broadcast %cst_16 : f32 to vector<2048x128xf32>
    %19 = arith.maximumf %17, %18 : vector<2048x128xf32>
    %20 = vector.shape_cast %19 : vector<2048x128xf32> to vector<8x256x128xf32>
    %cst_17 = arith.constant dense<0.000000e+00> : vector<8x128xf32>
    %21 = vector.multi_reduction <add>, %20, %cst_17 [1] : vector<8x256x128xf32> to vector<8x128xf32>
    %22 = tpu.concatenate %10, %21 in 1 : vector<8x128xf32>, vector<8x128xf32> -> vector<8x256xf32>
    %c0_18 = arith.constant 0 : index
    %c0_19 = arith.constant 0 : index
    %23 = vector.load %arg7[%c0_18, %c0_19] : memref<256x256xf32, #tpu.memory_space<vmem>>, vector<256x256xf32>
    %cst_20 = arith.constant dense<0.000000e+00> : vector<8x256xf32>
    %24 = tpu.matmul %22, %23, %cst_20 {dimension_numbers = #tpu.dot_dimension_numbers<[1], [0], [0], [1], [0, 0, 1, 1], [], []>} : vector<8x256xf32>, vector<256x256xf32>, vector<8x256xf32> -> vector<8x256xf32>
    %c0_21 = arith.constant 0 : index
    %c0_22 = arith.constant 0 : index
    %25 = vector.load %arg8[%c0_21, %c0_22] : memref<1x256xf32, #tpu.memory_space<vmem>>, vector<1x256xf32>
    %26 = vector.broadcast %25 : vector<1x256xf32> to vector<8x256xf32>
    %27 = arith.addf %24, %26 : vector<8x256xf32>
    %28 = arith.mulf %27, %27 : vector<8x256xf32>
    %cst_23 = arith.constant dense<0.000000e+00> : vector<8xf32>
    %29 = vector.multi_reduction <add>, %28, %cst_23 [1] : vector<8x256xf32> to vector<8xf32>
    %30 = vector.shape_cast %29 : vector<8xf32> to vector<8x1xf32>
    %cst_24 = arith.constant 1.000000e-24 : f32
    %31 = vector.broadcast %cst_24 : f32 to vector<8x1xf32>
    %32 = arith.maximumf %30, %31 : vector<8x1xf32>
    %33 = math.rsqrt %32 : vector<8x1xf32>
    %34 = vector.broadcast %33 : vector<8x1xf32> to vector<8x256xf32>
    %35 = arith.mulf %27, %34 : vector<8x256xf32>
    %c0_25 = arith.constant 0 : index
    %c0_26 = arith.constant 0 : index
    %36 = vector.load %arg9[%c0_25, %c0_26] : memref<256x128xf32, #tpu.memory_space<vmem>>, vector<256x128xf32>
    %cst_27 = arith.constant dense<0.000000e+00> : vector<8x128xf32>
    %37 = tpu.matmul %35, %36, %cst_27 {dimension_numbers = #tpu.dot_dimension_numbers<[1], [0], [0], [1], [0, 0, 1, 1], [], []>} : vector<8x256xf32>, vector<256x128xf32>, vector<8x128xf32> -> vector<8x128xf32>
    %c0_28 = arith.constant 0 : index
    %c0_29 = arith.constant 0 : index
    %38 = vector.load %arg10[%c0_28, %c0_29] : memref<1x128xf32, #tpu.memory_space<vmem>>, vector<1x128xf32>
    %39 = vector.broadcast %38 : vector<1x128xf32> to vector<8x128xf32>
    %40 = arith.addf %37, %39 : vector<8x128xf32>
    %cst_30 = arith.constant 0.000000e+00 : f32
    %41 = vector.broadcast %cst_30 : f32 to vector<8x128xf32>
    %42 = arith.maximumf %40, %41 : vector<8x128xf32>
    %c0_31 = arith.constant 0 : index
    %c0_32 = arith.constant 0 : index
    %43 = vector.load %arg11[%c0_31, %c0_32] : memref<128x128xf32, #tpu.memory_space<vmem>>, vector<128x128xf32>
    %cst_33 = arith.constant dense<0.000000e+00> : vector<8x128xf32>
    %44 = tpu.matmul %42, %43, %cst_33 {dimension_numbers = #tpu.dot_dimension_numbers<[1], [0], [0], [1], [0, 0, 1, 1], [], []>} : vector<8x128xf32>, vector<128x128xf32>, vector<8x128xf32> -> vector<8x128xf32>
    %c0_34 = arith.constant 0 : index
    %c0_35 = arith.constant 0 : index
    %45 = vector.load %arg12[%c0_34, %c0_35] : memref<1x128xf32, #tpu.memory_space<vmem>>, vector<1x128xf32>
    %46 = vector.broadcast %45 : vector<1x128xf32> to vector<8x128xf32>
    %47 = arith.addf %44, %46 : vector<8x128xf32>
    %c0_36 = arith.constant 0 : index
    %c0_37 = arith.constant 0 : index
    %48 = vector.load %arg13[%c0_36, %c0_37] : memref<8x128xf32, #tpu.memory_space<vmem>>, vector<8x128xf32>
    tpu.vector_store %arg13[%c0_36, %c0_37], %47 {strides = array<i32>} : memref<8x128xf32, #tpu.memory_space<vmem>>, vector<8x128xf32>,
    return
  }
  func.func @transform_0(%arg0: i32) -> (i32, i32, i32) {
    %c0_i32 = arith.constant 0 : i32
    %c0_i32_0 = arith.constant 0 : i32
    %c0_i32_1 = arith.constant 0 : i32
    return %arg0, %c0_i32, %c0_i32_0 : i32, i32, i32
  }
  func.func @transform_1(%arg0: i32) -> (i32, i32, i32) {
    %c0_i32 = arith.constant 0 : i32
    %c0_i32_0 = arith.constant 0 : i32
    %c0_i32_1 = arith.constant 0 : i32
    return %arg0, %c0_i32, %c0_i32_0 : i32, i32, i32
  }
  func.func @transform_2(%arg0: i32) -> (i32, i32) {
    %c0_i32 = arith.constant 0 : i32
    %c0_i32_0 = arith.constant 0 : i32
    %c0_i32_1 = arith.constant 0 : i32
    return %c0_i32, %c0_i32_0 : i32, i32
  }
  func.func @transform_3(%arg0: i32) -> (i32, i32) {
    %c0_i32 = arith.constant 0 : i32
    %c0_i32_0 = arith.constant 0 : i32
    %c0_i32_1 = arith.constant 0 : i32
    return %c0_i32, %c0_i32_0 : i32, i32
  }
  func.func @transform_4(%arg0: i32) -> (i32, i32) {
    %c0_i32 = arith.constant 0 : i32
    %c0_i32_0 = arith.constant 0 : i32
    %c0_i32_1 = arith.constant 0 : i32
    return %c0_i32, %c0_i32_0 : i32, i32
  }
  func.func @transform_5(%arg0: i32) -> (i32, i32) {
    %c0_i32 = arith.constant 0 : i32
    %c0_i32_0 = arith.constant 0 : i32
    %c0_i32_1 = arith.constant 0 : i32
    return %c0_i32, %c0_i32_0 : i32, i32
  }
  func.func @transform_6(%arg0: i32) -> (i32, i32) {
    %c0_i32 = arith.constant 0 : i32
    %c0_i32_0 = arith.constant 0 : i32
    %c0_i32_1 = arith.constant 0 : i32
    return %c0_i32, %c0_i32_0 : i32, i32
  }
  func.func @transform_7(%arg0: i32) -> (i32, i32) {
    %c0_i32 = arith.constant 0 : i32
    %c0_i32_0 = arith.constant 0 : i32
    %c0_i32_1 = arith.constant 0 : i32
    return %c0_i32, %c0_i32_0 : i32, i32
  }
  func.func @transform_8(%arg0: i32) -> (i32, i32) {
    %c0_i32 = arith.constant 0 : i32
    %c0_i32_0 = arith.constant 0 : i32
    %c0_i32_1 = arith.constant 0 : i32
    return %c0_i32, %c0_i32_0 : i32, i32
  }
  func.func @transform_9(%arg0: i32) -> (i32, i32) {
    %c0_i32 = arith.constant 0 : i32
    %c0_i32_0 = arith.constant 0 : i32
    %c0_i32_1 = arith.constant 0 : i32
    return %c0_i32, %c0_i32_0 : i32, i32
  }
  func.func @transform_10(%arg0: i32) -> (i32, i32) {
    %c0_i32 = arith.constant 0 : i32
    %c0_i32_0 = arith.constant 0 : i32
    %c0_i32_1 = arith.constant 0 : i32
    return %c0_i32, %c0_i32_0 : i32, i32
  }
  func.func @transform_11(%arg0: i32) -> (i32, i32) {
    %c0_i32 = arith.constant 0 : i32
    %c0_i32_0 = arith.constant 0 : i32
    %c0_i32_1 = arith.constant 0 : i32
    return %c0_i32, %c0_i32_0 : i32, i32
  }
  func.func @transform_12(%arg0: i32) -> (i32, i32) {
    %c0_i32 = arith.constant 0 : i32
    %c0_i32_0 = arith.constant 0 : i32
    return %arg0, %c0_i32 : i32, i32
  }
}

</mosaic_0001>

<bundles_post_ra>
// kernel: tpu_custom_call.1
= control target key start
LH: loop header
LB: loop body
LE: loop exit
PB: predicated region body
PF: predicated region fallthrough
CT: control target
= control target key end

     0   :  { %s6486_s0 = inlined_call_operand.vmem [shape: bf16[16,16,16], index: 0, kind: input, shape index: {}]   ;;  %s6487_s1 = inlined_call_operand.vmem [shape: bf16[16,256,32], index: 1, kind: input, shape index: {}]   ;;  %s6488_s2 = inlined_call_operand.vmem [shape: bf16[16,128], index: 2, kind: input, shape index: {}]   ;;  %s6489_s3 = inlined_call_operand.vmem [shape: f32[1,128], index: 3, kind: input, shape index: {}]   ;;  %s6490_s4 = inlined_call_operand.vmem [shape: bf16[32,128], index: 4, kind: input, shape index: {}]   ;;  %s6491_s5 = inlined_call_operand.vmem [shape: f32[1,128], index: 5, kind: input, shape index: {}]   ;;  %s6492_s6 = inlined_call_operand.vmem [shape: f32[256,256], index: 6, kind: input, shape index: {}]   ;;  %s6493_s7 = inlined_call_operand.vmem [shape: f32[1,256], index: 7, kind: input, shape index: {}]   ;;  %s6494_s8 = inlined_call_operand.vmem [shape: f32[256,128], index: 8, kind: input, shape index: {}]   ;;  %s6495_s9 = inlined_call_operand.vmem [shape: f32[1,128], index: 9, kind: input, shape index: {}]   ;;  %s6496_s10 = inlined_call_operand.vmem [shape: f32[128,128], index: 10, kind: input, shape index: {}]   ;;  %s6497_s11 = inlined_call_operand.vmem [shape: f32[1,128], index: 11, kind: input, shape index: {}]   ;;  %s6498_s12 = inlined_call_operand.hbm [shape: f32[16,128], index: 12, kind: output, shape index: {}]  }
   0x1   :  { %6499 = sst [smem:[#allocation6_spill]] %s6486_s0 }
   0x2   :  { %17 = vsyncpa [#allocation3], 0 }
   0x3   :  { %19 = vsyncpa [#allocation3 + $0x1], 0  ;;  %s5347_s21 = smov 0   ;;  %s5349_s22 = smov 0  }
   0x4   :  { %s5351_s23 = smov 0   ;;  %s5353_s24 = smov 0  }
   0x5 LB: > { %s5368_s25 = sadd.s32 4294967295, %s5276_s24   ;;  %s4105_s26 = sadd.s32 4294967294, %s5276_s24   ;;  %s5276_s24 = sphi %s5353_s24, %s6508_s24   ;;  %s5272_s23 = sphi %s5351_s23, %s6507_s23   ;;  %s5268_s22 = sphi %s5349_s22, %s6506_s22   ;;  %s5264_s21 = sphi %s5347_s21, %s6505_s21  }
   0x6   : > { %s5372_s27 = sadd.s32 1, %s5276_s24   ;;  %s294_s28 = sadd.s32 1, %s5272_s23 }
   0x7   : > { %s291_s29 = ssub.s32 %s5276_s24, %s5372_s27  ;;  %p304_p0 = scmp.ne.s32.totalorder %s5272_s23, %s5268_s22 }
   0x8   : > { %p292_p1 = scmp.eq.s32.totalorder %s291_s29, 0  ;;  %p305_p2 = scmp.eq.s32.totalorder %s5368_s25, 1 }
   0x9   : > { %p310_p3 = scmp.ne.s32.totalorder %s5268_s22, %s5264_s21  ;;  %p311_p4 = scmp.eq.s32.totalorder %s4105_s26, 1 }
   0xa   : > { %s5383_s30 = scalar_select %p292_p1, %s5272_s23, %s294_s28  }
   0xb   : > { %p5385_p5 = por %p305_p2, %p304_p0  ;;  %p5389_p6 = por %p311_p4, %p310_p3 }
   0xc   : > { %6500 = sst [smem:[#allocation5_spill]] %s5383_s30  ;;  %p4108_p7 = scmp.ge.s32.totalorder %s5276_s24, 1 }
   0xd   : > { %p379_p8 = scmp.lt.s32.totalorder %s5276_s24, 3 }
   0xf   : > { %p380_p9 = pnand %p4108_p7, %p379_p8 }
  0x10   : > { %v5071_v0 = vld [vmem:[%s6490_s4] sm:$0xff] (!%p380_p9)   ;;  %s4110_s17 = sshll.u32 (!%p380_p9), %s5368_s25, 3  ;;  %v5073_v2 = vld [vmem:[%s6490_s4 + $0x8] sm:$0xff] (!%p380_p9)   ;;  %s6503_s0 = sld [smem:[#allocation6_spill]] (!%p380_p9)  ;;  %vm514_vm0 = vcmask (!%p380_p9), 130048   ;;  %vm1627_vm1 = vcmask (!%p380_p9), 261120  }
  0x11   : > { %383 = sbr.rel (%p380_p9) target bundleno = 1389 (0x56d), region = 68  ;;  %v5072_v1 = vld [vmem:[%s6488_s2] sm:$0xff] (!%p380_p9)   ;;  %p429_p10 = scmp.lt.s32.totalorder (!%p380_p9), %s4110_s17, 15  ;;  %5025 = vmatprep.subr.bf16.mxu1 (!%p380_p9), %v5071_v0  ;;  %vm3629_vm2 = vcmask (!%p380_p9), 1041409   ;;  %vm3631_vm3 = vcmask (!%p380_p9), 1042434   ;;  %vm3633_vm4 = vcmask (!%p380_p9), 1043459  }
  0x12   : > { %5027 = vmatpush3.bf16.msra.mxu1 (!%p380_p9), %v5071_v0  ;;  %4592 = vmatprep.subr.bf16.mxu0 (!%p380_p9), %v5072_v1  ;;  %vm3635_vm5 = vcmask (!%p380_p9), 1044484   ;;  %vm3637_vm6 = vcmask (!%p380_p9), 1045509   ;;  %vm3639_vm7 = vcmask (!%p380_p9), 1046534   ;;  %vm3641_vm8 = vcmask (!%p380_p9), 1047559   ;;  %s4396_s18 = sshll.u32 (!%p380_p9), %s5368_s25, 7  ;;  %s5281_s25 = smov (!%p380_p9), [#allocation2]  }
  0x13   : > { %5026 = vmatprep.subr.bf16.mxu1 (!%p380_p9), %v5073_v2  ;;  %4593 = vmatpush3.bf16.msra.mxu0 (!%p380_p9), %v5072_v1  ;;  %vm5279_vm9 = vmmov (!%p380_p9), 0  }
  0x14   : > { %4610 = vmatprep.subr.bf16.mxu0 (!%p380_p9), %v5071_v0 }
  0x16   : > { %5028 = vmatpush3.bf16.msra.mxu1 (!%p380_p9), %v5073_v2 }
  0x18   : > { %s6510_s17 = smov (!%p429_p10, %s4110_s17), 15 }
  0x19   : > { %s4399_s28 = sshll.u32 %s6510_s17, 3  ;;  %s4400_s29 = sshll.u32 %s6510_s17, 7 }
  0x1a   : > { %s5408_s30 = scalar_lea.vmem %s6503_s0, %s4399_s28  ;;  %s5413_s20 = scalar_lea.vmem %s6487_s1, %s4400_s29 }
  0x1b   : > { %v5074_v3 = vld [vmem:[%s5408_s30] sm:$0xff]   ;;  %v5076_v5 = vld [vmem:[%s5408_s30 + $0x8] sm:$0xff]   ;;  %v5078_v7 = vld [vmem:[%s5408_s30 + $0x10] sm:$0xff]   ;;  %s425_s28 = sand.u32 1, %s5268_s22   ;;  %s6444_s17 = scalar_lea.hbm %s6498_s12, %s4396_s18 }
  0x1c   : > { %v5075_v4 = vld [vmem:[%s5413_s20 + $0x1a0] sm:$0xff]   ;;  %4594 = vmatprep.mubr.msk.bf16.mxu0 %vm514_vm0, %v5074_v3  ;;  %v5077_v6 = vld [vmem:[%s5413_s20 + $0x1a8] sm:$0xff]   ;;  %v5079_v8 = vld [vmem:[%s5413_s20 + $0x1b0] sm:$0xff]   ;;  %s4109_s29 = sshll.u32 %s425_s28, 3  ;;  %s4021_s26 = scalar_lea.sflag [#allocation3], %s425_s28 }
  0x1d   : > { %4718 = vmatprep.mubr.msk.bf16.mxu1 %vm1627_vm1, %v5075_v4  ;;  %4595 = vmatmul.mubr.msk.bf16.vlgmr.msra.gmra.mrb[0].mxu0 %vm514_vm0, %v5076_v5  ;;  %v5080_v9 = vld [vmem:[%s5408_s30 + $0x18] sm:$0xff]   ;;  %v5082_v11 = vld [vmem:[%s5408_s30 + $0x20] sm:$0xff]   ;;  %v5084_v13 = vld [vmem:[%s5408_s30 + $0x28] sm:$0xff]   ;;  %s427_s19 = scalar_lea.vmem [#allocation2], %s4109_s29  ;;  %s5218_s29 = sshll.u32 %s5281_s25, 4  ;;  %s5219_s29 = int_to_ptr.vmem [resolvable:$false] %s5218_s29 }
  0x1e   : > { %4719 = vmatmul.mubr.msk.bf16.vlgmr.msra.gmra.mrb[0].mxu1 %vm1627_vm1, %v5077_v6  ;;  %4611 = vmatpush3.bf16.msra.mxu0 %v5071_v0  ;;  %v5081_v10 = vld [vmem:[%s5413_s20 + $0x1b8] sm:$0xff]   ;;  %v5083_v12 = vld [vmem:[%s5413_s20 + $0x1c0] sm:$0xff]   ;;  %v5085_v14 = vld [vmem:[%s5413_s20 + $0x1c8] sm:$0xff]   ;;  %s5220_s16 = scalar_lea.vmem %s5219_s29, 256 }
  0x1f   : > { %4598 = vmatprep.mubr.msk.bf16.mxu0 %vm514_vm0, %v5078_v7  ;;  %4612 = vmatprep.subr.bf16.mxu0 %v5073_v2  ;;  %v5086_v15 = vld [vmem:[%s5408_s30 + $0x30] sm:$0xff]   ;;  %v5088_v17 = vld [vmem:[%s5408_s30 + $0x38] sm:$0xff]   ;;  %v5090_v19 = vld [vmem:[%s5413_s20] sm:$0xff]   ;;  %s4034_s30 = sshll.u32 %s427_s19, 4  ;;  %s6446_s30 = int_to_ptr.vmem [resolvable:$true] %s4034_s30 }
  0x20   : > { %4722 = vmatprep.mubr.msk.bf16.mxu1 %vm1627_vm1, %v5079_v8  ;;  %v5087_v16 = vld [vmem:[%s5413_s20 + $0x1d0] sm:$0xff]   ;;  %v5089_v18 = vld [vmem:[%s5413_s20 + $0x1d8] sm:$0xff]   ;;  %v5091_v20 = vld [vmem:[%s5413_s20 + $0x1e0] sm:$0xff]   ;;  %s5214_s15 = scalar_lea.vmem %s6446_s30, 128  ;;  %p5221_p0 = scmp.lt.s32.totalorder %s6446_s30, %s5219_s29 }
  0x21   : > { %v5092_v21 = vld [vmem:[%s5413_s20 + $0x8] sm:$0xff]   ;;  %v5094_v23 = vld [vmem:[%s5413_s20 + $0x10] sm:$0xff]   ;;  %v5096_v25 = vld [vmem:[%s5413_s20 + $0x18] sm:$0xff]   ;;  %p5215_p11 = scmp.ne.s32.totalorder %s6446_s30, %s5214_s15  ;;  %p5222_p1 = scmp.lt.s32.totalorder %s5220_s16, %s5214_s15 }
  0x22   : > { %4613 = vmatpush3.bf16.msra.mxu0 %v5073_v2  ;;  %v5093_v22 = vld [vmem:[%s5413_s20 + $0x1e8] sm:$0xff]   ;;  %v5095_v24 = vld [vmem:[%s5413_s20 + $0x1f0] sm:$0xff]   ;;  %v5097_v26 = vld [vmem:[%s5413_s20 + $0x1f8] sm:$0xff]  }
  0x23   : > { %v5098_v27 = vld [vmem:[%s5413_s20 + $0x20] sm:$0xff]   ;;  %v5100_v29 = vld [vmem:[%s5413_s20 + $0x28] sm:$0xff]   ;;  %v5102_v31 = vld [vmem:[%s5413_s20 + $0x30] sm:$0xff]   ;;  %p5216_p12 = pnand %p5215_p11, %p5385_p5  ;;  %p5223_p2 = por %p5222_p1, %p5221_p0 }
  0x24   : > { %v5099_v28 = vld [vmem:[%s5413_s20 + $0x200] sm:$0xff]   ;;  %v5101_v30 = vld [vmem:[%s5413_s20 + $0x208] sm:$0xff]   ;;  %v5103_v32 = vld [vmem:[%s5413_s20 + $0x210] sm:$0xff]  }
  0x25   : > { %4599 = vmatmul.mubr.msk.bf16.gmra.mrb[4].mxu0 %vm514_vm0, %v5080_v9  ;;  %v5104_v33 = vld [vmem:[%s5413_s20 + $0x38] sm:$0xff]   ;;  %v5106_v35 = vld [vmem:[%s5413_s20 + $0x40] sm:$0xff]   ;;  %v5108_v37 = vld [vmem:[%s5413_s20 + $0x48] sm:$0xff]   ;;  %p5217_p13 = pneg %p5216_p12 }
  0x26   : > { %4723 = vmatmul.mubr.msk.bf16.gmra.mrb[4].mxu1 %vm1627_vm1, %v5081_v10  ;;  %4602 = vmatprep.mubr.msk.bf16.mxu0 %vm514_vm0, %v5082_v11  ;;  %v5105_v34 = vld [vmem:[%s5413_s20 + $0x218] sm:$0xff]   ;;  %v5107_v36 = vld [vmem:[%s5413_s20 + $0x220] sm:$0xff]   ;;  %v5109_v38 = vld [vmem:[%s5413_s20 + $0x228] sm:$0xff]  }
  0x27   : > { %4726 = vmatprep.mubr.msk.bf16.mxu1 %vm1627_vm1, %v5083_v12  ;;  %v5110_v39 = vld [vmem:[%s5413_s20 + $0x50] sm:$0xff]   ;;  %v5112_v41 = vld [vmem:[%s5413_s20 + $0x58] sm:$0xff]   ;;  %v5114_v43 = vld [vmem:[%s5413_s20 + $0x60] sm:$0xff]   ;;  %p5224_p3 = pnand %p5223_p2, %p5217_p13 }
  0x28   : > { %v5111_v40 = vld [vmem:[%s5413_s20 + $0x230] sm:$0xff]   ;;  %v5113_v42 = vld [vmem:[%s5413_s20 + $0x238] sm:$0xff]   ;;  %v5115_v44 = vld [vmem:[%s5413_s20 + $0x240] sm:$0xff]  }
  0x29   : > { %v5116_v45 = vld [vmem:[%s5413_s20 + $0x68] sm:$0xff]   ;;  %v5118_v47 = vld [vmem:[%s5413_s20 + $0x70] sm:$0xff]   ;;  %v5120_v49 = vld [vmem:[%s5413_s20 + $0x78] sm:$0xff]  }
  0x2a   : > { %v5117_v46 = vld [vmem:[%s5413_s20 + $0x248] sm:$0xff]   ;;  %v5119_v48 = vld [vmem:[%s5413_s20 + $0x250] sm:$0xff]   ;;  %v5121_v50 = vld [vmem:[%s5413_s20 + $0x258] sm:$0xff]  }
  0x2b   : > { %v5122_v51 = vld [vmem:[%s5413_s20 + $0x80] sm:$0xff]   ;;  %v5124_v53 = vld [vmem:[%s5413_s20 + $0x88] sm:$0xff]   ;;  %v5126_v55 = vld [vmem:[%s5413_s20 + $0x90] sm:$0xff]  }
  0x2c   : > { %v5123_v52 = vld [vmem:[%s5413_s20 + $0x260] sm:$0xff]   ;;  %v5125_v54 = vld [vmem:[%s5413_s20 + $0x268] sm:$0xff]   ;;  %v5127_v56 = vld [vmem:[%s5413_s20 + $0x270] sm:$0xff]  }
  0x2d   : > { %4603 = vmatmul.mubr.msk.bf16.gmra.mrb[8].mxu0 %vm514_vm0, %v5084_v13  ;;  %v5128_v57 = vld [vmem:[%s5413_s20 + $0x98] sm:$0xff]   ;;  %v5130_v59 = vld [vmem:[%s5413_s20 + $0xa0] sm:$0xff]   ;;  %v5132_v61 = vld [vmem:[%s5413_s20 + $0xa8] sm:$0xff]  }
  0x2e   : > { %4727 = vmatmul.mubr.msk.bf16.gmra.mrb[8].mxu1 %vm1627_vm1, %v5085_v14  ;;  %4606 = vmatprep.mubr.msk.bf16.mxu0 %vm514_vm0, %v5086_v15  ;;  %v5129_v58 = vld [vmem:[%s5413_s20 + $0x278] sm:$0xff]   ;;  %v5131_v60 = vld [vmem:[%s5413_s20 + $0x280] sm:$0xff]   ;;  %v5133_v62 = vld [vmem:[%s5413_s20 + $0x288] sm:$0xff]  }
  0x2f   : > { %4730 = vmatprep.mubr.msk.bf16.mxu1 %vm1627_vm1, %v5087_v16  ;;  %v5134_v63 = vld [vmem:[%s5413_s20 + $0xb0] sm:$0xff]   ;;  %v5136_v1 = vld [vmem:[%s5413_s20 + $0xb8] sm:$0xff]   ;;  %v5138_v3 = vld [vmem:[%s5413_s20 + $0xc0] sm:$0xff]  }
  0x30   : > { %v5135_v0 = vld [vmem:[%s5413_s20 + $0x290] sm:$0xff]   ;;  %v5137_v2 = vld [vmem:[%s5413_s20 + $0x298] sm:$0xff]   ;;  %v5139_v4 = vld [vmem:[%s5413_s20 + $0x2a0] sm:$0xff]  }
  0x31   : > { %v5140_v5 = vld [vmem:[%s5413_s20 + $0xc8] sm:$0xff]   ;;  %v5142_v7 = vld [vmem:[%s5413_s20 + $0xd0] sm:$0xff]   ;;  %v5144_v9 = vld [vmem:[%s5413_s20 + $0xd8] sm:$0xff]  }
  0x32   : > { %v5141_v6 = vld [vmem:[%s5413_s20 + $0x2a8] sm:$0xff]   ;;  %v5143_v8 = vld [vmem:[%s5413_s20 + $0x2b0] sm:$0xff]   ;;  %v5145_v10 = vld [vmem:[%s5413_s20 + $0x2b8] sm:$0xff]  }
  0x33   : > { %v5146_v11 = vld [vmem:[%s5413_s20 + $0xe0] sm:$0xff]   ;;  %v5148_v13 = vld [vmem:[%s5413_s20 + $0xe8] sm:$0xff]   ;;  %v5150_v15 = vld [vmem:[%s5413_s20 + $0xf0] sm:$0xff]  }
  0x34   : > { %v5147_v12 = vld [vmem:[%s5413_s20 + $0x2c0] sm:$0xff]   ;;  %v5149_v14 = vld [vmem:[%s5413_s20 + $0x2c8] sm:$0xff]   ;;  %v5151_v16 = vld [vmem:[%s5413_s20 + $0x2d0] sm:$0xff]  }
  0x35   : > { %4607 = vmatmul.mubr.msk.bf16.gmra.mrb[12].mxu0 %vm514_vm0, %v5088_v17  ;;  %v5152_v17 = vld [vmem:[%s5413_s20 + $0xf8] sm:$0xff]  }
  0x36   : > { %4731 = vmatmul.mubr.msk.bf16.gmra.mrb[12].mxu1 %vm1627_vm1, %v5089_v18  ;;  %4614 = vmatprep.mubr.msk.bf16.mxu0 %vm1627_vm1, %v5090_v19  ;;  %v5153_v18 = vld [vmem:[%s5413_s20 + $0x2d8] sm:$0xff]   ;;  %v5154_v19 = vld [vmem:[%s5413_s20 + $0x100] sm:$0xff]  }
  0x37   : > { %4734 = vmatprep.mubr.msk.bf16.mxu1 %vm1627_vm1, %v5091_v20  ;;  %v5155_v20 = vld [vmem:[%s5413_s20 + $0x2e0] sm:$0xff]  }
  0x3d   : > { %4615 = vmatmul.mubr.msk.bf16.vlgmr.msra.gmra.mrb[16].mxu0 %vm1627_vm1, %v5092_v21  ;;  %v5156_v21 = vld [vmem:[%s5413_s20 + $0x108] sm:$0xff]  }
  0x3e   : > { %4735 = vmatmul.mubr.msk.bf16.gmra.mrb[16].mxu1 %vm1627_vm1, %v5093_v22  ;;  %4618 = vmatprep.mubr.msk.bf16.mxu0 %vm1627_vm1, %v5094_v23  ;;  %v5157_v22 = vld [vmem:[%s5413_s20 + $0x2e8] sm:$0xff]   ;;  %v5158_v23 = vld [vmem:[%s5413_s20 + $0x110] sm:$0xff]  }
  0x3f   : > { %4738 = vmatprep.mubr.msk.bf16.mxu1 %vm1627_vm1, %v5095_v24  ;;  %v5159_v24 = vld [vmem:[%s5413_s20 + $0x2f0] sm:$0xff]  }
  0x45   : > { %4619 = vmatmul.mubr.msk.bf16.gmra.mrb[20].mxu0 %vm1627_vm1, %v5096_v25  ;;  %v5160_v25 = vld [vmem:[%s5413_s20 + $0x118] sm:$0xff]  }
  0x46   : > { %4739 = vmatmul.mubr.msk.bf16.gmra.mrb[20].mxu1 %vm1627_vm1, %v5097_v26  ;;  %4622 = vmatprep.mubr.msk.bf16.mxu0 %vm1627_vm1, %v5098_v27  ;;  %v5161_v26 = vld [vmem:[%s5413_s20 + $0x2f8] sm:$0xff]   ;;  %v5162_v27 = vld [vmem:[%s5413_s20 + $0x120] sm:$0xff]  }
  0x47   : > { %4742 = vmatprep.mubr.msk.bf16.mxu1 %vm1627_vm1, %v5099_v28  ;;  %v5163_v28 = vld [vmem:[%s5413_s20 + $0x300] sm:$0xff]  }
  0x4d   : > { %4623 = vmatmul.mubr.msk.bf16.gmra.mrb[24].mxu0 %vm1627_vm1, %v5100_v29  ;;  %v5164_v29 = vld [vmem:[%s5413_s20 + $0x128] sm:$0xff]  }
  0x4e   : > { %4743 = vmatmul.mubr.msk.bf16.gmra.mrb[24].mxu1 %vm1627_vm1, %v5101_v30  ;;  %4626 = vmatprep.mubr.msk.bf16.mxu0 %vm1627_vm1, %v5102_v31  ;;  %v5165_v30 = vld [vmem:[%s5413_s20 + $0x308] sm:$0xff]   ;;  %v5166_v31 = vld [vmem:[%s5413_s20 + $0x130] sm:$0xff]  }
  0x4f   : > { %4746 = vmatprep.mubr.msk.bf16.mxu1 %vm1627_vm1, %v5103_v32  ;;  %v5167_v32 = vld [vmem:[%s5413_s20 + $0x310] sm:$0xff]  }
  0x55   : > { %4627 = vmatmul.mubr.msk.bf16.gmra.mrb[28].mxu0 %vm1627_vm1, %v5104_v33  ;;  %v5168_v33 = vld [vmem:[%s5413_s20 + $0x138] sm:$0xff]  }
  0x56   : > { %4747 = vmatmul.mubr.msk.bf16.gmra.mrb[28].mxu1 %vm1627_vm1, %v5105_v34  ;;  %4630 = vmatprep.mubr.msk.bf16.mxu0 %vm1627_vm1, %v5106_v35  ;;  %v5169_v34 = vld [vmem:[%s5413_s20 + $0x318] sm:$0xff]   ;;  %v5170_v35 = vld [vmem:[%s5413_s20 + $0x140] sm:$0xff]  }
  0x57   : > { %4750 = vmatprep.mubr.msk.bf16.mxu1 %vm1627_vm1, %v5107_v36  ;;  %v5171_v36 = vld [vmem:[%s5413_s20 + $0x320] sm:$0xff]  }
  0x5d   : > { %4631 = vmatmul.mubr.msk.bf16.gmra.mrb[32].mxu0 %vm1627_vm1, %v5108_v37  ;;  %v5172_v37 = vld [vmem:[%s5413_s20 + $0x148] sm:$0xff]  }
  0x5e   : > { %4751 = vmatmul.mubr.msk.bf16.gmra.mrb[32].mxu1 %vm1627_vm1, %v5109_v38  ;;  %4634 = vmatprep.mubr.msk.bf16.mxu0 %vm1627_vm1, %v5110_v39  ;;  %v5173_v38 = vld [vmem:[%s5413_s20 + $0x328] sm:$0xff]   ;;  %v5174_v39 = vld [vmem:[%s5413_s20 + $0x150] sm:$0xff]  }
  0x5f   : > { %4754 = vmatprep.mubr.msk.bf16.mxu1 %vm1627_vm1, %v5111_v40  ;;  %v5175_v40 = vld [vmem:[%s5413_s20 + $0x330] sm:$0xff]  }
  0x65   : > { %4635 = vmatmul.mubr.msk.bf16.gmra.mrb[36].mxu0 %vm1627_vm1, %v5112_v41  ;;  %v5176_v41 = vld [vmem:[%s5413_s20 + $0x158] sm:$0xff]  }
  0x66   : > { %4755 = vmatmul.mubr.msk.bf16.gmra.mrb[36].mxu1 %vm1627_vm1, %v5113_v42  ;;  %4638 = vmatprep.mubr.msk.bf16.mxu0 %vm1627_vm1, %v5114_v43  ;;  %v5177_v42 = vld [vmem:[%s5413_s20 + $0x338] sm:$0xff]   ;;  %v5178_v43 = vld [vmem:[%s5413_s20 + $0x160] sm:$0xff]  }
  0x67   : > { %4758 = vmatprep.mubr.msk.bf16.mxu1 %vm1627_vm1, %v5115_v44  ;;  %v5179_v44 = vld [vmem:[%s5413_s20 + $0x340] sm:$0xff]  }
  0x6d   : > { %4639 = vmatmul.mubr.msk.bf16.gmra.mrb[40].mxu0 %vm1627_vm1, %v5116_v45  ;;  %v5180_v45 = vld [vmem:[%s5413_s20 + $0x168] sm:$0xff]  }
  0x6e   : > { %4759 = vmatmul.mubr.msk.bf16.gmra.mrb[40].mxu1 %vm1627_vm1, %v5117_v46  ;;  %4642 = vmatprep.mubr.msk.bf16.mxu0 %vm1627_vm1, %v5118_v47  ;;  %v5181_v46 = vld [vmem:[%s5413_s20 + $0x348] sm:$0xff]   ;;  %v5182_v47 = vld [vmem:[%s5413_s20 + $0x170] sm:$0xff]  }
  0x6f   : > { %4762 = vmatprep.mubr.msk.bf16.mxu1 %vm1627_vm1, %v5119_v48  ;;  %v5183_v48 = vld [vmem:[%s5413_s20 + $0x350] sm:$0xff]  }
  0x75   : > { %4643 = vmatmul.mubr.msk.bf16.gmra.mrb[44].mxu0 %vm1627_vm1, %v5120_v49  ;;  %v5636_v49 = vld [vmem:[%s6489_s3] ss:$0 sm:$0xff] }
  0x76   : > { %4763 = vmatmul.mubr.msk.bf16.gmra.mrb[44].mxu1 %vm1627_vm1, %v5121_v50  ;;  %4646 = vmatprep.mubr.msk.bf16.mxu0 %vm1627_vm1, %v5122_v51  ;;  %v3661_v51 = vld [vmem:[%s6492_s6 + $0x8] sm:$0xff] }
  0x77   : > { %4766 = vmatprep.mubr.msk.bf16.mxu1 %vm1627_vm1, %v5123_v52  ;;  %v3663_v52 = vld [vmem:[%s6492_s6 + $0x18] sm:$0xff] }
  0x7d   : > { %4647 = vmatmul.mubr.msk.bf16.gmra.mrb[48].mxu0 %vm1627_vm1, %v5124_v53  ;;  %v3660_v53 = vld [vmem:[%s6492_s6] sm:$0xff] }
  0x7e   : > { %4767 = vmatmul.mubr.msk.bf16.gmra.mrb[48].mxu1 %vm1627_vm1, %v5125_v54  ;;  %4650 = vmatprep.mubr.msk.bf16.mxu0 %vm1627_vm1, %v5126_v55 }
  0x7f   : > { %4770 = vmatprep.mubr.msk.bf16.mxu1 %vm1627_vm1, %v5127_v56 }
  0x85   : > { %4651 = vmatmul.mubr.msk.bf16.gmra.mrb[52].mxu0 %vm1627_vm1, %v5128_v57  ;;  %v5184_v57 = vld [vmem:[%s5413_s20 + $0x178] sm:$0xff]  }
  0x86   : > { %4771 = vmatmul.mubr.msk.bf16.gmra.mrb[52].mxu1 %vm1627_vm1, %v5129_v58  ;;  %4654 = vmatprep.mubr.msk.bf16.mxu0 %vm1627_vm1, %v5130_v59  ;;  %v4905_v58 = vpack.c.bf16 %v3663_v52, %v3661_v51  ;;  %v3662_v59 = vld [vmem:[%s6492_s6 + $0x10] sm:$0xff] }
  0x87   : > { %4774 = vmatprep.mubr.msk.bf16.mxu1 %vm1627_vm1, %v5131_v60 }
  0x88   : > { %4906 = vmatprep.subr.bf16.mxu0 %v4905_v58  ;;  %v5192_v58 = vld [vmem:[%s5413_s20 + $0x198] sm:$0xff]  }
  0x8d   : > { %4655 = vmatmul.mubr.msk.bf16.gmra.mrb[56].mxu0 %vm1627_vm1, %v5132_v61 }
  0x8e   : > { %4775 = vmatmul.mubr.msk.bf16.gmra.mrb[56].mxu1 %vm1627_vm1, %v5133_v62  ;;  %4658 = vmatprep.mubr.msk.bf16.mxu0 %vm1627_vm1, %v5134_v63  ;;  %v5185_v63 = vld [vmem:[%s5413_s20 + $0x358] sm:$0xff]  }
  0x8f   : > { %4778 = vmatprep.mubr.msk.bf16.mxu1 %vm1627_vm1, %v5135_v0  ;;  %v5186_v0 = vld [vmem:[%s5413_s20 + $0x180] sm:$0xff]  }
  0x95   : > { %4659 = vmatmul.mubr.msk.bf16.gmra.mrb[60].mxu0 %vm1627_vm1, %v5136_v1  ;;  %v4907_v1 = vpack.c.bf16 %v3662_v59, %v3660_v53 }
  0x96   : > { %4779 = vmatmul.mubr.msk.bf16.gmra.mrb[60].mxu1 %vm1627_vm1, %v5137_v2  ;;  %4662 = vmatprep.mubr.msk.bf16.mxu0 %vm1627_vm1, %v5138_v3 }
  0x97   : > { %4782 = vmatprep.mubr.msk.bf16.mxu1 %vm1627_vm1, %v5139_v4  ;;  %4908 = vmatpush1.bf16.msra.mxu0 %v4907_v1 }
  0x9d   : > { %4663 = vmatmul.mubr.msk.bf16.gmra.mrb[64].mxu0 %vm1627_vm1, %v5140_v5 }
  0x9e   : > { %4783 = vmatmul.mubr.msk.bf16.gmra.mrb[64].mxu1 %vm1627_vm1, %v5141_v6  ;;  %4666 = vmatprep.mubr.msk.bf16.mxu0 %vm1627_vm1, %v5142_v7  ;;  %v5187_v6 = vld [vmem:[%s5413_s20 + $0x360] sm:$0xff]  }
  0x9f   : > { %4786 = vmatprep.mubr.msk.bf16.mxu1 %vm1627_vm1, %v5143_v8 }
  0xa5   : > { %4667 = vmatmul.mubr.msk.bf16.gmra.mrb[68].mxu0 %vm1627_vm1, %v5144_v9 }
  0xa6   : > { %4787 = vmatmul.mubr.msk.bf16.gmra.mrb[68].mxu1 %vm1627_vm1, %v5145_v10  ;;  %4670 = vmatprep.mubr.msk.bf16.mxu0 %vm1627_vm1, %v5146_v11  ;;  %v3665_v11 = vld [vmem:[%s6492_s6 + $0x28] sm:$0xff] }
  0xa7   : > { %4790 = vmatprep.mubr.msk.bf16.mxu1 %vm1627_vm1, %v5147_v12  ;;  %v3667_v12 = vld [vmem:[%s6492_s6 + $0x38] sm:$0xff] }
  0xad   : > { %4671 = vmatmul.mubr.msk.bf16.gmra.mrb[72].mxu0 %vm1627_vm1, %v5148_v13 }
  0xae   : > { %4791 = vmatmul.mubr.msk.bf16.gmra.mrb[72].mxu1 %vm1627_vm1, %v5149_v14  ;;  %4674 = vmatprep.mubr.msk.bf16.mxu0 %vm1627_vm1, %v5150_v15  ;;  %v4909_v14 = vpack.c.bf16 %v3667_v12, %v3665_v11 }
  0xaf   : > { %4794 = vmatprep.mubr.msk.bf16.mxu1 %vm1627_vm1, %v5151_v16 }
  0xb0   : > { %4910 = vmatprep.subr.bf16.mxu0 %v4909_v14 }
  0xb5   : > { %4675 = vmatmul.mubr.msk.bf16.gmra.mrb[76].mxu0 %vm1627_vm1, %v5152_v17 }
  0xb6   : > { %4795 = vmatmul.mubr.msk.bf16.gmra.mrb[76].mxu1 %vm1627_vm1, %v5153_v18  ;;  %4678 = vmatprep.mubr.msk.bf16.mxu0 %vm1627_vm1, %v5154_v19 }
  0xb7   : > { %4798 = vmatprep.mubr.msk.bf16.mxu1 %vm1627_vm1, %v5155_v20 }
  0xbd   : > { %4679 = vmatmul.mubr.msk.bf16.gmra.mrb[80].mxu0 %vm1627_vm1, %v5156_v21 }
  0xbe   : > { %4799 = vmatmul.mubr.msk.bf16.gmra.mrb[80].mxu1 %vm1627_vm1, %v5157_v22  ;;  %4682 = vmatprep.mubr.msk.bf16.mxu0 %vm1627_vm1, %v5158_v23  ;;  %v5188_v22 = vld [vmem:[%s5413_s20 + $0x188] sm:$0xff]   ;;  %v3664_v23 = vld [vmem:[%s6492_s6 + $0x20] sm:$0xff] }
  0xbf   : > { %4802 = vmatprep.mubr.msk.bf16.mxu1 %vm1627_vm1, %v5159_v24  ;;  %v3666_v24 = vld [vmem:[%s6492_s6 + $0x30] sm:$0xff] }
  0xc5   : > { %4683 = vmatmul.mubr.msk.bf16.gmra.mrb[84].mxu0 %vm1627_vm1, %v5160_v25 }
  0xc6   : > { %4803 = vmatmul.mubr.msk.bf16.gmra.mrb[84].mxu1 %vm1627_vm1, %v5161_v26  ;;  %4686 = vmatprep.mubr.msk.bf16.mxu0 %vm1627_vm1, %v5162_v27 }
  0xc7   : > { %4806 = vmatprep.mubr.msk.bf16.mxu1 %vm1627_vm1, %v5163_v28 }
  0xcd   : > { %4687 = vmatmul.mubr.msk.bf16.gmra.mrb[88].mxu0 %vm1627_vm1, %v5164_v29  ;;  %v5189_v29 = vld [vmem:[%s5413_s20 + $0x368] sm:$0xff]  }
  0xce   : > { %4807 = vmatmul.mubr.msk.bf16.gmra.mrb[88].mxu1 %vm1627_vm1, %v5165_v30  ;;  %4690 = vmatprep.mubr.msk.bf16.mxu0 %vm1627_vm1, %v5166_v31  ;;  %v5190_v30 = vld [vmem:[%s5413_s20 + $0x190] sm:$0xff]   ;;  %v4911_v31 = vpack.c.bf16 %v3666_v24, %v3664_v23 }
  0xcf   : > { %4810 = vmatprep.mubr.msk.bf16.mxu1 %vm1627_vm1, %v5167_v32 }
  0xd0   : > { %4912 = vmatpush1.bf16.msra.mxu0 %v4911_v31 }
  0xd5   : > { %4691 = vmatmul.mubr.msk.bf16.gmra.mrb[92].mxu0 %vm1627_vm1, %v5168_v33 }
  0xd6   : > { %4811 = vmatmul.mubr.msk.bf16.gmra.mrb[92].mxu1 %vm1627_vm1, %v5169_v34  ;;  %4694 = vmatprep.mubr.msk.bf16.mxu0 %vm1627_vm1, %v5170_v35 }
  0xd7   : > { %4814 = vmatprep.mubr.msk.bf16.mxu1 %vm1627_vm1, %v5171_v36 }
  0xdd   : > { %4695 = vmatmul.mubr.msk.bf16.gmra.mrb[96].mxu0 %vm1627_vm1, %v5172_v37  ;;  %v5191_v37 = vld [vmem:[%s5413_s20 + $0x370] sm:$0xff]  }
  0xde   : > { %4815 = vmatmul.mubr.msk.bf16.gmra.mrb[96].mxu1 %vm1627_vm1, %v5173_v38  ;;  %4698 = vmatprep.mubr.msk.bf16.mxu0 %vm1627_vm1, %v5174_v39 }
  0xdf   : > { %4818 = vmatprep.mubr.msk.bf16.mxu1 %vm1627_vm1, %v5175_v40 }
  0xe5   : > { %4699 = vmatmul.mubr.msk.bf16.gmra.mrb[100].mxu0 %vm1627_vm1, %v5176_v41 }
  0xe6   : > { %4819 = vmatmul.mubr.msk.bf16.gmra.mrb[100].mxu1 %vm1627_vm1, %v5177_v42  ;;  %4702 = vmatprep.mubr.msk.bf16.mxu0 %vm1627_vm1, %v5178_v43 }
  0xe7   : > { %4822 = vmatprep.mubr.msk.bf16.mxu1 %vm1627_vm1, %v5179_v44 }
  0xed   : > { %4703 = vmatmul.mubr.msk.bf16.gmra.mrb[104].mxu0 %vm1627_vm1, %v5180_v45 }
  0xee   : > { %4823 = vmatmul.mubr.msk.bf16.gmra.mrb[104].mxu1 %vm1627_vm1, %v5181_v46  ;;  %4706 = vmatprep.mubr.msk.bf16.mxu0 %vm1627_vm1, %v5182_v47 }
  0xef   : > { %4826 = vmatprep.mubr.msk.bf16.mxu1 %vm1627_vm1, %v5183_v48 }
  0xf0   : > { %v4596_v50 = vpop.f32.mrb[0].mxu0 }
  0xf1   : > { %v5649_v54 = vpop.f32.mrb[0].mxu1  ;;  %v582_v55 = vadd.f32 %v4596_v50, %v5636_v49  ;;  %v573_v56 = vpop.f32.mrb[1].mxu0 }
  0xf2   : > { %v5656_v60 = vpop.f32.mrb[1].mxu1  ;;  %v574_v61 = vadd.f32 %v5636_v49, %v573_v56  ;;  %v4597_v62 = vpop.f32.mrb[2].mxu0 }
  0xf3   : > { %v5661_v2 = vpop.f32.mrb[2].mxu1  ;;  %v638_v3 = vmax.f32 %v582_v55, 0.0  ;;  %v585_v4 = vadd.f32 %v4597_v62, %v5636_v49  ;;  %v576_v5 = vpop.f32.mrb[3].mxu0 }
  0xf4   : > { %v5665_v7 = vpop.f32.mrb[3].mxu1  ;;  %v636_v8 = vmax.f32 %v574_v61, 0.0  ;;  %v577_v9 = vadd.f32 %v5636_v49, %v576_v5 }
  0xf5   : > { %v639_v10 = vmax.f32 %v585_v4, 0.0  ;;  %4707 = vmatmul.mubr.msk.bf16.gmra.mrb[108].mxu0 %vm1627_vm1, %v5184_v57 }
  0xf6   : > { %4827 = vmatmul.mubr.msk.bf16.gmra.mrb[108].mxu1 %vm1627_vm1, %v5185_v63  ;;  %v637_v13 = vmax.f32 %v577_v9, 0.0  ;;  %4710 = vmatprep.mubr.msk.bf16.mxu0 %vm1627_vm1, %v5186_v0  ;;  %v5193_v0 = vld [vmem:[%s5413_s20 + $0x378] sm:$0xff]  }
  0xf7   : > { %v659_v15 = vadd.f32 %v639_v10, %v638_v3  ;;  %4830 = vmatprep.mubr.msk.bf16.mxu1 %vm1627_vm1, %v5187_v6 }
  0xf8   : > { %v652_v16 = vadd.f32 %v637_v13, %v636_v8  ;;  %v4600_v17 = vpop.f32.mrb[4].mxu0  ;;  %v5194_v8 = vld [vmem:[%s5413_s20 + $0x380] sm:$0xff]  }
  0xf9   : > { %v660_v18 = vrot.slane %v659_v15, 4  ;;  %v598_v19 = vadd.f32 %v4600_v17, %v5636_v49  ;;  %v5679_v20 = vpop.f32.mrb[4].mxu1  ;;  %v589_v21 = vpop.f32.mrb[5].mxu0  ;;  %v3668_v17 = vld [vmem:[%s6492_s6 + $0x40] sm:$0xff] }
  0xfa   : > { %v653_v25 = vrot.slane %v652_v16, 4  ;;  %v590_v26 = vadd.f32 %v5636_v49, %v589_v21  ;;  %v5689_v27 = vpop.f32.mrb[5].mxu1  ;;  %v4601_v28 = vpop.f32.mrb[6].mxu0 }
  0xfb   : > { %v661_v32 = vadd.f32 %v660_v18, %v659_v15  ;;  %v642_v33 = vmax.f32 %v598_v19, 0.0  ;;  %v601_v34 = vadd.f32 %v4601_v28, %v5636_v49  ;;  %v5694_v35 = vpop.f32.mrb[6].mxu1  ;;  %v592_v36 = vpop.f32.mrb[7].mxu0  ;;  %v3669_v15 = vld [vmem:[%s6492_s6 + $0x48] sm:$0xff] }
  0xfc   : > { %v654_v38 = vadd.f32 %v653_v25, %v652_v16  ;;  %v5697_v39 = vpop.f32.mrb[7].mxu1  ;;  %v640_v41 = vmax.f32 %v590_v26, 0.0  ;;  %v593_v43 = vadd.f32 %v5636_v49, %v592_v36  ;;  %v3671_v16 = vld [vmem:[%s6492_s6 + $0x58] sm:$0xff] }
  0xfd   : > { %v662_v40 = vrot.slane %v661_v32, 2  ;;  %v643_v42 = vmax.f32 %v601_v34, 0.0  ;;  %4711 = vmatmul.mubr.msk.bf16.gmra.mrb[112].mxu0 %vm1627_vm1, %v5188_v22  ;;  %v3670_v22 = vld [vmem:[%s6492_s6 + $0x50] sm:$0xff] }
  0xfe   : > { %v655_v44 = vrot.slane %v654_v38, 2  ;;  %4831 = vmatmul.mubr.msk.bf16.gmra.mrb[112].mxu1 %vm1627_vm1, %v5189_v29  ;;  %4714 = vmatprep.mubr.msk.bf16.mxu0 %vm1627_vm1, %v5190_v30  ;;  %v641_v47 = vmax.f32 %v593_v43, 0.0  ;;  %v4913_v29 = vpack.c.bf16 %v3671_v16, %v3669_v15  ;;  %v4915_v30 = vpack.c.bf16 %v3670_v22, %v3668_v17  ;;  %v5195_v43 = vld [vmem:[%s5413_s20 + $0x388] sm:$0xff]  }
  0xff   : > { %v663_v45 = vadd.f32 %v662_v40, %v661_v32  ;;  %v673_v46 = vadd.f32 %v643_v42, %v642_v33  ;;  %4834 = vmatprep.mubr.msk.bf16.mxu1 %vm1627_vm1, %v5191_v37 }
 0x100   : > { %v656_v48 = vadd.f32 %v655_v44, %v654_v38  ;;  %v4604_v50 = vpop.f32.mrb[8].mxu0  ;;  %v666_v53 = vadd.f32 %v641_v47, %v640_v41  ;;  %4914 = vmatprep.subr.bf16.mxu0 %v4913_v29 }
 0x101   : > { %v664_v51 = vrot.slane %v663_v45, 1  ;;  %v674_v52 = vrot.slane %v673_v46, 4  ;;  %v614_v55 = vadd.f32 %v4604_v50, %v5636_v49  ;;  %v5705_v56 = vpop.f32.mrb[8].mxu1  ;;  %v605_v57 = vpop.f32.mrb[9].mxu0  ;;  %4916 = vmatpush1.bf16.msra.mxu0 %v4915_v30 }
 0x102   : > { %v657_v59 = vrot.slane %v656_v48, 1  ;;  %v606_v61 = vadd.f32 %v5636_v49, %v605_v57  ;;  %v5709_v62 = vpop.f32.mrb[9].mxu1  ;;  %v4605_v63 = vpop.f32.mrb[10].mxu0  ;;  %v667_v4 = vrot.slane %v666_v53, 4 }
 0x103   : > { %v665_v1 = vadd.f32 %v664_v51, %v663_v45  ;;  %v675_v3 = vadd.f32 %v674_v52, %v673_v46  ;;  %v5712_v5 = vpop.f32.mrb[10].mxu1  ;;  %v608_v6 = vpop.f32.mrb[11].mxu0  ;;  %v646_v13 = vmax.f32 %v614_v55, 0.0  ;;  %v617_v14 = vadd.f32 %v4605_v63, %v5636_v49 }
 0x104   : > { %v658_v9 = vadd.f32 %v657_v59, %v656_v48  ;;  %v5715_v10 = vpop.f32.mrb[11].mxu1  ;;  %v668_v12 = vadd.f32 %v667_v4, %v666_v53  ;;  %v644_v19 = vmax.f32 %v606_v61, 0.0  ;;  %v609_v21 = vadd.f32 %v5636_v49, %v608_v6  ;;  %v5196_v48 = vld [vmem:[%s5413_s20 + $0x390] sm:$0xff]  }
 0x105   : > { %v676_v11 = vrot.slane %v675_v3, 2  ;;  %4715 = vmatmul.mubr.msk.bf16.gmra.mrb[116].mxu0 %vm1627_vm1, %v5192_v58  ;;  %v647_v25 = vmax.f32 %v617_v14, 0.0 }
 0x106   : > { %v3630_v18 = vsel %vm3629_vm2, %v665_v1, %v658_v9  ;;  %4835 = vmatmul.mubr.msk.bf16.gmra.mrb[116].mxu1 %vm1627_vm1, %v5193_v0  ;;  %v669_v24 = vrot.slane %v668_v12, 2  ;;  %v645_v26 = vmax.f32 %v609_v21, 0.0  ;;  %v5197_v21 = vld [vmem:[%s5413_s20 + $0x398] sm:$0xff]  }
 0x107   : > { %v677_v23 = vadd.f32 %v676_v11, %v675_v3  ;;  %4838 = vmatprep.mubr.msk.bf16.mxu1 %vm1627_vm1, %v5194_v8  ;;  %v687_v33 = vadd.f32 %v647_v25, %v646_v13  ;;  %v5756_v11 = vld [vmem:[%s6491_s5] ss:$0 sm:$0xff] }
 0x108   : > { %v4608_v28 = vpop.f32.mrb[12].mxu0  ;;  %v670_v32 = vadd.f32 %v669_v24, %v668_v12  ;;  %v680_v38 = vadd.f32 %v645_v26, %v644_v19  ;;  %v5198_v26 = vld [vmem:[%s5413_s20 + $0x3a0] sm:$0xff]  }
 0x109   : > { %v678_v31 = vrot.slane %v677_v23, 1  ;;  %v630_v34 = vadd.f32 %v4608_v28, %v5636_v49  ;;  %v5736_v36 = vpop.f32.mrb[12].mxu1  ;;  %v621_v37 = vpop.f32.mrb[13].mxu0  ;;  %v688_v45 = vrot.slane %v687_v33, 4 }
 0x10a   : > { %v622_v40 = vadd.f32 %v5636_v49, %v621_v37  ;;  %v5739_v41 = vpop.f32.mrb[13].mxu1  ;;  %v4609_v42 = vpop.f32.mrb[14].mxu0  ;;  %v671_v44 = vrot.slane %v670_v32, 1  ;;  %v681_v51 = vrot.slane %v680_v38, 4 }
 0x10b   : > { %v5742_v46 = vpop.f32.mrb[14].mxu1  ;;  %v624_v47 = vpop.f32.mrb[15].mxu0  ;;  %v679_v50 = vadd.f32 %v678_v31, %v677_v23  ;;  %v689_v55 = vadd.f32 %v688_v45, %v687_v33  ;;  %v650_v57 = vmax.f32 %v630_v34, 0.0  ;;  %v633_v58 = vadd.f32 %v4609_v42, %v5636_v49  ;;  %v3675_v33 = vld [vmem:[%s6492_s6 + $0x78] sm:$0xff] }
 0x10c   : > { %v5745_v52 = vpop.f32.mrb[15].mxu1  ;;  %v672_v53 = vadd.f32 %v671_v44, %v670_v32  ;;  %v682_v59 = vadd.f32 %v681_v51, %v680_v38  ;;  %v648_v61 = vmax.f32 %v622_v40, 0.0  ;;  %v625_v63 = vadd.f32 %v5636_v49, %v624_v47  ;;  %v3673_v32 = vld [vmem:[%s6492_s6 + $0x68] sm:$0xff] }
 0x10d   : > { %v690_v1 = vrot.slane %v689_v55, 2  ;;  %v651_v3 = vmax.f32 %v633_v58, 0.0  ;;  %v4917_v47 = vpack.c.bf16 %v3675_v33, %v3673_v32 }
 0x10e   : > { %4839 = vmatmul.mubr.msk.bf16.gmra.mrb[120].mxu1 %vm1627_vm1, %v5195_v43  ;;  %v3632_v0 = vsel %vm3631_vm3, %v672_v53, %v3630_v18  ;;  %v683_v4 = vrot.slane %v682_v59, 2  ;;  %v649_v6 = vmax.f32 %v625_v63, 0.0 }
 0x10f   : > { %4842 = vmatprep.mubr.msk.bf16.mxu1 %vm1627_vm1, %v5196_v48  ;;  %v3634_v9 = vsel %vm3633_vm4, %v679_v50, %v3632_v0  ;;  %v691_v49 = vadd.f32 %v690_v1, %v689_v55  ;;  %v701_v12 = vadd.f32 %v651_v3, %v650_v57  ;;  %4918 = vmatprep.subr.bf16.mxu0 %v4917_v47 }
 0x110   : > { %v4616_v8 = vpop.f32.mrb[16].mxu0  ;;  %v684_v15 = vadd.f32 %v683_v4, %v682_v59  ;;  %v694_v16 = vadd.f32 %v649_v6, %v648_v61 }
 0x111   : > { %v5758_v13 = vpop.f32.mrb[16].mxu1  ;;  %v2046_v14 = vpop.f32.mrb[17].mxu0  ;;  %v692_v22 = vrot.slane %v691_v49, 1  ;;  %v702_v23 = vrot.slane %v701_v12, 4  ;;  %v2055_v30 = vadd.f32 %v4616_v8, %v5756_v11  ;;  %v5199_v8 = vld [vmem:[%s5413_s20 + $0x3a8] sm:$0xff]  }
 0x112   : > { %v2047_v17 = vadd.f32 %v5756_v11, %v2046_v14  ;;  %v5761_v18 = vpop.f32.mrb[17].mxu1  ;;  %v4617_v19 = vpop.f32.mrb[18].mxu0  ;;  %v685_v28 = vrot.slane %v684_v15, 1  ;;  %v695_v29 = vrot.slane %v694_v16, 4  ;;  %v5200_v14 = vld [vmem:[%s5413_s20 + $0x3b0] sm:$0xff]  }
 0x113   : > { %v5764_v24 = vpop.f32.mrb[18].mxu1  ;;  %v2049_v25 = vpop.f32.mrb[19].mxu0  ;;  %v693_v34 = vadd.f32 %v692_v22, %v691_v49  ;;  %v703_v37 = vadd.f32 %v702_v23, %v701_v12  ;;  %v2058_v43 = vadd.f32 %v4617_v19, %v5756_v11  ;;  %v3071_v50 = vmax.f32 %v2055_v30, 0.0 }
 0x114   : > { %v5768_v31 = vpop.f32.mrb[19].mxu1  ;;  %v3069_v38 = vmax.f32 %v2047_v17, 0.0  ;;  %v686_v40 = vadd.f32 %v685_v28, %v684_v15  ;;  %v696_v42 = vadd.f32 %v695_v29, %v694_v16  ;;  %v2050_v44 = vadd.f32 %v5756_v11, %v2049_v25 }
 0x115   : > { %v704_v45 = vrot.slane %v703_v37, 2  ;;  %v3072_v0 = vmax.f32 %v2058_v43, 0.0 }
 0x116   : > { %4843 = vmatmul.mubr.msk.bf16.gmra.mrb[124].mxu1 %vm1627_vm1, %v5197_v21  ;;  %v697_v48 = vrot.slane %v696_v42, 2  ;;  %v3070_v51 = vmax.f32 %v2050_v44, 0.0  ;;  %v3636_v55 = vsel %vm3635_vm5, %v686_v40, %v3634_v9  ;;  %v5201_v40 = vld [vmem:[%s5413_s20 + $0x3b8] sm:$0xff]  }
 0x117   : > { %4846 = vmatprep.mubr.msk.bf16.mxu1 %vm1627_vm1, %v5198_v26  ;;  %v705_v57 = vadd.f32 %v704_v45, %v703_v37  ;;  %v3638_v61 = vsel %vm3637_vm6, %v693_v34, %v3636_v55  ;;  %v3677_v55 = vld [vmem:[%s6492_s6 + $0x88] sm:$0xff] }
 0x118   : > { %v4620_v53 = vpop.f32.mrb[20].mxu0  ;;  %v698_v63 = vadd.f32 %v697_v48, %v696_v42  ;;  %v3325_v1 = vadd.f32 %v3070_v51, %v3069_v38  ;;  %v5202_v42 = vld [vmem:[%s5413_s20 + $0x3c0] sm:$0xff]  }
 0x119   : > { %v5781_v58 = vpop.f32.mrb[20].mxu1  ;;  %v2062_v59 = vpop.f32.mrb[21].mxu0  ;;  %v706_v49 = vrot.slane %v705_v57, 1  ;;  %v2071_v17 = vadd.f32 %v4620_v53, %v5756_v11  ;;  %v3672_v51 = vld [vmem:[%s6492_s6 + $0x60] sm:$0xff]  ;;  %v3674_v53 = vld [vmem:[%s6492_s6 + $0x70] sm:$0xff] }
 0x11a   : > { %v2063_v3 = vadd.f32 %v5756_v11, %v2062_v59  ;;  %v5785_v4 = vpop.f32.mrb[21].mxu1  ;;  %v4621_v6 = vpop.f32.mrb[22].mxu0  ;;  %v699_v15 = vrot.slane %v698_v63, 1  ;;  %v3326_v16 = vadd.f32 %v3325_v1, %v3071_v50  ;;  %v3676_v1 = vld [vmem:[%s6492_s6 + $0x80] sm:$0xff] }
 0x11b   : > { %v5788_v12 = vpop.f32.mrb[22].mxu1  ;;  %v2065_v9 = vpop.f32.mrb[23].mxu0  ;;  %v707_v22 = vadd.f32 %v706_v49, %v705_v57  ;;  %v2074_v26 = vadd.f32 %v4621_v6, %v5756_v11  ;;  %v3075_v29 = vmax.f32 %v2071_v17, 0.0 }
 0x11c   : > { %v3073_v19 = vmax.f32 %v2063_v3, 0.0  ;;  %v5792_v21 = vpop.f32.mrb[23].mxu1  ;;  %v700_v23 = vadd.f32 %v699_v15, %v698_v63  ;;  %v3327_v25 = vadd.f32 %v3326_v16, %v3072_v0  ;;  %v2066_v28 = vadd.f32 %v5756_v11, %v2065_v9  ;;  %v3679_v0 = vld [vmem:[%s6492_s6 + $0x98] sm:$0xff]  ;;  %v3678_v3 = vld [vmem:[%s6492_s6 + $0x90] sm:$0xff] }
 0x11d   : > { %v3076_v44 = vmax.f32 %v2074_v26, 0.0  ;;  %v4919_v63 = vpack.c.bf16 %v3674_v53, %v3672_v51  ;;  %v5203_v51 = vld [vmem:[%s5413_s20 + $0x3c8] sm:$0xff]  }
 0x11e   : > { %4847 = vmatmul.mubr.msk.bf16.gmra.mrb[128].mxu1 %vm1627_vm1, %v5199_v8  ;;  %v3328_v30 = vadd.f32 %v3327_v25, %v3073_v19  ;;  %v3074_v32 = vmax.f32 %v2066_v28, 0.0  ;;  %v3640_v34 = vsel %vm3639_vm7, %v700_v23, %v3638_v61  ;;  %v4923_v23 = vpack.c.bf16 %v3678_v3, %v3676_v1 }
 0x11f   : > { %4850 = vmatprep.mubr.msk.bf16.mxu1 %vm1627_vm1, %v5200_v14  ;;  %v5802_v43 = vsel %vm3641_vm8, %v707_v22, %v3640_v34  ;;  %4920 = vmatpush1.bf16.msra.mxu0 %v4919_v63  ;;  %v4921_v22 = vpack.c.bf16 %v3679_v0, %v3677_v55  ;;  %v5204_v63 = vld [vmem:[%s5413_s20 + $0x3d0] sm:$0xff]  }
 0x120   : > { %v4624_v33 = vpop.f32.mrb[24].mxu0  ;;  %v3329_v45 = vadd.f32 %v3328_v30, %v3074_v32 }
 0x121   : > { %v4744_v37 = vpop.f32.mrb[24].mxu1  ;;  %v2078_v38 = vpop.f32.mrb[25].mxu0  ;;  %v2087_v8 = vadd.f32 %v4624_v33, %v5756_v11  ;;  %4922 = vmatprep.subr.bf16.mxu0 %v4921_v22 }
 0x122   : > { %v2079_v47 = vadd.f32 %v5756_v11, %v2078_v38  ;;  %v2558_v48 = vpop.f32.mrb[25].mxu1  ;;  %v4625_v50 = vpop.f32.mrb[26].mxu0  ;;  %v3330_v6 = vadd.f32 %v3329_v45, %v3075_v29  ;;  %v2567_v14 = vadd.f32 %v4744_v37, %v5756_v11 }
 0x123   : > { %v2559_v57 = vadd.f32 %v5756_v11, %v2558_v48  ;;  %v4745_v59 = vpop.f32.mrb[26].mxu1  ;;  %v2081_v61 = vpop.f32.mrb[27].mxu0  ;;  %v2090_v19 = vadd.f32 %v4625_v50, %v5756_v11  ;;  %v3079_v30 = vmax.f32 %v2087_v8, 0.0  ;;  %4924 = vmatpush1.bf16.msra.mxu0 %v4923_v23  ;;  %v3681_v23 = vld [vmem:[%s6492_s6 + $0xa8] sm:$0xff] }
 0x124   : > { %v3077_v49 = vmax.f32 %v2079_v47, 0.0  ;;  %v2561_v9 = vpop.f32.mrb[27].mxu1  ;;  %v2082_v15 = vadd.f32 %v5756_v11, %v2081_v61  ;;  %v3331_v17 = vadd.f32 %v3330_v6, %v3076_v44  ;;  %v2570_v26 = vadd.f32 %v4745_v59, %v5756_v11 }
 0x125   : > { %v2562_v16 = vadd.f32 %v5756_v11, %v2561_v9  ;;  %v3197_v25 = vmax.f32 %v2559_v57, 0.0  ;;  %v3199_v34 = vmax.f32 %v2567_v14, 0.0 }
 0x126   : > { %4851 = vmatmul.mubr.msk.bf16.gmra.mrb[132].mxu1 %vm1627_vm1, %v5201_v40  ;;  %v3078_v28 = vmax.f32 %v2082_v15, 0.0  ;;  %v3332_v32 = vadd.f32 %v3331_v17, %v3077_v49  ;;  %v3080_v40 = vmax.f32 %v2090_v19, 0.0  ;;  %v3200_v53 = vmax.f32 %v2570_v26, 0.0  ;;  %v3680_v26 = vld [vmem:[%s6492_s6 + $0xa0] sm:$0xff] }
 0x127   : > { %v3198_v29 = vmax.f32 %v2562_v16, 0.0  ;;  %4854 = vmatprep.mubr.msk.bf16.mxu1 %vm1627_vm1, %v5202_v42 }
 0x128   : > { %v4628_v33 = vpop.f32.mrb[28].mxu0  ;;  %v3333_v45 = vadd.f32 %v3332_v32, %v3078_v28 }
 0x129   : > { %v3473_v37 = vadd.f32 %v3198_v29, %v3197_v25  ;;  %v4748_v38 = vpop.f32.mrb[28].mxu1  ;;  %v2094_v44 = vpop.f32.mrb[29].mxu0  ;;  %v2103_v42 = vadd.f32 %v4628_v33, %v5756_v11  ;;  %v3683_v25 = vld [vmem:[%s6492_s6 + $0xb8] sm:$0xff] }
 0x12a   : > { %v2095_v47 = vadd.f32 %v5756_v11, %v2094_v44  ;;  %v2574_v48 = vpop.f32.mrb[29].mxu1  ;;  %v4629_v50 = vpop.f32.mrb[30].mxu0  ;;  %v3334_v0 = vadd.f32 %v3333_v45, %v3079_v30  ;;  %v2583_v6 = vadd.f32 %v4748_v38, %v5756_v11  ;;  %v4925_v33 = vpack.c.bf16 %v3683_v25, %v3681_v23 }
 0x12b   : > { %v3474_v55 = vadd.f32 %v3473_v37, %v3199_v34  ;;  %v2575_v57 = vadd.f32 %v5756_v11, %v2574_v48  ;;  %v4749_v59 = vpop.f32.mrb[30].mxu1  ;;  %v2097_v61 = vpop.f32.mrb[31].mxu0  ;;  %v2106_v15 = vadd.f32 %v4629_v50, %v5756_v11  ;;  %v3083_v17 = vmax.f32 %v2103_v42, 0.0  ;;  %v3682_v34 = vld [vmem:[%s6492_s6 + $0xb0] sm:$0xff] }
 0x12c   : > { %v3081_v1 = vmax.f32 %v2095_v47, 0.0  ;;  %v2577_v3 = vpop.f32.mrb[31].mxu1  ;;  %v2098_v9 = vadd.f32 %v5756_v11, %v2097_v61  ;;  %v3335_v14 = vadd.f32 %v3334_v0, %v3080_v40  ;;  %v2586_v29 = vadd.f32 %v4749_v59, %v5756_v11  ;;  %4926 = vmatprep.subr.bf16.mxu0 %v4925_v33  ;;  %v3687_v33 = vld [vmem:[%s6492_s6 + $0xd8] sm:$0xff] }
 0x12d   : > { %v3201_v8 = vmax.f32 %v2575_v57, 0.0  ;;  %v3475_v49 = vadd.f32 %v3474_v55, %v3200_v53  ;;  %v2578_v16 = vadd.f32 %v5756_v11, %v2577_v3  ;;  %v3203_v37 = vmax.f32 %v2583_v6, 0.0  ;;  %v5205_v55 = vld [vmem:[%s5413_s20 + $0x3d8] sm:$0xff]  }
 0x12e   : > { %4855 = vmatmul.mubr.msk.bf16.gmra.mrb[136].mxu1 %vm1627_vm1, %v5203_v51  ;;  %v3082_v22 = vmax.f32 %v2098_v9, 0.0  ;;  %v3336_v28 = vadd.f32 %v3335_v14, %v3081_v1  ;;  %v4927_v40 = vpack.c.bf16 %v3682_v34, %v3680_v26  ;;  %v3084_v45 = vmax.f32 %v2106_v15, 0.0  ;;  %v3684_v34 = vld [vmem:[%s6492_s6 + $0xc0] sm:$0xff] }
 0x12f   : > { %v3476_v19 = vadd.f32 %v3475_v49, %v3201_v8  ;;  %4858 = vmatprep.mubr.msk.bf16.mxu1 %vm1627_vm1, %v5204_v63  ;;  %v3202_v30 = vmax.f32 %v2578_v16, 0.0  ;;  %v5206_v63 = vld [vmem:[%s5413_s20 + $0x3e0] sm:$0xff]   ;;  %v3204_v0 = vmax.f32 %v2586_v29, 0.0 }
 0x130   : > { %v4632_v32 = vpop.f32.mrb[32].mxu0  ;;  %v3337_v47 = vadd.f32 %v3336_v28, %v3082_v22  ;;  %4928 = vmatpush1.bf16.msra.mxu0 %v4927_v40 }
 0x131   : > { %v4752_v38 = vpop.f32.mrb[32].mxu1  ;;  %v2110_v44 = vpop.f32.mrb[33].mxu0  ;;  %v3477_v48 = vadd.f32 %v3476_v19, %v3202_v30  ;;  %v2119_v42 = vadd.f32 %v4632_v32, %v5756_v11  ;;  %v3685_v32 = vld [vmem:[%s6492_s6 + $0xc8] sm:$0xff] }
 0x132   : > { %v2111_v50 = vadd.f32 %v5756_v11, %v2110_v44  ;;  %v2590_v51 = vpop.f32.mrb[33].mxu1  ;;  %v4633_v53 = vpop.f32.mrb[34].mxu0  ;;  %v3338_v1 = vadd.f32 %v3337_v47, %v3083_v17  ;;  %v2599_v49 = vadd.f32 %v4752_v38, %v5756_v11  ;;  %v4929_v40 = vpack.c.bf16 %v3687_v33, %v3685_v32 }
 0x133   : > { %v2591_v57 = vadd.f32 %v5756_v11, %v2590_v51  ;;  %v4753_v59 = vpop.f32.mrb[34].mxu1  ;;  %v2113_v61 = vpop.f32.mrb[35].mxu0  ;;  %v3478_v3 = vadd.f32 %v3477_v48, %v3203_v37  ;;  %v2122_v19 = vadd.f32 %v4633_v53, %v5756_v11  ;;  %v3087_v23 = vmax.f32 %v2119_v42, 0.0  ;;  %v5207_v42 = vld [vmem:[%s5413_s20 + $0x3e8] sm:$0xff]  }
 0x134   : > { %v3085_v6 = vmax.f32 %v2111_v50, 0.0  ;;  %v2593_v8 = vpop.f32.mrb[35].mxu1  ;;  %v2114_v14 = vadd.f32 %v5756_v11, %v2113_v61  ;;  %v3339_v15 = vadd.f32 %v3338_v1, %v3084_v45  ;;  %v2602_v28 = vadd.f32 %v4753_v59, %v5756_v11  ;;  %v3686_v45 = vld [vmem:[%s6492_s6 + $0xd0] sm:$0xff]  ;;  %4930 = vmatprep.subr.bf16.mxu0 %v4929_v40 }
 0x135   : > { %v3205_v9 = vmax.f32 %v2591_v57, 0.0  ;;  %v3479_v16 = vadd.f32 %v3478_v3, %v3204_v0  ;;  %v2594_v22 = vadd.f32 %v5756_v11, %v2593_v8  ;;  %v3207_v37 = vmax.f32 %v2599_v49, 0.0  ;;  %v5208_v0 = vld [vmem:[%s5413_s20 + $0x3f0] sm:$0xff]  }
 0x136   : > { %4859 = vmatmul.mubr.msk.bf16.gmra.mrb[140].mxu1 %vm1627_vm1, %v5205_v55  ;;  %v3086_v25 = vmax.f32 %v2114_v14, 0.0  ;;  %v3340_v17 = vadd.f32 %v3339_v15, %v3085_v6  ;;  %v3088_v47 = vmax.f32 %v2122_v19, 0.0  ;;  %v4931_v1 = vpack.c.bf16 %v3686_v45, %v3684_v34 }
 0x137   : > { %4862 = vmatprep.mubr.msk.bf16.mxu1 %vm1627_vm1, %v5206_v63  ;;  %v3480_v26 = vadd.f32 %v3479_v16, %v3205_v9  ;;  %v3206_v29 = vmax.f32 %v2594_v22, 0.0  ;;  %v3208_v3 = vmax.f32 %v2602_v28, 0.0 }
 0x138   : > { %v4636_v30 = vpop.f32.mrb[36].mxu0  ;;  %v3341_v48 = vadd.f32 %v3340_v17, %v3086_v25  ;;  %4932 = vmatpush1.bf16.msra.mxu0 %v4931_v1 }
 0x139   : > { %v4756_v38 = vpop.f32.mrb[36].mxu1  ;;  %v2126_v44 = vpop.f32.mrb[37].mxu0  ;;  %v3481_v50 = vadd.f32 %v3480_v26, %v3206_v29  ;;  %v2135_v57 = vadd.f32 %v4636_v30, %v5756_v11 }
 0x13a   : > { %v2127_v51 = vadd.f32 %v5756_v11, %v2126_v44  ;;  %v2606_v53 = vpop.f32.mrb[37].mxu1  ;;  %v4637_v55 = vpop.f32.mrb[38].mxu0  ;;  %v3342_v6 = vadd.f32 %v3341_v48, %v3087_v23  ;;  %v2615_v14 = vadd.f32 %v4756_v38, %v5756_v11 }
 0x13b   : > { %v2607_v59 = vadd.f32 %v5756_v11, %v2606_v53  ;;  %v4757_v61 = vpop.f32.mrb[38].mxu1  ;;  %v2129_v63 = vpop.f32.mrb[39].mxu0  ;;  %v3482_v8 = vadd.f32 %v3481_v50, %v3207_v37  ;;  %v2138_v25 = vadd.f32 %v4637_v55, %v5756_v11  ;;  %v3091_v26 = vmax.f32 %v2135_v57, 0.0 }
 0x13c   : > { %v3089_v49 = vmax.f32 %v2127_v51, 0.0  ;;  %v2609_v9 = vpop.f32.mrb[39].mxu1  ;;  %v2130_v16 = vadd.f32 %v5756_v11, %v2129_v63  ;;  %v3343_v19 = vadd.f32 %v3342_v6, %v3088_v47  ;;  %v2618_v30 = vadd.f32 %v4757_v61, %v5756_v11  ;;  %v5209_v51 = vld [vmem:[%s5413_s20 + $0x3f8] sm:$0xff]  }
 0x13d   : > { %v3209_v15 = vmax.f32 %v2607_v59, 0.0  ;;  %v3483_v22 = vadd.f32 %v3482_v8, %v3208_v3  ;;  %v2610_v17 = vadd.f32 %v5756_v11, %v2609_v9  ;;  %v3211_v34 = vmax.f32 %v2615_v14, 0.0  ;;  %v3689_v3 = vld [vmem:[%s6492_s6 + $0xe8] sm:$0xff]  ;;  %v3691_v6 = vld [vmem:[%s6492_s6 + $0xf8] sm:$0xff]  ;;  %v3688_v8 = vld [vmem:[%s6492_s6 + $0xe0] sm:$0xff] }
 0x13e   : > { %4863 = vmatmul.mubr.msk.bf16.gmra.mrb[144].mxu1 %vm1627_vm1, %v5207_v42  ;;  %v3090_v28 = vmax.f32 %v2130_v16, 0.0  ;;  %v3344_v23 = vadd.f32 %v3343_v19, %v3089_v49  ;;  %v3092_v44 = vmax.f32 %v2138_v25, 0.0  ;;  %v3212_v59 = vmax.f32 %v2618_v30, 0.0  ;;  %v3690_v16 = vld [vmem:[%s6492_s6 + $0xf0] sm:$0xff] }
 0x13f   : > { %4866 = vmatprep.mubr.msk.bf16.mxu1 %vm1627_vm1, %v5208_v0  ;;  %v3484_v29 = vadd.f32 %v3483_v22, %v3209_v15  ;;  %v3210_v32 = vmax.f32 %v2610_v17, 0.0  ;;  %v4933_v17 = vpack.c.bf16 %v3691_v6, %v3689_v3 }
 0x140   : > { %v4640_v33 = vpop.f32.mrb[40].mxu0  ;;  %v3345_v40 = vadd.f32 %v3344_v23, %v3090_v28  ;;  %v4935_v23 = vpack.c.bf16 %v3690_v16, %v3688_v8 }
 0x141   : > { %v4760_v37 = vpop.f32.mrb[40].mxu1  ;;  %v2142_v38 = vpop.f32.mrb[41].mxu0  ;;  %v3485_v45 = vadd.f32 %v3484_v29, %v3210_v32  ;;  %v2151_v53 = vadd.f32 %v4640_v33, %v5756_v11  ;;  %4934 = vmatprep.subr.bf16.mxu0 %v4933_v17 }
 0x142   : > { %v2143_v47 = vadd.f32 %v5756_v11, %v2142_v38  ;;  %v2622_v48 = vpop.f32.mrb[41].mxu1  ;;  %v4641_v50 = vpop.f32.mrb[42].mxu0  ;;  %v3346_v61 = vadd.f32 %v3345_v40, %v3091_v26  ;;  %v2631_v49 = vadd.f32 %v4760_v37, %v5756_v11  ;;  %4936 = vmatpush1.bf16.msra.mxu0 %v4935_v23 }
 0x143   : > { %v2623_v55 = vadd.f32 %v5756_v11, %v2622_v48  ;;  %v4761_v42 = vpop.f32.mrb[42].mxu1  ;;  %v2145_v57 = vpop.f32.mrb[43].mxu0  ;;  %v3486_v63 = vadd.f32 %v3485_v45, %v3211_v34  ;;  %v2154_v14 = vadd.f32 %v4641_v50, %v5756_v11  ;;  %v3095_v26 = vmax.f32 %v2151_v53, 0.0 }
 0x144   : > { %v3093_v0 = vmax.f32 %v2143_v47, 0.0  ;;  %v2625_v1 = vpop.f32.mrb[43].mxu1  ;;  %v2146_v15 = vadd.f32 %v5756_v11, %v2145_v57  ;;  %v3347_v19 = vadd.f32 %v3346_v61, %v3092_v44  ;;  %v2634_v32 = vadd.f32 %v4761_v42, %v5756_v11 }
 0x145   : > { %v3213_v9 = vmax.f32 %v2623_v55, 0.0  ;;  %v3487_v22 = vadd.f32 %v3486_v63, %v3212_v59  ;;  %v2626_v25 = vadd.f32 %v5756_v11, %v2625_v1  ;;  %v3215_v37 = vmax.f32 %v2631_v49, 0.0 }
 0x146   : > { %4867 = vmatmul.mubr.msk.bf16.gmra.mrb[148].mxu1 %vm1627_vm1, %v5209_v51  ;;  %v3094_v28 = vmax.f32 %v2146_v15, 0.0  ;;  %v3348_v29 = vadd.f32 %v3347_v19, %v3093_v0  ;;  %v3096_v44 = vmax.f32 %v2154_v14, 0.0  ;;  %v3216_v59 = vmax.f32 %v2634_v32, 0.0 }
 0x147   : > { %v3488_v30 = vadd.f32 %v3487_v22, %v3213_v9  ;;  %v3214_v33 = vmax.f32 %v2626_v25, 0.0 }
 0x148   : > { %v4644_v34 = vpop.f32.mrb[44].mxu0  ;;  %v3349_v45 = vadd.f32 %v3348_v29, %v3094_v28 }
 0x149   : > { %v4764_v38 = vpop.f32.mrb[44].mxu1  ;;  %v2158_v40 = vpop.f32.mrb[45].mxu0  ;;  %v3489_v47 = vadd.f32 %v3488_v30, %v3214_v33  ;;  %v2167_v53 = vadd.f32 %v4644_v34, %v5756_v11 }
 0x14a   : > { %v2159_v48 = vadd.f32 %v5756_v11, %v2158_v40  ;;  %v2638_v50 = vpop.f32.mrb[45].mxu1  ;;  %v4645_v51 = vpop.f32.mrb[46].mxu0  ;;  %v3350_v61 = vadd.f32 %v3349_v45, %v3095_v26  ;;  %v2647_v3 = vadd.f32 %v4764_v38, %v5756_v11 }
 0x14b   : > { %v2639_v55 = vadd.f32 %v5756_v11, %v2638_v50  ;;  %v4765_v57 = vpop.f32.mrb[46].mxu1  ;;  %v2161_v42 = vpop.f32.mrb[47].mxu0  ;;  %v3490_v63 = vadd.f32 %v3489_v47, %v3215_v37  ;;  %v2170_v14 = vadd.f32 %v4645_v51, %v5756_v11  ;;  %v3099_v16 = vmax.f32 %v2167_v53, 0.0 }
 0x14c   : > { %v3097_v0 = vmax.f32 %v2159_v48, 0.0  ;;  %v2641_v1 = vpop.f32.mrb[47].mxu1  ;;  %v2162_v8 = vadd.f32 %v5756_v11, %v2161_v42  ;;  %v3351_v49 = vadd.f32 %v3350_v61, %v3096_v44  ;;  %v2650_v17 = vadd.f32 %v4765_v57, %v5756_v11 }
 0x14d   : > { %v3217_v6 = vmax.f32 %v2639_v55, 0.0  ;;  %v3491_v9 = vadd.f32 %v3490_v63, %v3216_v59  ;;  %v2642_v15 = vadd.f32 %v5756_v11, %v2641_v1  ;;  %v3219_v23 = vmax.f32 %v2647_v3, 0.0 }
 0x14e   : > { %v3098_v19 = vmax.f32 %v2162_v8, 0.0  ;;  %v3352_v22 = vadd.f32 %v3351_v49, %v3097_v0  ;;  %v3100_v32 = vmax.f32 %v2170_v14, 0.0  ;;  %v3220_v50 = vmax.f32 %v2650_v17, 0.0 }
 0x14f   : > { %v3492_v25 = vadd.f32 %v3491_v9, %v3217_v6  ;;  %v3218_v26 = vmax.f32 %v2642_v15, 0.0 }
 0x150   : > { %v4648_v28 = vpop.f32.mrb[48].mxu0  ;;  %v3353_v33 = vadd.f32 %v3352_v22, %v3098_v19 }
 0x151   : > { %v4768_v29 = vpop.f32.mrb[48].mxu1  ;;  %v2174_v30 = vpop.f32.mrb[49].mxu0  ;;  %v3493_v34 = vadd.f32 %v3492_v25, %v3218_v26  ;;  %v2183_v44 = vadd.f32 %v4648_v28, %v5756_v11 }
 0x152   : > { %v2175_v37 = vadd.f32 %v5756_v11, %v2174_v30  ;;  %v2654_v38 = vpop.f32.mrb[49].mxu1  ;;  %v4649_v40 = vpop.f32.mrb[50].mxu0  ;;  %v3354_v51 = vadd.f32 %v3353_v33, %v3099_v16  ;;  %v2663_v0 = vadd.f32 %v4768_v29, %v5756_v11 }
 0x153   : > { %v2655_v45 = vadd.f32 %v5756_v11, %v2654_v38  ;;  %v4769_v47 = vpop.f32.mrb[50].mxu1  ;;  %v2177_v48 = vpop.f32.mrb[51].mxu0  ;;  %v3494_v53 = vadd.f32 %v3493_v34, %v3219_v23  ;;  %v2186_v59 = vadd.f32 %v4649_v40, %v5756_v11  ;;  %v3103_v6 = vmax.f32 %v2183_v44, 0.0 }
 0x154   : > { %v2657_v55 = vpop.f32.mrb[51].mxu1  ;;  %v3101_v57 = vmax.f32 %v2175_v37, 0.0  ;;  %v2178_v61 = vadd.f32 %v5756_v11, %v2177_v48  ;;  %v5927_v63 = vadd.f32 %v3354_v51, %v3100_v32  ;;  %v2666_v9 = vadd.f32 %v4769_v47, %v5756_v11 }
 0x155   : > { %v3221_v42 = vmax.f32 %v2655_v45, 0.0  ;;  %v3495_v1 = vadd.f32 %v3494_v53, %v3220_v50  ;;  %v2658_v3 = vadd.f32 %v5756_v11, %v2657_v55  ;;  %v3104_v16 = vmax.f32 %v2186_v59, 0.0 }
 0x156   : > { %v3102_v8 = vmax.f32 %v2178_v61, 0.0  ;;  %v3223_v17 = vmax.f32 %v2663_v0, 0.0  ;;  %v3224_v38 = vmax.f32 %v2666_v9, 0.0 }
 0x157   : > { %v3496_v49 = vadd.f32 %v3495_v1, %v3221_v42  ;;  %v3222_v14 = vmax.f32 %v2658_v3, 0.0 }
 0x158   : > { %v4652_v15 = vpop.f32.mrb[52].mxu0  ;;  %v3362_v19 = vadd.f32 %v3102_v8, %v3101_v57 }
 0x159   : > { %v4772_v22 = vpop.f32.mrb[52].mxu1  ;;  %v2190_v25 = vpop.f32.mrb[53].mxu0  ;;  %v3497_v26 = vadd.f32 %v3496_v49, %v3222_v14  ;;  %v2199_v32 = vadd.f32 %v4652_v15, %v5756_v11 }
 0x15a   : > { %v2191_v28 = vadd.f32 %v5756_v11, %v2190_v25  ;;  %v2670_v23 = vpop.f32.mrb[53].mxu1  ;;  %v4653_v29 = vpop.f32.mrb[54].mxu0  ;;  %v3363_v30 = vadd.f32 %v3362_v19, %v3103_v6  ;;  %v2679_v47 = vadd.f32 %v4772_v22, %v5756_v11 }
 0x15b   : > { %v2671_v33 = vadd.f32 %v5756_v11, %v2670_v23  ;;  %v4773_v34 = vpop.f32.mrb[54].mxu1  ;;  %v2193_v37 = vpop.f32.mrb[55].mxu0  ;;  %v3498_v40 = vadd.f32 %v3497_v26, %v3223_v17  ;;  %v2202_v53 = vadd.f32 %v4653_v29, %v5756_v11  ;;  %v3107_v42 = vmax.f32 %v2199_v32, 0.0  ;;  %v3693_v23 = vld [vmem:[%s6492_s6 + $0x108] sm:$0xff]  ;;  %v3695_v29 = vld [vmem:[%s6492_s6 + $0x118] sm:$0xff] }
 0x15c   : > { %v3105_v44 = vmax.f32 %v2191_v28, 0.0  ;;  %v2673_v45 = vpop.f32.mrb[55].mxu1  ;;  %v3364_v48 = vadd.f32 %v3363_v30, %v3104_v16  ;;  %v2194_v55 = vadd.f32 %v5756_v11, %v2193_v37  ;;  %v2682_v0 = vadd.f32 %v4773_v34, %v5756_v11  ;;  %v3692_v30 = vld [vmem:[%s6492_s6 + $0x100] sm:$0xff] }
 0x15d   : > { %v3225_v50 = vmax.f32 %v2671_v33, 0.0  ;;  %v3499_v51 = vadd.f32 %v3498_v40, %v3224_v38  ;;  %v2674_v57 = vadd.f32 %v5756_v11, %v2673_v45  ;;  %v3227_v14 = vmax.f32 %v2679_v47, 0.0  ;;  %v3694_v40 = vld [vmem:[%s6492_s6 + $0x110] sm:$0xff]  ;;  %v3699_v45 = vld [vmem:[%s6492_s6 + $0x138] sm:$0xff] }
 0x15e   : > { %v3365_v59 = vadd.f32 %v3364_v48, %v3105_v44  ;;  %v3106_v1 = vmax.f32 %v2194_v55, 0.0  ;;  %v3108_v15 = vmax.f32 %v2202_v53, 0.0  ;;  %v3228_v32 = vmax.f32 %v2682_v0, 0.0  ;;  %v3697_v44 = vld [vmem:[%s6492_s6 + $0x128] sm:$0xff] }
 0x15f   : > { %v3500_v61 = vadd.f32 %v3499_v51, %v3225_v50  ;;  %v3226_v3 = vmax.f32 %v2674_v57, 0.0  ;;  %v4939_v0 = vpack.c.bf16 %v3694_v40, %v3692_v30 }
 0x160   : > { %v4656_v6 = vpop.f32.mrb[56].mxu0  ;;  %v3366_v16 = vadd.f32 %v3365_v59, %v3106_v1  ;;  %v4941_v1 = vpack.c.bf16 %v3699_v45, %v3697_v44 }
 0x161   : > { %v2215_v8 = vadd.f32 %v4656_v6, %v5756_v11  ;;  %v4776_v49 = vpop.f32.mrb[56].mxu1  ;;  %v2206_v9 = vpop.f32.mrb[57].mxu0  ;;  %v3501_v19 = vadd.f32 %v3500_v61, %v3226_v3  ;;  %v4937_v61 = vpack.c.bf16 %v3695_v29, %v3693_v23  ;;  %v3696_v3 = vld [vmem:[%s6492_s6 + $0x120] sm:$0xff]  ;;  %v3698_v6 = vld [vmem:[%s6492_s6 + $0x130] sm:$0xff] }
 0x162   : > { %v2686_v22 = vpop.f32.mrb[57].mxu1  ;;  %v4657_v25 = vpop.f32.mrb[58].mxu0  ;;  %v2207_v17 = vadd.f32 %v5756_v11, %v2206_v9  ;;  %v3367_v33 = vadd.f32 %v3366_v16, %v3107_v42  ;;  %v2695_v48 = vadd.f32 %v4776_v49, %v5756_v11  ;;  %v4943_v30 = vpack.c.bf16 %v3698_v6, %v3696_v3 }
 0x163   : > { %v4777_v26 = vpop.f32.mrb[58].mxu1  ;;  %v2209_v28 = vpop.f32.mrb[59].mxu0  ;;  %v3502_v34 = vadd.f32 %v3501_v19, %v3227_v14  ;;  %v2687_v37 = vadd.f32 %v5756_v11, %v2686_v22  ;;  %v3111_v47 = vmax.f32 %v2215_v8, 0.0  ;;  %v2218_v57 = vadd.f32 %v4657_v25, %v5756_v11  ;;  %4938 = vmatprep.subr.bf16.mxu0 %v4937_v61 }
 0x164   : > { %v2689_v38 = vpop.f32.mrb[59].mxu1  ;;  %v3109_v50 = vmax.f32 %v2207_v17, 0.0  ;;  %v2210_v51 = vadd.f32 %v5756_v11, %v2209_v28  ;;  %v3368_v55 = vadd.f32 %v3367_v33, %v3108_v15  ;;  %v2698_v9 = vadd.f32 %v4777_v26, %v5756_v11  ;;  %4940 = vmatpush1.bf16.msra.mxu0 %v4939_v0 }
 0x165   : > { %v5963_v53 = vadd.f32 %v3502_v34, %v3228_v32  ;;  %v2690_v42 = vadd.f32 %v5756_v11, %v2689_v38  ;;  %v3229_v49 = vmax.f32 %v2687_v37, 0.0  ;;  %v3231_v16 = vmax.f32 %v2695_v48, 0.0  ;;  %4942 = vmatprep.subr.bf16.mxu0 %v4941_v1 }
 0x166   : > { %v3110_v59 = vmax.f32 %v2210_v51, 0.0  ;;  %v3369_v8 = vadd.f32 %v3368_v55, %v3109_v50  ;;  %v3112_v25 = vmax.f32 %v2218_v57, 0.0  ;;  %v3232_v26 = vmax.f32 %v2698_v9, 0.0 }
 0x167   : > { %v3230_v14 = vmax.f32 %v2690_v42, 0.0 }
 0x168   : > { %v4660_v15 = vpop.f32.mrb[60].mxu0  ;;  %v3370_v17 = vadd.f32 %v3369_v8, %v3110_v59  ;;  %4944 = vmatpush1.bf16.msra.mxu0 %v4943_v30 }
 0x169   : > { %v4780_v19 = vpop.f32.mrb[60].mxu1  ;;  %v2222_v22 = vpop.f32.mrb[61].mxu0  ;;  %v3510_v28 = vadd.f32 %v3230_v14, %v3229_v49  ;;  %v2231_v44 = vadd.f32 %v4660_v15, %v5756_v11 }
 0x16a   : > { %v2702_v23 = vpop.f32.mrb[61].mxu1  ;;  %v4661_v29 = vpop.f32.mrb[62].mxu0  ;;  %v2223_v32 = vadd.f32 %v5756_v11, %v2222_v22  ;;  %v3371_v38 = vadd.f32 %v3370_v17, %v3111_v47  ;;  %v2711_v59 = vadd.f32 %v4780_v19, %v5756_v11 }
 0x16b   : > { %v2703_v33 = vadd.f32 %v5756_v11, %v2702_v23  ;;  %v4781_v34 = vpop.f32.mrb[62].mxu1  ;;  %v2225_v37 = vpop.f32.mrb[63].mxu0  ;;  %v3511_v40 = vadd.f32 %v3510_v28, %v3231_v16  ;;  %v2234_v57 = vadd.f32 %v4661_v29, %v5756_v11  ;;  %v3115_v0 = vmax.f32 %v2231_v44, 0.0 }
 0x16c   : > { %v2705_v45 = vpop.f32.mrb[63].mxu1  ;;  %v3113_v48 = vmax.f32 %v2223_v32, 0.0  ;;  %v3372_v51 = vadd.f32 %v3371_v38, %v3112_v25  ;;  %v2226_v42 = vadd.f32 %v5756_v11, %v2225_v37  ;;  %v2714_v8 = vadd.f32 %v4781_v34, %v5756_v11 }
 0x16d   : > { %v3233_v50 = vmax.f32 %v2703_v33, 0.0  ;;  %v3512_v55 = vadd.f32 %v3511_v40, %v3232_v26  ;;  %v2706_v61 = vadd.f32 %v5756_v11, %v2705_v45  ;;  %v3116_v15 = vmax.f32 %v2234_v57, 0.0 }
 0x16e   : > { %v3373_v1 = vadd.f32 %v3372_v51, %v3113_v48  ;;  %v3114_v3 = vmax.f32 %v2226_v42, 0.0  ;;  %v3235_v28 = vmax.f32 %v2711_v59, 0.0  ;;  %v3236_v26 = vmax.f32 %v2714_v8, 0.0 }
 0x16f   : > { %v3513_v47 = vadd.f32 %v3512_v55, %v3233_v50  ;;  %v3234_v49 = vmax.f32 %v2706_v61, 0.0 }
 0x170   : > { %v4664_v6 = vpop.f32.mrb[64].mxu0  ;;  %v3374_v16 = vadd.f32 %v3373_v1, %v3114_v3 }
 0x171   : > { %v4784_v9 = vpop.f32.mrb[64].mxu1  ;;  %v2238_v14 = vpop.f32.mrb[65].mxu0  ;;  %v3514_v19 = vadd.f32 %v3513_v47, %v3234_v49  ;;  %v2247_v33 = vadd.f32 %v4664_v6, %v5756_v11 }
 0x172   : > { %v2239_v22 = vadd.f32 %v5756_v11, %v2238_v14  ;;  %v2718_v25 = vpop.f32.mrb[65].mxu1  ;;  %v4665_v17 = vpop.f32.mrb[66].mxu0  ;;  %v3375_v32 = vadd.f32 %v3374_v16, %v3115_v0  ;;  %v2727_v51 = vadd.f32 %v4784_v9, %v5756_v11 }
 0x173   : > { %v2719_v23 = vadd.f32 %v5756_v11, %v2718_v25  ;;  %v4785_v29 = vpop.f32.mrb[66].mxu1  ;;  %v2241_v30 = vpop.f32.mrb[67].mxu0  ;;  %v3515_v38 = vadd.f32 %v3514_v19, %v3235_v28  ;;  %v2250_v48 = vadd.f32 %v4665_v17, %v5756_v11  ;;  %v3119_v42 = vmax.f32 %v2247_v33, 0.0 }
 0x174   : > { %v3117_v37 = vmax.f32 %v2239_v22, 0.0  ;;  %v2721_v34 = vpop.f32.mrb[67].mxu1  ;;  %v2242_v44 = vadd.f32 %v5756_v11, %v2241_v30  ;;  %v3376_v45 = vadd.f32 %v3375_v32, %v3116_v15  ;;  %v2730_v47 = vadd.f32 %v4785_v29, %v5756_v11 }
 0x175   : > { %v3237_v40 = vmax.f32 %v2719_v23, 0.0  ;;  %v2722_v50 = vadd.f32 %v5756_v11, %v2721_v34  ;;  %v3516_v55 = vadd.f32 %v3515_v38, %v3236_v26  ;;  %v3120_v8 = vmax.f32 %v2250_v48, 0.0 }
 0x176   : > { %v3118_v57 = vmax.f32 %v2242_v44, 0.0  ;;  %v3377_v59 = vadd.f32 %v3376_v45, %v3117_v37  ;;  %v3239_v22 = vmax.f32 %v2727_v51, 0.0  ;;  %v3240_v29 = vmax.f32 %v2730_v47, 0.0 }
 0x177   : > { %v3238_v61 = vmax.f32 %v2722_v50, 0.0  ;;  %v3517_v1 = vadd.f32 %v3516_v55, %v3237_v40  ;;  %v5998_v40 = vld [vmem:[%s6491_s5] ss:$0 sm:$0xff] }
 0x178   : > { %v4668_v0 = vpop.f32.mrb[68].mxu0  ;;  %v3378_v49 = vadd.f32 %v3377_v59, %v3118_v57 }
 0x179   : > { %v4788_v3 = vpop.f32.mrb[68].mxu1  ;;  %v2254_v6 = vpop.f32.mrb[69].mxu0  ;;  %v3518_v25 = vadd.f32 %v3517_v1, %v3238_v61  ;;  %v2263_v23 = vadd.f32 %v4668_v0, %v5756_v11 }
 0x17a   : > { %v2255_v14 = vadd.f32 %v5756_v11, %v2254_v6  ;;  %v2734_v15 = vpop.f32.mrb[69].mxu1  ;;  %v4669_v16 = vpop.f32.mrb[70].mxu0  ;;  %v3379_v19 = vadd.f32 %v3378_v49, %v3119_v42  ;;  %v2743_v45 = vadd.f32 %v5998_v40, %v4788_v3 }
 0x17b   : > { %v2735_v9 = vadd.f32 %v5756_v11, %v2734_v15  ;;  %v4789_v17 = vpop.f32.mrb[70].mxu1  ;;  %v2257_v28 = vpop.f32.mrb[71].mxu0  ;;  %v3519_v33 = vadd.f32 %v3518_v25, %v3239_v22  ;;  %v2266_v38 = vadd.f32 %v4669_v16, %v5756_v11  ;;  %v3123_v51 = vmax.f32 %v2263_v23, 0.0  ;;  %v3701_v23 = vld [vmem:[%s6492_s6 + $0x148] sm:$0xff] }
 0x17c   : > { %v3121_v30 = vmax.f32 %v2255_v14, 0.0  ;;  %v2737_v32 = vpop.f32.mrb[71].mxu1  ;;  %v2258_v34 = vadd.f32 %v5756_v11, %v2257_v28  ;;  %v3380_v26 = vadd.f32 %v3379_v19, %v3120_v8  ;;  %v2746_v57 = vadd.f32 %v5998_v40, %v4789_v17 }
 0x17d   : > { %v3241_v37 = vmax.f32 %v2735_v9, 0.0  ;;  %v2738_v44 = vadd.f32 %v5998_v40, %v2737_v32  ;;  %v3520_v48 = vadd.f32 %v3519_v33, %v3240_v29  ;;  %v3124_v1 = vmax.f32 %v2266_v38, 0.0  ;;  %v3700_v32 = vld [vmem:[%s6492_s6 + $0x140] sm:$0xff]  ;;  %v3705_v38 = vld [vmem:[%s6492_s6 + $0x168] sm:$0xff] }
 0x17e   : > { %v3122_v50 = vmax.f32 %v2258_v34, 0.0  ;;  %v3381_v55 = vadd.f32 %v3380_v26, %v3121_v30  ;;  %v3243_v14 = vmax.f32 %v2743_v45, 0.0  ;;  %v3244_v25 = vmax.f32 %v2746_v57, 0.0  ;;  %v3703_v30 = vld [vmem:[%s6492_s6 + $0x158] sm:$0xff]  ;;  %v3702_v26 = vld [vmem:[%s6492_s6 + $0x150] sm:$0xff] }
 0x17f   : > { %v3242_v42 = vmax.f32 %v2738_v44, 0.0  ;;  %v3521_v61 = vadd.f32 %v3520_v48, %v3241_v37  ;;  %v3707_v44 = vld [vmem:[%s6492_s6 + $0x178] sm:$0xff]  ;;  %v3706_v57 = vld [vmem:[%s6492_s6 + $0x170] sm:$0xff] }
 0x180   : > { %v4672_v59 = vpop.f32.mrb[72].mxu0  ;;  %v3382_v47 = vadd.f32 %v3381_v55, %v3122_v50  ;;  %v3704_v55 = vld [vmem:[%s6492_s6 + $0x160] sm:$0xff] }
 0x181   : > { %v4792_v0 = vpop.f32.mrb[72].mxu1  ;;  %v2270_v11 = vpop.f32.mrb[73].mxu0  ;;  %v3522_v15 = vadd.f32 %v3521_v61, %v3242_v42  ;;  %v2279_v17 = vadd.f32 %v5998_v40, %v4672_v59  ;;  %v4947_v61 = vpack.c.bf16 %v3702_v26, %v3700_v32 }
 0x182   : > { %v2271_v6 = vadd.f32 %v5998_v40, %v2270_v11  ;;  %v2750_v8 = vpop.f32.mrb[73].mxu1  ;;  %v4673_v49 = vpop.f32.mrb[74].mxu0  ;;  %v3383_v9 = vadd.f32 %v3382_v47, %v3123_v51  ;;  %v2759_v33 = vadd.f32 %v5998_v40, %v4792_v0  ;;  %v4945_v51 = vpack.c.bf16 %v3703_v30, %v3701_v23  ;;  %v3709_v11 = vld [vmem:[%s6492_s6 + $0x188] sm:$0xff] }
 0x183   : > { %v2751_v3 = vadd.f32 %v5998_v40, %v2750_v8  ;;  %v4793_v16 = vpop.f32.mrb[74].mxu1  ;;  %v2273_v22 = vpop.f32.mrb[75].mxu0  ;;  %v3523_v29 = vadd.f32 %v3522_v15, %v3243_v14  ;;  %v2282_v48 = vadd.f32 %v5998_v40, %v4673_v49  ;;  %v4949_v0 = vpack.c.bf16 %v3707_v44, %v3705_v38 }
 0x184   : > { %v3125_v28 = vmax.f32 %v2271_v6, 0.0  ;;  %v2753_v19 = vpop.f32.mrb[75].mxu1  ;;  %v2274_v34 = vadd.f32 %v5998_v40, %v2273_v22  ;;  %v3384_v45 = vadd.f32 %v3383_v9, %v3124_v1  ;;  %v3711_v1 = vld [vmem:[%s6492_s6 + $0x198] sm:$0xff]  ;;  %v3127_v47 = vmax.f32 %v2279_v17, 0.0  ;;  %4946 = vmatprep.subr.bf16.mxu0 %v4945_v51  ;;  %v3710_v17 = vld [vmem:[%s6492_s6 + $0x190] sm:$0xff] }
 0x185   : > { %v3245_v37 = vmax.f32 %v2751_v3, 0.0  ;;  %v2754_v50 = vadd.f32 %v5998_v40, %v2753_v19  ;;  %v3524_v42 = vadd.f32 %v3523_v29, %v3244_v25  ;;  %v2762_v8 = vadd.f32 %v5998_v40, %v4793_v16  ;;  %4948 = vmatpush1.bf16.msra.mxu0 %v4947_v61  ;;  %v3708_v16 = vld [vmem:[%s6492_s6 + $0x180] sm:$0xff] }
 0x186   : > { %v3126_v59 = vmax.f32 %v2274_v34, 0.0  ;;  %v3385_v6 = vadd.f32 %v3384_v45, %v3125_v28  ;;  %v4951_v25 = vpack.c.bf16 %v3706_v57, %v3704_v55  ;;  %v3128_v9 = vmax.f32 %v2282_v48, 0.0  ;;  %4950 = vmatprep.subr.bf16.mxu0 %v4949_v0 }
 0x187   : > { %v3246_v49 = vmax.f32 %v2754_v50, 0.0  ;;  %v3525_v15 = vadd.f32 %v3524_v42, %v3245_v37  ;;  %v4953_v29 = vpack.c.bf16 %v3711_v1, %v3709_v11  ;;  %v3356_v28 = vrot.slane %v5927_v63, 4 }
 0x188   : > { %v4676_v14 = vpop.f32.mrb[76].mxu0  ;;  %v3386_v19 = vadd.f32 %v3385_v6, %v3126_v59  ;;  %v3247_v37 = vmax.f32 %v2759_v33, 0.0  ;;  %v3248_v45 = vmax.f32 %v2762_v8, 0.0  ;;  %v4955_v61 = vpack.c.bf16 %v3710_v17, %v3708_v16 }
 0x189   : > { %v4796_v3 = vpop.f32.mrb[76].mxu1  ;;  %v2286_v22 = vpop.f32.mrb[77].mxu0  ;;  %v3526_v34 = vadd.f32 %v3525_v15, %v3246_v49  ;;  %v2295_v50 = vadd.f32 %v5998_v40, %v4676_v14  ;;  %4952 = vmatpush1.bf16.msra.mxu0 %v4951_v25  ;;  %v3357_v1 = vadd.f32 %v3356_v28, %v5927_v63 }
 0x18a   : > { %v2287_v23 = vadd.f32 %v5998_v40, %v2286_v22  ;;  %v2766_v30 = vpop.f32.mrb[77].mxu1  ;;  %v4677_v32 = vpop.f32.mrb[78].mxu0  ;;  %v3387_v48 = vadd.f32 %v3386_v19, %v3127_v47  ;;  %4954 = vmatprep.subr.bf16.mxu0 %v4953_v29  ;;  %v2775_v47 = vadd.f32 %v5998_v40, %v4796_v3 }
 0x18b   : > { %v2767_v26 = vadd.f32 %v5998_v40, %v2766_v30  ;;  %v4797_v38 = vpop.f32.mrb[78].mxu1  ;;  %v2289_v44 = vpop.f32.mrb[79].mxu0  ;;  %v3527_v57 = vadd.f32 %v3526_v34, %v3247_v37  ;;  %v2298_v33 = vadd.f32 %v5998_v40, %v4677_v32  ;;  %v3131_v49 = vmax.f32 %v2295_v50, 0.0 }
 0x18c   : > { %v3129_v51 = vmax.f32 %v2287_v23, 0.0  ;;  %v2769_v55 = vpop.f32.mrb[79].mxu1  ;;  %v2290_v59 = vadd.f32 %v5998_v40, %v2289_v44  ;;  %v3388_v0 = vadd.f32 %v3387_v48, %v3128_v9  ;;  %v2778_v15 = vadd.f32 %v5998_v40, %v4797_v38  ;;  %v3713_v38 = vld [vmem:[%s6492_s6 + $0x1a8] sm:$0xff]  ;;  %v3715_v44 = vld [vmem:[%s6492_s6 + $0x1b8] sm:$0xff] }
 0x18d   : > { %v3249_v42 = vmax.f32 %v2767_v26, 0.0  ;;  %v2770_v11 = vadd.f32 %v5998_v40, %v2769_v55  ;;  %v3528_v6 = vadd.f32 %v3527_v57, %v3248_v45  ;;  %4956 = vmatpush1.bf16.msra.mxu0 %v4955_v61  ;;  %v3132_v30 = vmax.f32 %v2298_v33, 0.0  ;;  %v3712_v57 = vld [vmem:[%s6492_s6 + $0x1a0] sm:$0xff] }
 0x18e   : > { %v3130_v8 = vmax.f32 %v2290_v59, 0.0  ;;  %v3389_v14 = vadd.f32 %v3388_v0, %v3129_v51  ;;  %v3251_v17 = vmax.f32 %v2775_v47, 0.0  ;;  %v3358_v45 = vrot.slane %v3357_v1, 2 }
 0x18f   : > { %v3250_v22 = vmax.f32 %v2770_v11, 0.0  ;;  %v3529_v25 = vadd.f32 %v3528_v6, %v3249_v42  ;;  %v3252_v48 = vmax.f32 %v2778_v15, 0.0  ;;  %v3714_v42 = vld [vmem:[%s6492_s6 + $0x1b0] sm:$0xff] }
 0x190   : > { %v4680_v19 = vpop.f32.mrb[80].mxu0  ;;  %v3390_v32 = vadd.f32 %v3389_v14, %v3130_v8  ;;  %v4957_v8 = vpack.c.bf16 %v3715_v44, %v3713_v38 }
 0x191   : > { %v4800_v23 = vpop.f32.mrb[80].mxu1  ;;  %v2302_v9 = vpop.f32.mrb[81].mxu0  ;;  %v3530_v3 = vadd.f32 %v3529_v25, %v3250_v22  ;;  %v2311_v28 = vadd.f32 %v5998_v40, %v4680_v19  ;;  %v4959_v22 = vpack.c.bf16 %v3714_v42, %v3712_v57  ;;  %v6076_v19 = vadd.f32 %v3358_v45, %v3357_v1 }
 0x192   : > { %v2303_v29 = vadd.f32 %v5998_v40, %v2302_v9  ;;  %v2782_v16 = vpop.f32.mrb[81].mxu1  ;;  %v4681_v63 = vpop.f32.mrb[82].mxu0  ;;  %v3391_v50 = vadd.f32 %v3390_v32, %v3131_v49  ;;  %v2791_v47 = vadd.f32 %v5998_v40, %v4800_v23  ;;  %4958 = vmatprep.subr.bf16.mxu0 %v4957_v8 }
 0x193   : > { %v2783_v37 = vadd.f32 %v5998_v40, %v2782_v16  ;;  %v4801_v34 = vpop.f32.mrb[82].mxu1  ;;  %v2305_v26 = vpop.f32.mrb[83].mxu0  ;;  %v2314_v51 = vadd.f32 %v5998_v40, %v4681_v63  ;;  %v3531_v59 = vadd.f32 %v3530_v3, %v3251_v17  ;;  %v3135_v49 = vmax.f32 %v2311_v28, 0.0  ;;  %4960 = vmatpush1.bf16.msra.mxu0 %v4959_v22 }
 0x194   : > { %v2785_v55 = vpop.f32.mrb[83].mxu1  ;;  %v3133_v61 = vmax.f32 %v2303_v29, 0.0  ;;  %v2306_v33 = vadd.f32 %v5998_v40, %v2305_v26  ;;  %v3392_v11 = vadd.f32 %v3391_v50, %v3132_v30  ;;  %v2794_v63 = vadd.f32 %v5998_v40, %v4801_v34 }
 0x195   : > { %v3253_v0 = vmax.f32 %v2783_v37, 0.0  ;;  %v2786_v6 = vadd.f32 %v5998_v40, %v2785_v55  ;;  %v3532_v14 = vadd.f32 %v3531_v59, %v3252_v48  ;;  %v3136_v16 = vmax.f32 %v2314_v51, 0.0 }
 0x196   : > { %v3134_v15 = vmax.f32 %v2306_v33, 0.0  ;;  %v3393_v25 = vrot.slane %v3392_v11, 4  ;;  %v3255_v37 = vmax.f32 %v2791_v47, 0.0  ;;  %v3360_v34 = vrot.slane %v6076_v19, 1 }
 0x197   : > { %v3254_v9 = vmax.f32 %v2786_v6, 0.0  ;;  %v3533_v29 = vadd.f32 %v3532_v14, %v3253_v0  ;;  %v3256_v59 = vmax.f32 %v2794_v63, 0.0 }
 0x198   : > { %v4684_v32 = vpop.f32.mrb[84].mxu0  ;;  %v3399_v30 = vadd.f32 %v3134_v15, %v3133_v61  ;;  %v3394_v3 = vadd.f32 %v3393_v25, %v3392_v11  ;;  %v3717_v25 = vld [vmem:[%s6492_s6 + $0x1c8] sm:$0xff] }
 0x199   : > { %v4804_v17 = vpop.f32.mrb[84].mxu1  ;;  %v2318_v23 = vpop.f32.mrb[85].mxu0  ;;  %v3534_v44 = vadd.f32 %v3533_v29, %v3254_v9  ;;  %v2327_v45 = vadd.f32 %v5998_v40, %v4684_v32  ;;  %v3719_v9 = vld [vmem:[%s6492_s6 + $0x1d8] sm:$0xff]  ;;  %v3716_v32 = vld [vmem:[%s6492_s6 + $0x1c0] sm:$0xff] }
 0x19a   : > { %v2319_v28 = vadd.f32 %v5998_v40, %v2318_v23  ;;  %v2798_v26 = vpop.f32.mrb[85].mxu1  ;;  %v4685_v38 = vpop.f32.mrb[86].mxu0  ;;  %v3400_v1 = vadd.f32 %v3399_v30, %v3135_v49  ;;  %v3395_v55 = vrot.slane %v3394_v3, 2  ;;  %v2807_v14 = vadd.f32 %v5998_v40, %v4804_v17  ;;  %v3718_v17 = vld [vmem:[%s6492_s6 + $0x1d0] sm:$0xff] }
 0x19b   : > { %v2799_v48 = vadd.f32 %v5998_v40, %v2798_v26  ;;  %v4805_v50 = vpop.f32.mrb[86].mxu1  ;;  %v2321_v51 = vpop.f32.mrb[87].mxu0  ;;  %v3535_v61 = vadd.f32 %v3534_v44, %v3255_v37  ;;  %v2330_v47 = vadd.f32 %v5998_v40, %v4685_v38  ;;  %v3139_v49 = vmax.f32 %v2327_v45, 0.0 }
 0x19c   : > { %v3137_v57 = vmax.f32 %v2319_v28, 0.0  ;;  %v2801_v42 = vpop.f32.mrb[87].mxu1  ;;  %v3401_v0 = vadd.f32 %v3400_v1, %v3136_v16  ;;  %v3396_v11 = vadd.f32 %v3395_v55, %v3394_v3  ;;  %v2322_v6 = vadd.f32 %v5998_v40, %v2321_v51 }
 0x19d   : > { %v3257_v33 = vmax.f32 %v2799_v48, 0.0  ;;  %v2802_v8 = vadd.f32 %v5998_v40, %v2801_v42  ;;  %v3536_v22 = vadd.f32 %v3535_v61, %v3256_v59  ;;  %v4961_v23 = vpack.c.bf16 %v3719_v9, %v3717_v25 }
 0x19e   : > { %v3402_v15 = vadd.f32 %v3401_v0, %v3137_v57  ;;  %v3397_v29 = vrot.slane %v3396_v11, 1  ;;  %v3138_v16 = vmax.f32 %v2322_v6, 0.0  ;;  %v2810_v37 = vadd.f32 %v5998_v40, %v4805_v50 }
 0x19f   : > { %v3258_v63 = vmax.f32 %v2802_v8, 0.0  ;;  %v3537_v3 = vadd.f32 %v3536_v22, %v3257_v33  ;;  %v4963_v38 = vpack.c.bf16 %v3718_v17, %v3716_v32  ;;  %v3140_v44 = vmax.f32 %v2330_v47, 0.0  ;;  %4962 = vmatprep.subr.bf16.mxu0 %v4961_v23 }
 0x1a0   : > { %v4688_v30 = vpop.f32.mrb[88].mxu0  ;;  %v3398_v1 = vadd.f32 %v3397_v29, %v3396_v11  ;;  %v3403_v45 = vadd.f32 %v3402_v15, %v3138_v16  ;;  %v3259_v57 = vmax.f32 %v2807_v14, 0.0  ;;  %v3361_v50 = vadd.f32 %v3360_v34, %v6076_v19 }
 0x1a1   : > { %v4808_v28 = vpop.f32.mrb[88].mxu1  ;;  %v2334_v26 = vpop.f32.mrb[89].mxu0  ;;  %v3538_v42 = vadd.f32 %v3537_v3, %v3258_v63  ;;  %v2343_v59 = vadd.f32 %v5998_v40, %v4688_v30  ;;  %4964 = vmatpush1.bf16.msra.mxu0 %v4963_v38  ;;  %v3260_v8 = vmax.f32 %v2810_v37, 0.0 }
 0x1a2   : > { %v2335_v48 = vadd.f32 %v5998_v40, %v2334_v26  ;;  %v2814_v51 = vpop.f32.mrb[89].mxu1  ;;  %v4689_v55 = vpop.f32.mrb[90].mxu0  ;;  %v3404_v33 = vadd.f32 %v3403_v45, %v3139_v49  ;;  %v2823_v22 = vadd.f32 %v5998_v40, %v4808_v28  ;;  %v6109_v29 = vsel %vm3629_vm2, %v3398_v1, %v3361_v50 }
 0x1a3   : > { %v4809_v61 = vpop.f32.mrb[90].mxu1  ;;  %v2337_v0 = vpop.f32.mrb[91].mxu0  ;;  %v2815_v11 = vadd.f32 %v5998_v40, %v2814_v51  ;;  %v3539_v15 = vadd.f32 %v3538_v42, %v3259_v57  ;;  %v2346_v9 = vadd.f32 %v5998_v40, %v4689_v55  ;;  %v3143_v34 = vmax.f32 %v2343_v59, 0.0  ;;  %v3721_v59 = vld [vmem:[%s6492_s6 + $0x1e8] sm:$0xff] }
 0x1a4   : > { %v3141_v6 = vmax.f32 %v2335_v48, 0.0  ;;  %v2817_v47 = vpop.f32.mrb[91].mxu1  ;;  %v2338_v25 = vadd.f32 %v5998_v40, %v2337_v0  ;;  %v3405_v14 = vadd.f32 %v3404_v33, %v3140_v44  ;;  %v2826_v30 = vadd.f32 %v5998_v40, %v4809_v61 }
 0x1a5   : > { %v2818_v32 = vadd.f32 %v5998_v40, %v2817_v47  ;;  %v6111_v19 = vadd.f32 %v3539_v15, %v3260_v8  ;;  %v3261_v63 = vmax.f32 %v2815_v11, 0.0  ;;  %v3263_v3 = vmax.f32 %v2823_v22, 0.0  ;;  %v3723_v11 = vld [vmem:[%s6492_s6 + $0x1f8] sm:$0xff]  ;;  %v3720_v47 = vld [vmem:[%s6492_s6 + $0x1e0] sm:$0xff]  ;;  %v3722_v8 = vld [vmem:[%s6492_s6 + $0x1f0] sm:$0xff] }
 0x1a6   : > { %v3142_v49 = vmax.f32 %v2338_v25, 0.0  ;;  %v3406_v16 = vadd.f32 %v3405_v14, %v3141_v6  ;;  %v3144_v26 = vmax.f32 %v2346_v9, 0.0  ;;  %v3264_v61 = vmax.f32 %v2826_v30, 0.0 }
 0x1a7   : > { %v3262_v23 = vmax.f32 %v2818_v32, 0.0  ;;  %v4967_v30 = vpack.c.bf16 %v3722_v8, %v3720_v47 }
 0x1a8   : > { %v4692_v17 = vpop.f32.mrb[92].mxu0  ;;  %v3407_v38 = vadd.f32 %v3406_v16, %v3142_v49 }
 0x1a9   : > { %v4812_v37 = vpop.f32.mrb[92].mxu1  ;;  %v2350_v28 = vpop.f32.mrb[93].mxu0  ;;  %v3547_v44 = vadd.f32 %v3262_v23, %v3261_v63  ;;  %v2359_v51 = vadd.f32 %v5998_v40, %v4692_v17  ;;  %v4965_v63 = vpack.c.bf16 %v3723_v11, %v3721_v59 }
 0x1aa   : > { %v2351_v45 = vadd.f32 %v5998_v40, %v2350_v28  ;;  %v2830_v1 = vpop.f32.mrb[93].mxu1  ;;  %v4693_v48 = vpop.f32.mrb[94].mxu0  ;;  %v3408_v0 = vadd.f32 %v3407_v38, %v3143_v34  ;;  %v2839_v15 = vadd.f32 %v5998_v40, %v4812_v37 }
 0x1ab   : > { %v2831_v55 = vadd.f32 %v5998_v40, %v2830_v1  ;;  %v4813_v57 = vpop.f32.mrb[94].mxu1  ;;  %v2353_v42 = vpop.f32.mrb[95].mxu0  ;;  %v3548_v50 = vadd.f32 %v3547_v44, %v3263_v3  ;;  %v2362_v25 = vadd.f32 %v5998_v40, %v4693_v48  ;;  %v3147_v49 = vmax.f32 %v2359_v51, 0.0  ;;  %4966 = vmatprep.subr.bf16.mxu0 %v4965_v63 }
 0x1ac   : > { %v3145_v33 = vmax.f32 %v2351_v45, 0.0  ;;  %v2833_v6 = vpop.f32.mrb[95].mxu1  ;;  %v3409_v14 = vadd.f32 %v3408_v0, %v3144_v26  ;;  %v2354_v32 = vadd.f32 %v5998_v40, %v2353_v42  ;;  %v2842_v16 = vadd.f32 %v5998_v40, %v4813_v57  ;;  %4968 = vmatpush1.bf16.msra.mxu0 %v4967_v30 }
 0x1ad   : > { %v3265_v22 = vmax.f32 %v2831_v55, 0.0  ;;  %v3549_v9 = vadd.f32 %v3548_v50, %v3264_v61  ;;  %v2834_v34 = vadd.f32 %v5998_v40, %v2833_v6  ;;  %v3267_v37 = vmax.f32 %v2839_v15, 0.0 }
 0x1ae   : > { %v3410_v23 = vadd.f32 %v3409_v14, %v3145_v33  ;;  %v3146_v3 = vmax.f32 %v2354_v32, 0.0  ;;  %v3148_v26 = vmax.f32 %v2362_v25, 0.0  ;;  %v3268_v50 = vmax.f32 %v2842_v16, 0.0 }
 0x1af   : > { %v3550_v17 = vadd.f32 %v3549_v9, %v3265_v22  ;;  %v3266_v28 = vmax.f32 %v2834_v34, 0.0 }
 0x1b0   : > { %v4696_v38 = vpop.f32.mrb[96].mxu0  ;;  %v3411_v1 = vadd.f32 %v3410_v23, %v3146_v3 }
 0x1b1   : > { %v4816_v44 = vpop.f32.mrb[96].mxu1  ;;  %v2366_v45 = vpop.f32.mrb[97].mxu0  ;;  %v3551_v48 = vadd.f32 %v3550_v17, %v3266_v28  ;;  %v2375_v57 = vadd.f32 %v5998_v40, %v4696_v38 }
 0x1b2   : > { %v2367_v55 = vadd.f32 %v5998_v40, %v2366_v45  ;;  %v2846_v42 = vpop.f32.mrb[97].mxu1  ;;  %v4697_v51 = vpop.f32.mrb[98].mxu0  ;;  %v3412_v33 = vadd.f32 %v3411_v1, %v3147_v49  ;;  %v2855_v8 = vadd.f32 %v5998_v40, %v4816_v44 }
 0x1b3   : > { %v2847_v59 = vadd.f32 %v5998_v40, %v2846_v42  ;;  %v4817_v61 = vpop.f32.mrb[98].mxu1  ;;  %v2369_v0 = vpop.f32.mrb[99].mxu0  ;;  %v3552_v6 = vadd.f32 %v3551_v48, %v3267_v37  ;;  %v2378_v9 = vadd.f32 %v5998_v40, %v4697_v51  ;;  %v3151_v34 = vmax.f32 %v2375_v57, 0.0 }
 0x1b4   : > { %v3149_v11 = vmax.f32 %v2367_v55, 0.0  ;;  %v2849_v47 = vpop.f32.mrb[99].mxu1  ;;  %v2370_v22 = vadd.f32 %v5998_v40, %v2369_v0  ;;  %v3413_v25 = vadd.f32 %v3412_v33, %v3148_v26  ;;  %v2858_v49 = vadd.f32 %v5998_v40, %v4817_v61 }
 0x1b5   : > { %v3269_v15 = vmax.f32 %v2847_v59, 0.0  ;;  %v3553_v14 = vadd.f32 %v3552_v6, %v3268_v50  ;;  %v2850_v32 = vadd.f32 %v5998_v40, %v2849_v47  ;;  %v3271_v3 = vmax.f32 %v2855_v8, 0.0 }
 0x1b6   : > { %v3150_v63 = vmax.f32 %v2370_v22, 0.0  ;;  %v3414_v30 = vadd.f32 %v3413_v25, %v3149_v11  ;;  %v3152_v37 = vmax.f32 %v2378_v9, 0.0  ;;  %v3272_v59 = vmax.f32 %v2858_v49, 0.0 }
 0x1b7   : > { %v3554_v23 = vadd.f32 %v3553_v14, %v3269_v15  ;;  %v3270_v16 = vmax.f32 %v2850_v32, 0.0 }
 0x1b8   : > { %v4700_v17 = vpop.f32.mrb[100].mxu0  ;;  %v3415_v44 = vadd.f32 %v3414_v30, %v3150_v63 }
 0x1b9   : > { %v4820_v28 = vpop.f32.mrb[100].mxu1  ;;  %v2382_v38 = vpop.f32.mrb[101].mxu0  ;;  %v3555_v45 = vadd.f32 %v3554_v23, %v3270_v16  ;;  %v2391_v55 = vadd.f32 %v5998_v40, %v4700_v17 }
 0x1ba   : > { %v2383_v26 = vadd.f32 %v5998_v40, %v2382_v38  ;;  %v2862_v1 = vpop.f32.mrb[101].mxu1  ;;  %v4701_v48 = vpop.f32.mrb[102].mxu0  ;;  %v3416_v61 = vadd.f32 %v3415_v44, %v3151_v34  ;;  %v2871_v6 = vadd.f32 %v5998_v40, %v4820_v28 }
 0x1bb   : > { %v2863_v42 = vadd.f32 %v5998_v40, %v2862_v1  ;;  %v4821_v51 = vpop.f32.mrb[102].mxu1  ;;  %v2385_v57 = vpop.f32.mrb[103].mxu0  ;;  %v3556_v0 = vadd.f32 %v3555_v45, %v3271_v3  ;;  %v2394_v22 = vadd.f32 %v5998_v40, %v4701_v48  ;;  %v3155_v14 = vmax.f32 %v2391_v55, 0.0 }
 0x1bc   : > { %v3153_v50 = vmax.f32 %v2383_v26, 0.0  ;;  %v2865_v33 = vpop.f32.mrb[103].mxu1  ;;  %v2386_v47 = vadd.f32 %v5998_v40, %v2385_v57  ;;  %v3417_v8 = vadd.f32 %v3416_v61, %v3152_v37  ;;  %v2874_v34 = vadd.f32 %v5998_v40, %v4821_v51 }
 0x1bd   : > { %v3273_v11 = vmax.f32 %v2863_v42, 0.0  ;;  %v3557_v15 = vadd.f32 %v3556_v0, %v3272_v59  ;;  %v2866_v25 = vadd.f32 %v5998_v40, %v2865_v33  ;;  %v3275_v49 = vmax.f32 %v2871_v6, 0.0 }
 0x1be   : > { %v3154_v9 = vmax.f32 %v2386_v47, 0.0  ;;  %v3418_v32 = vadd.f32 %v3417_v8, %v3153_v50  ;;  %v3156_v3 = vmax.f32 %v2394_v22, 0.0  ;;  %v3276_v42 = vmax.f32 %v2874_v34, 0.0 }
 0x1bf   : > { %v3558_v63 = vadd.f32 %v3557_v15, %v3273_v11  ;;  %v3274_v30 = vmax.f32 %v2866_v25, 0.0 }
 0x1c0   : > { %v4704_v23 = vpop.f32.mrb[104].mxu0  ;;  %v3419_v28 = vadd.f32 %v3418_v32, %v3154_v9 }
 0x1c1   : > { %v4824_v16 = vpop.f32.mrb[104].mxu1  ;;  %v2398_v17 = vpop.f32.mrb[105].mxu0  ;;  %v3559_v38 = vadd.f32 %v3558_v63, %v3274_v30  ;;  %v2407_v26 = vadd.f32 %v5998_v40, %v4704_v23 }
 0x1c2   : > { %v2399_v37 = vadd.f32 %v5998_v40, %v2398_v17  ;;  %v2878_v44 = vpop.f32.mrb[105].mxu1  ;;  %v4705_v45 = vpop.f32.mrb[106].mxu0  ;;  %v3420_v51 = vadd.f32 %v3419_v28, %v3155_v14  ;;  %v2887_v0 = vadd.f32 %v5998_v40, %v4824_v16 }
 0x1c3   : > { %v2879_v1 = vadd.f32 %v5998_v40, %v2878_v44  ;;  %v4825_v48 = vpop.f32.mrb[106].mxu1  ;;  %v2401_v55 = vpop.f32.mrb[107].mxu0  ;;  %v3560_v57 = vadd.f32 %v3559_v38, %v3275_v49  ;;  %v2410_v47 = vadd.f32 %v5998_v40, %v4705_v45  ;;  %v3159_v15 = vmax.f32 %v2407_v26, 0.0 }
 0x1c4   : > { %v3157_v59 = vmax.f32 %v2399_v37, 0.0  ;;  %v2881_v61 = vpop.f32.mrb[107].mxu1  ;;  %v2402_v33 = vadd.f32 %v5998_v40, %v2401_v55  ;;  %v3421_v6 = vadd.f32 %v3420_v51, %v3156_v3  ;;  %v2890_v14 = vadd.f32 %v5998_v40, %v4825_v48 }
 0x1c5   : > { %v3277_v50 = vmax.f32 %v2879_v1, 0.0  ;;  %v3561_v11 = vadd.f32 %v3560_v57, %v3276_v42  ;;  %v2882_v8 = vadd.f32 %v5998_v40, %v2881_v61  ;;  %v3279_v34 = vmax.f32 %v2887_v0, 0.0 }
 0x1c6   : > { %v3158_v22 = vmax.f32 %v2402_v33, 0.0  ;;  %v3422_v25 = vadd.f32 %v3421_v6, %v3157_v59  ;;  %v3160_v49 = vmax.f32 %v2410_v47, 0.0  ;;  %v3280_v1 = vmax.f32 %v2890_v14, 0.0 }
 0x1c7   : > { %v3562_v9 = vadd.f32 %v3561_v11, %v3277_v50  ;;  %v3278_v32 = vmax.f32 %v2882_v8, 0.0 }
 0x1c8   : > { %v4708_v63 = vpop.f32.mrb[108].mxu0  ;;  %v3423_v16 = vadd.f32 %v3422_v25, %v3158_v22 }
 0x1c9   : > { %v4828_v30 = vpop.f32.mrb[108].mxu1  ;;  %v2414_v23 = vpop.f32.mrb[109].mxu0  ;;  %v3563_v17 = vadd.f32 %v3562_v9, %v3278_v32  ;;  %v2423_v37 = vadd.f32 %v5998_v40, %v4708_v63 }
 0x1ca   : > { %v2415_v3 = vadd.f32 %v5998_v40, %v2414_v23  ;;  %v2894_v28 = vpop.f32.mrb[109].mxu1  ;;  %v4709_v38 = vpop.f32.mrb[110].mxu0  ;;  %v3424_v48 = vadd.f32 %v3423_v16, %v3159_v15  ;;  %v2903_v57 = vadd.f32 %v5998_v40, %v4828_v30 }
 0x1cb   : > { %v2895_v44 = vadd.f32 %v5998_v40, %v2894_v28  ;;  %v4829_v45 = vpop.f32.mrb[110].mxu1  ;;  %v2417_v26 = vpop.f32.mrb[111].mxu0  ;;  %v3564_v55 = vadd.f32 %v3563_v17, %v3279_v34  ;;  %v2426_v33 = vadd.f32 %v5998_v40, %v4709_v38  ;;  %v3163_v11 = vmax.f32 %v2423_v37, 0.0 }
 0x1cc   : > { %v3161_v42 = vmax.f32 %v2415_v3, 0.0  ;;  %v2897_v51 = vpop.f32.mrb[111].mxu1  ;;  %v2418_v61 = vadd.f32 %v5998_v40, %v2417_v26  ;;  %v3425_v0 = vadd.f32 %v3424_v48, %v3160_v49  ;;  %v2906_v15 = vadd.f32 %v5998_v40, %v4829_v45 }
 0x1cd   : > { %v3281_v59 = vmax.f32 %v2895_v44, 0.0  ;;  %v3565_v50 = vadd.f32 %v3564_v55, %v3280_v1  ;;  %v2898_v6 = vadd.f32 %v5998_v40, %v2897_v51  ;;  %v3283_v14 = vmax.f32 %v2903_v57, 0.0 }
 0x1ce   : > { %v3162_v47 = vmax.f32 %v2418_v61, 0.0  ;;  %v3426_v8 = vadd.f32 %v3425_v0, %v3161_v42  ;;  %v3164_v34 = vmax.f32 %v2426_v33, 0.0  ;;  %v3284_v44 = vmax.f32 %v2906_v15, 0.0 }
 0x1cf   : > { %v3566_v22 = vadd.f32 %v3565_v50, %v3281_v59  ;;  %v3282_v25 = vmax.f32 %v2898_v6, 0.0 }
 0x1d0   : > { %v4712_v9 = vpop.f32.mrb[112].mxu0  ;;  %v3427_v30 = vadd.f32 %v3426_v8, %v3162_v47 }
 0x1d1   : > { %v4832_v32 = vpop.f32.mrb[112].mxu1  ;;  %v2430_v63 = vpop.f32.mrb[113].mxu0  ;;  %v3567_v23 = vadd.f32 %v3566_v22, %v3282_v25  ;;  %v2439_v3 = vadd.f32 %v5998_v40, %v4712_v9 }
 0x1d2   : > { %v2431_v49 = vadd.f32 %v5998_v40, %v2430_v63  ;;  %v2910_v16 = vpop.f32.mrb[113].mxu1  ;;  %v4713_v17 = vpop.f32.mrb[114].mxu0  ;;  %v3428_v45 = vadd.f32 %v3427_v30, %v3163_v11  ;;  %v2919_v59 = vadd.f32 %v5998_v40, %v4832_v32 }
 0x1d3   : > { %v2911_v28 = vadd.f32 %v5998_v40, %v2910_v16  ;;  %v4833_v38 = vpop.f32.mrb[114].mxu1  ;;  %v2433_v37 = vpop.f32.mrb[115].mxu0  ;;  %v3568_v26 = vadd.f32 %v3567_v23, %v3283_v14  ;;  %v2442_v42 = vadd.f32 %v5998_v40, %v4713_v17  ;;  %v3167_v50 = vmax.f32 %v2439_v3, 0.0 }
 0x1d4   : > { %v2913_v1 = vpop.f32.mrb[115].mxu1  ;;  %v3165_v48 = vmax.f32 %v2431_v49, 0.0  ;;  %v2434_v51 = vadd.f32 %v5998_v40, %v2433_v37  ;;  %v3429_v57 = vadd.f32 %v3428_v45, %v3164_v34  ;;  %v2922_v11 = vadd.f32 %v5998_v40, %v4833_v38 }
 0x1d5   : > { %v3285_v55 = vmax.f32 %v2911_v28, 0.0  ;;  %v3569_v61 = vadd.f32 %v3568_v26, %v3284_v44  ;;  %v2914_v0 = vadd.f32 %v5998_v40, %v2913_v1  ;;  %v3168_v15 = vmax.f32 %v2442_v42, 0.0 }
 0x1d6   : > { %v3166_v33 = vmax.f32 %v2434_v51, 0.0  ;;  %v3430_v6 = vrot.slane %v3429_v57, 4  ;;  %v3287_v30 = vmax.f32 %v2919_v59, 0.0  ;;  %v3288_v44 = vmax.f32 %v2922_v11, 0.0 }
 0x1d7   : > { %v3570_v47 = vadd.f32 %v3569_v61, %v3285_v55  ;;  %v3286_v8 = vmax.f32 %v2914_v0, 0.0 }
 0x1d8   : > { %v4716_v22 = vpop.f32.mrb[116].mxu0  ;;  %v3436_v25 = vadd.f32 %v3166_v33, %v3165_v48  ;;  %v3431_v63 = vadd.f32 %v3430_v6, %v3429_v57 }
 0x1d9   : > { %v4836_v9 = vpop.f32.mrb[116].mxu1  ;;  %v2446_v14 = vpop.f32.mrb[117].mxu0  ;;  %v3571_v34 = vadd.f32 %v3570_v47, %v3286_v8  ;;  %v2455_v17 = vadd.f32 %v5998_v40, %v4716_v22 }
 0x1da   : > { %v2447_v32 = vadd.f32 %v5998_v40, %v2446_v14  ;;  %v2926_v23 = vpop.f32.mrb[117].mxu1  ;;  %v4717_v49 = vpop.f32.mrb[118].mxu0  ;;  %v3437_v16 = vadd.f32 %v3436_v25, %v3167_v50  ;;  %v3432_v37 = vrot.slane %v3431_v63, 2  ;;  %v2935_v48 = vadd.f32 %v5998_v40, %v4836_v9 }
 0x1db   : > { %v2927_v3 = vadd.f32 %v5998_v40, %v2926_v23  ;;  %v4837_v28 = vpop.f32.mrb[118].mxu1  ;;  %v2449_v38 = vpop.f32.mrb[119].mxu0  ;;  %v3572_v45 = vadd.f32 %v3571_v34, %v3287_v30  ;;  %v2458_v51 = vadd.f32 %v5998_v40, %v4717_v49  ;;  %v3171_v50 = vmax.f32 %v2455_v17, 0.0 }
 0x1dc   : > { %v3169_v26 = vmax.f32 %v2447_v32, 0.0  ;;  %v2929_v1 = vpop.f32.mrb[119].mxu1  ;;  %v3438_v55 = vadd.f32 %v3437_v16, %v3168_v15  ;;  %v3433_v57 = vadd.f32 %v3432_v37, %v3431_v63  ;;  %v2450_v61 = vadd.f32 %v5998_v40, %v2449_v38 }
 0x1dd   : > { %v3289_v42 = vmax.f32 %v2927_v3, 0.0  ;;  %v3573_v59 = vadd.f32 %v3572_v45, %v3288_v44  ;;  %v2930_v0 = vadd.f32 %v5998_v40, %v2929_v1  ;;  %v2938_v6 = vadd.f32 %v5998_v40, %v4837_v28 }
 0x1de   : > { %v3439_v33 = vadd.f32 %v3438_v55, %v3169_v26  ;;  %v3434_v47 = vrot.slane %v3433_v57, 1  ;;  %v3170_v8 = vmax.f32 %v2450_v61, 0.0  ;;  %v2463_v15 = vadd.f32 %v5998_v40, %v5656_v60 }
 0x1df   : > { %v3574_v11 = vadd.f32 %v3573_v59, %v3289_v42  ;;  %v3290_v22 = vmax.f32 %v2930_v0, 0.0  ;;  %v3291_v25 = vmax.f32 %v2935_v48, 0.0  ;;  %v3172_v63 = vmax.f32 %v2458_v51, 0.0 }
 0x1e0   : > { %v3435_v14 = vadd.f32 %v3434_v47, %v3433_v57  ;;  %v3440_v30 = vadd.f32 %v3439_v33, %v3170_v8  ;;  %v2466_v16 = vadd.f32 %v5998_v40, %v5665_v7  ;;  %v3292_v17 = vmax.f32 %v2938_v6, 0.0 }
 0x1e1   : > { %v4840_v9 = vpop.f32.mrb[120].mxu1  ;;  %v3575_v34 = vadd.f32 %v3574_v11, %v3290_v22  ;;  %v2471_v45 = vadd.f32 %v5998_v40, %v5649_v54  ;;  %v3173_v26 = vmax.f32 %v2463_v15, 0.0  ;;  %v2474_v51 = vadd.f32 %v5998_v40, %v5661_v2 }
 0x1e2   : > { %v2942_v32 = vpop.f32.mrb[121].mxu1  ;;  %v3441_v3 = vadd.f32 %v3440_v30, %v3171_v50  ;;  %v2951_v37 = vadd.f32 %v5998_v40, %v4840_v9  ;;  %v6191_v44 = vsel %vm3631_vm3, %v3435_v14, %v6109_v29  ;;  %v3174_v57 = vmax.f32 %v2466_v16, 0.0 }
 0x1e3   : > { %v2943_v23 = vadd.f32 %v5998_v40, %v2942_v32  ;;  %v4841_v49 = vpop.f32.mrb[122].mxu1  ;;  %v3576_v28 = vadd.f32 %v3575_v34, %v3291_v25  ;;  %v3175_v50 = vmax.f32 %v2471_v45, 0.0  ;;  %v2479_v54 = vadd.f32 %v5998_v40, %v5689_v27 }
 0x1e4   : > { %v2945_v38 = vpop.f32.mrb[123].mxu1  ;;  %v3442_v1 = vadd.f32 %v3441_v3, %v3172_v63  ;;  %v2954_v55 = vadd.f32 %v5998_v40, %v4841_v49  ;;  %v3295_v61 = vmax.f32 %v2951_v37, 0.0  ;;  %v3176_v15 = vmax.f32 %v2474_v51, 0.0 }
 0x1e5   : > { %v2946_v60 = vadd.f32 %v5998_v40, %v2945_v38  ;;  %v6195_v48 = vadd.f32 %v3576_v28, %v3292_v17  ;;  %v3293_v7 = vmax.f32 %v2943_v23, 0.0  ;;  %v2482_v2 = vadd.f32 %v5998_v40, %v5697_v39 }
 0x1e6   : > { %v3443_v59 = vadd.f32 %v3442_v1, %v3173_v26  ;;  %v3296_v47 = vmax.f32 %v2954_v55, 0.0  ;;  %v2487_v27 = vadd.f32 %v5998_v40, %v5679_v20  ;;  %v3177_v32 = vmax.f32 %v2479_v54, 0.0  ;;  %v6215_v26 = vld [vmem:[%s6491_s5] ss:$0 sm:$0xff] }
 0x1e7   : > { %v3294_v42 = vmax.f32 %v2946_v60, 0.0  ;;  %v2490_v39 = vadd.f32 %v5998_v40, %v5694_v35  ;;  %v3178_v3 = vmax.f32 %v2482_v2, 0.0  ;;  %v2495_v20 = vadd.f32 %v6215_v26, %v5709_v62 }
 0x1e8   : > { %v3444_v33 = vadd.f32 %v3443_v59, %v3174_v57  ;;  %v3179_v45 = vmax.f32 %v2487_v27, 0.0  ;;  %v2498_v57 = vadd.f32 %v6215_v26, %v5715_v10  ;;  %v2503_v62 = vadd.f32 %v6215_v26, %v5705_v56 }
 0x1e9   : > { %v3584_v0 = vadd.f32 %v3294_v42, %v3293_v7  ;;  %v4844_v29 = vpop.f32.mrb[124].mxu1  ;;  %v3180_v51 = vmax.f32 %v2490_v39, 0.0  ;;  %v2506_v10 = vadd.f32 %v6215_v26, %v5712_v5  ;;  %v2514_v5 = vadd.f32 %v6215_v26, %v5745_v52 }
 0x1ea   : > { %v2958_v6 = vpop.f32.mrb[125].mxu1  ;;  %v3445_v25 = vadd.f32 %v3444_v33, %v3175_v50  ;;  %v2967_v14 = vadd.f32 %v5998_v40, %v4844_v29  ;;  %v3181_v33 = vmax.f32 %v2495_v20, 0.0  ;;  %v2522_v52 = vadd.f32 %v6215_v26, %v5742_v46 }
 0x1eb   : > { %v3585_v11 = vadd.f32 %v3584_v0, %v3295_v61  ;;  %v2959_v8 = vadd.f32 %v5998_v40, %v2958_v6  ;;  %v4845_v22 = vpop.f32.mrb[126].mxu1  ;;  %v2530_v46 = vadd.f32 %v6215_v26, %v5768_v31  ;;  %v2538_v31 = vadd.f32 %v6215_v26, %v5764_v24 }
 0x1ec   : > { %v2961_v9 = vpop.f32.mrb[127].mxu1  ;;  %v3446_v23 = vadd.f32 %v3445_v25, %v3176_v15  ;;  %v2970_v16 = vadd.f32 %v5998_v40, %v4845_v22  ;;  %v3299_v38 = vmax.f32 %v2967_v14, 0.0  ;;  %v3182_v22 = vmax.f32 %v2498_v57, 0.0 }
 0x1ed   : > { %v3297_v63 = vmax.f32 %v2959_v8, 0.0  ;;  %v3586_v30 = vadd.f32 %v3585_v11, %v3296_v47  ;;  %v2962_v34 = vadd.f32 %v5998_v40, %v2961_v9  ;;  %v3183_v14 = vmax.f32 %v2503_v62, 0.0 }
 0x1ee   : > { %v3447_v28 = vadd.f32 %v3446_v23, %v3177_v32  ;;  %v3300_v55 = vmax.f32 %v2970_v16, 0.0  ;;  %v2527_v57 = vadd.f32 %v6215_v26, %v5761_v18  ;;  %v2535_v18 = vadd.f32 %v6215_v26, %v5758_v13 }
 0x1ef   : > { %v3587_v49 = vadd.f32 %v3586_v30, %v3297_v63  ;;  %v3298_v17 = vmax.f32 %v2962_v34, 0.0  ;;  %v2511_v63 = vadd.f32 %v6215_v26, %v5739_v41  ;;  %v2519_v41 = vadd.f32 %v6215_v26, %v5736_v36 }
 0x1f0   : > { %v3448_v1 = vadd.f32 %v3447_v28, %v3178_v3  ;;  %v2546_v24 = vadd.f32 %v6215_v26, %v5792_v21 }
 0x1f1   : > { %v3588_v37 = vadd.f32 %v3587_v49, %v3298_v17  ;;  %v4848_v60 = vpop.f32.mrb[128].mxu1  ;;  %v3184_v49 = vmax.f32 %v2506_v10, 0.0  ;;  %v3189_v10 = vmax.f32 %v2527_v57, 0.0 }
 0x1f2   : > { %v2974_v7 = vpop.f32.mrb[129].mxu1  ;;  %v3449_v59 = vadd.f32 %v3448_v1, %v3179_v45  ;;  %v2983_v0 = vadd.f32 %v6215_v26, %v4848_v60 }
 0x1f3   : > { %v3589_v42 = vadd.f32 %v3588_v37, %v3299_v38  ;;  %v2975_v35 = vadd.f32 %v6215_v26, %v2974_v7  ;;  %v4849_v40 = vpop.f32.mrb[130].mxu1  ;;  %v3185_v37 = vmax.f32 %v2511_v63, 0.0  ;;  %v3186_v7 = vmax.f32 %v2514_v5, 0.0 }
 0x1f4   : > { %v2977_v61 = vpop.f32.mrb[131].mxu1  ;;  %v3450_v6 = vadd.f32 %v3449_v59, %v3180_v51  ;;  %v2986_v11 = vadd.f32 %v6215_v26, %v4849_v40  ;;  %v3303_v2 = vmax.f32 %v2983_v0, 0.0  ;;  %v3187_v51 = vmax.f32 %v2519_v41, 0.0 }
 0x1f5   : > { %v3301_v29 = vmax.f32 %v2975_v35, 0.0  ;;  %v3590_v50 = vadd.f32 %v3589_v42, %v3300_v55  ;;  %v2978_v54 = vadd.f32 %v6215_v26, %v2977_v61 }
 0x1f6   : > { %v3451_v15 = vadd.f32 %v3450_v6, %v3181_v33  ;;  %v3304_v34 = vmax.f32 %v2986_v11, 0.0 }
 0x1f7   : > { %v3591_v47 = vadd.f32 %v3590_v50, %v3301_v29  ;;  %v3302_v8 = vmax.f32 %v2978_v54, 0.0  ;;  %v3188_v54 = vmax.f32 %v2522_v52, 0.0 }
 0x1f8   : > { %v3452_v30 = vadd.f32 %v3451_v15, %v3182_v22 }
 0x1f9   : > { %v3592_v25 = vadd.f32 %v3591_v47, %v3302_v8  ;;  %v4852_v9 = vpop.f32.mrb[132].mxu1 }
 0x1fa   : > { %v2990_v56 = vpop.f32.mrb[133].mxu1  ;;  %v3453_v16 = vadd.f32 %v3452_v30, %v3183_v14  ;;  %v2999_v39 = vadd.f32 %v6215_v26, %v4852_v9  ;;  %v3190_v9 = vmax.f32 %v2530_v46, 0.0 }
 0x1fb   : > { %v3593_v27 = vadd.f32 %v3592_v25, %v3303_v2  ;;  %v2991_v32 = vadd.f32 %v6215_v26, %v2990_v56  ;;  %v4853_v23 = vpop.f32.mrb[134].mxu1 }
 0x1fc   : > { %v2993_v17 = vpop.f32.mrb[135].mxu1  ;;  %v3454_v60 = vadd.f32 %v3453_v16, %v3184_v49  ;;  %v3002_v20 = vadd.f32 %v6215_v26, %v4853_v23  ;;  %v3307_v42 = vmax.f32 %v2999_v39, 0.0 }
 0x1fd   : > { %v3305_v3 = vmax.f32 %v2991_v32, 0.0  ;;  %v3594_v28 = vadd.f32 %v3593_v27, %v3304_v34  ;;  %v2994_v38 = vadd.f32 %v6215_v26, %v2993_v17  ;;  %v3191_v34 = vmax.f32 %v2535_v18, 0.0 }
 0x1fe   : > { %v3455_v55 = vadd.f32 %v3454_v60, %v3185_v37  ;;  %v3308_v61 = vmax.f32 %v3002_v20, 0.0  ;;  %v2543_v27 = vadd.f32 %v6215_v26, %v5785_v4  ;;  %v3192_v17 = vmax.f32 %v2538_v31, 0.0 }
 0x1ff   : > { %v3595_v45 = vadd.f32 %v3594_v28, %v3305_v3  ;;  %v3306_v1 = vmax.f32 %v2994_v38, 0.0  ;;  %v2551_v4 = vadd.f32 %v6215_v26, %v5781_v58 }
 0x200   : > { %v3456_v59 = vadd.f32 %v3455_v55, %v3186_v7  ;;  %v3193_v60 = vmax.f32 %v2543_v27, 0.0  ;;  %v3194_v55 = vmax.f32 %v2546_v24, 0.0 }
 0x201   : > { %v3596_v35 = vadd.f32 %v3595_v45, %v3306_v1  ;;  %v4856_v40 = vpop.f32.mrb[136].mxu1  ;;  %v2554_v45 = vadd.f32 %v6215_v26, %v5788_v12  ;;  %v3504_v1 = vrot.slane %v5963_v53, 4 }
 0x202   : > { %v3006_v36 = vpop.f32.mrb[137].mxu1  ;;  %v3457_v62 = vadd.f32 %v3456_v59, %v3187_v51  ;;  %v3015_v6 = vadd.f32 %v6215_v26, %v4856_v40  ;;  %v3195_v59 = vmax.f32 %v2551_v4, 0.0 }
 0x203   : > { %v3597_v0 = vadd.f32 %v3596_v35, %v3307_v42  ;;  %v3007_v29 = vadd.f32 %v6215_v26, %v3006_v36  ;;  %v4857_v50 = vpop.f32.mrb[138].mxu1  ;;  %v3541_v42 = vrot.slane %v6111_v19, 4  ;;  %v3578_v35 = vrot.slane %v6195_v48, 4 }
 0x204   : > { %v3009_v33 = vpop.f32.mrb[139].mxu1  ;;  %v3458_v22 = vadd.f32 %v3457_v62, %v3188_v54  ;;  %v3018_v2 = vadd.f32 %v6215_v26, %v4857_v50  ;;  %v3311_v63 = vmax.f32 %v3015_v6, 0.0  ;;  %v3505_v12 = vadd.f32 %v3504_v1, %v5963_v53 }
 0x205   : > { %v3309_v47 = vmax.f32 %v3007_v29, 0.0  ;;  %v3598_v11 = vadd.f32 %v3597_v0, %v3308_v61  ;;  %v3010_v8 = vadd.f32 %v6215_v26, %v3009_v33  ;;  %v3196_v46 = vmax.f32 %v2554_v45, 0.0 }
 0x206   : > { %v3459_v14 = vadd.f32 %v3458_v22, %v3189_v10  ;;  %v3312_v23 = vmax.f32 %v3018_v2, 0.0  ;;  %v3542_v62 = vadd.f32 %v3541_v42, %v6111_v19  ;;  %v3579_v33 = vadd.f32 %v3578_v35, %v6195_v48 }
 0x207   : > { %v3599_v15 = vadd.f32 %v3598_v11, %v3309_v47  ;;  %v3310_v25 = vmax.f32 %v3010_v8, 0.0  ;;  %v3506_v53 = vrot.slane %v3505_v12, 2 }
 0x208   : > { %v3460_v13 = vadd.f32 %v3459_v14, %v3190_v9  ;;  %v3543_v31 = vrot.slane %v3542_v62, 2  ;;  %v3580_v9 = vrot.slane %v3579_v33, 2 }
 0x209   : > { %v3600_v30 = vadd.f32 %v3599_v15, %v3310_v25  ;;  %v4860_v56 = vpop.f32.mrb[140].mxu1 }
 0x20a   : > { %v3022_v32 = vpop.f32.mrb[141].mxu1  ;;  %v3461_v3 = vadd.f32 %v3460_v13, %v3191_v34  ;;  %v3031_v28 = vadd.f32 %v6215_v26, %v4860_v56  ;;  %v3507_v34 = vadd.f32 %v3506_v53, %v3505_v12  ;;  %v3836_v53 = vld [vmem:[%s6494_s8 + $0xa0] sm:$0xff] }
 0x20b   : > { %v3601_v49 = vadd.f32 %v3600_v30, %v3311_v63  ;;  %v3023_v5 = vadd.f32 %v6215_v26, %v3022_v32  ;;  %v4861_v16 = vpop.f32.mrb[142].mxu1 }
 0x20c   : > { %v3025_v39 = vpop.f32.mrb[143].mxu1  ;;  %v3462_v20 = vadd.f32 %v3461_v3, %v3192_v17  ;;  %v3034_v21 = vadd.f32 %v6215_v26, %v4861_v16  ;;  %v3315_v51 = vmax.f32 %v3031_v28, 0.0  ;;  %v3581_v17 = vadd.f32 %v3580_v9, %v3579_v33  ;;  %v3816_v33 = vld [vmem:[%s6494_s8] sm:$0xff]  ;;  %v3821_v9 = vld [vmem:[%s6494_s8 + $0x28] sm:$0xff] }
 0x20d   : > { %v3313_v38 = vmax.f32 %v3023_v5, 0.0  ;;  %v3602_v41 = vadd.f32 %v3601_v49, %v3312_v23  ;;  %v3026_v37 = vadd.f32 %v6215_v26, %v3025_v39  ;;  %v3544_v49 = vadd.f32 %v3543_v31, %v3542_v62  ;;  %v3833_v62 = vld [vmem:[%s6494_s8 + $0x88] sm:$0xff]  ;;  %v3820_v31 = vld [vmem:[%s6494_s8 + $0x20] sm:$0xff] }
 0x20e   : > { %v3463_v40 = vadd.f32 %v3462_v20, %v3193_v60  ;;  %v3316_v0 = vmax.f32 %v3034_v21, 0.0  ;;  %v3582_v21 = vrot.slane %v3581_v17, 1 }
 0x20f   : > { %v3603_v52 = vadd.f32 %v3602_v41, %v3313_v38  ;;  %v3314_v7 = vmax.f32 %v3026_v37, 0.0  ;;  %v3508_v41 = vrot.slane %v3507_v34, 1  ;;  %v3545_v20 = vrot.slane %v3544_v49, 1 }
 0x210   : > { %v3464_v61 = vadd.f32 %v3463_v40, %v3194_v55 }
 0x211   : > { %v3604_v57 = vadd.f32 %v3603_v52, %v3314_v7  ;;  %v4864_v58 = vpop.f32.mrb[144].mxu1  ;;  %v3509_v35 = vadd.f32 %v3508_v41, %v3507_v34  ;;  %v3546_v40 = vadd.f32 %v3545_v20, %v3544_v49  ;;  %v3825_v20 = vld [vmem:[%s6494_s8 + $0x48] sm:$0xff] }
 0x212   : > { %v3038_v36 = vpop.f32.mrb[145].mxu1  ;;  %v3465_v47 = vadd.f32 %v3464_v61, %v3195_v59  ;;  %v3047_v11 = vadd.f32 %v6215_v26, %v4864_v58  ;;  %v3583_v58 = vadd.f32 %v3582_v21, %v3581_v17  ;;  %v3843_v21 = vld [vmem:[%s6494_s8 + $0xd8] sm:$0xff] }
 0x213   : > { %v3605_v29 = vadd.f32 %v3604_v57, %v3315_v51  ;;  %v3039_v50 = vadd.f32 %v6215_v26, %v3038_v36  ;;  %v4865_v54 = vpop.f32.mrb[146].mxu1 }
 0x214   : > { %v3041_v6 = vpop.f32.mrb[147].mxu1  ;;  %v3466_v22 = vadd.f32 %v3465_v47, %v3196_v46  ;;  %v3050_v2 = vadd.f32 %v6215_v26, %v4865_v54  ;;  %v3319_v19 = vmax.f32 %v3047_v11, 0.0  ;;  %v3817_v47 = vld [vmem:[%s6494_s8 + $0x8] sm:$0xff]  ;;  %v3835_v11 = vld [vmem:[%s6494_s8 + $0x98] sm:$0xff] }
 0x215   : > { %v3317_v8 = vmax.f32 %v3039_v50, 0.0  ;;  %v3606_v18 = vadd.f32 %v3605_v29, %v3316_v0  ;;  %v3042_v10 = vadd.f32 %v6215_v26, %v3041_v6 }
 0x216   : > { %v3467_v14 = vrot.slane %v3466_v22, 4  ;;  %v3320_v27 = vmax.f32 %v3050_v2, 0.0 }
 0x217   : > { %v3607_v15 = vadd.f32 %v3606_v18, %v3317_v8  ;;  %v3318_v25 = vmax.f32 %v3042_v10, 0.0  ;;  %v4971_v8 = vpack.c.bf16 %v3817_v47, %v3816_v33  ;;  %v3818_v10 = vld [vmem:[%s6494_s8 + $0x10] sm:$0xff]  ;;  %v3927_v33 = vld [vmem:[%s6496_s10 + $0x8] sm:$0xff] }
 0x218   : > { %v3468_v56 = vadd.f32 %v3467_v14, %v3466_v22  ;;  %v3819_v22 = vld [vmem:[%s6494_s8 + $0x18] sm:$0xff]  ;;  %v3838_v14 = vld [vmem:[%s6494_s8 + $0xb0] sm:$0xff] }
 0x219   : > { %v3608_v63 = vadd.f32 %v3607_v15, %v3318_v25  ;;  %v4868_v48 = vpop.f32.mrb[148].mxu1  ;;  %v3837_v15 = vld [vmem:[%s6494_s8 + $0xa8] sm:$0xff]  ;;  %v4975_v2 = vpack.c.bf16 %v3819_v22, %v3818_v10  ;;  %v3930_v22 = vld [vmem:[%s6496_s10 + $0x20] sm:$0xff] }
 0x21a   : > { %v3054_v30 = vpop.f32.mrb[149].mxu1  ;;  %v3469_v16 = vrot.slane %v3468_v56, 2  ;;  %v3063_v24 = vadd.f32 %v6215_v26, %v4868_v48  ;;  %v4977_v25 = vpack.c.bf16 %v3837_v15, %v3836_v53  ;;  %v3931_v53 = vld [vmem:[%s6496_s10 + $0x28] sm:$0xff] }
 0x21b   : > { %v3609_v32 = vadd.f32 %v3608_v63, %v3319_v19  ;;  %v3055_v13 = vadd.f32 %v6215_v26, %v3054_v30  ;;  %v4869_v23 = vpop.f32.mrb[150].mxu1  ;;  %v3839_v19 = vld [vmem:[%s6494_s8 + $0xb8] sm:$0xff]  ;;  %v4979_v63 = vpack.c.bf16 %v3821_v9, %v3820_v31  ;;  %v3822_v30 = vld [vmem:[%s6494_s8 + $0x30] sm:$0xff]  ;;  %v5008_v15 = vpack.c.bf16 %v3931_v53, %v3930_v22  ;;  %v3934_v9 = vld [vmem:[%s6496_s10 + $0x40] sm:$0xff] }
 0x21c   : > { %v3057_v5 = vpop.f32.mrb[151].mxu1  ;;  %v3470_v38 = vadd.f32 %v3469_v16, %v3468_v56  ;;  %v3066_v4 = vadd.f32 %v6215_v26, %v4869_v23  ;;  %v3323_v1 = vmax.f32 %v3063_v24, 0.0  ;;  %v4981_v48 = vpack.c.bf16 %v3839_v19, %v3838_v14  ;;  %v3823_v56 = vld [vmem:[%s6494_s8 + $0x38] sm:$0xff]  ;;  %v3724_v23 = vld [vmem:[%s6493_s7] sm:$0x3]  ;;  %v3935_v14 = vld [vmem:[%s6496_s10 + $0x48] sm:$0xff] }
 0x21d   : > { %v3321_v39 = vmax.f32 %v3055_v13, 0.0  ;;  %v3610_v3 = vadd.f32 %v3609_v32, %v3320_v27  ;;  %v3058_v28 = vadd.f32 %v6215_v26, %v3057_v5  ;;  %v4983_v34 = vpack.c.bf16 %v3823_v56, %v3822_v30  ;;  %v3938_v56 = vld [vmem:[%s6496_s10 + $0x60] sm:$0xff] }
 0x21e   : > { %v3471_v45 = vrot.slane %v3470_v38, 1  ;;  %v3324_v55 = vmax.f32 %v3066_v4, 0.0  ;;  %v3726_v27 = vlaneseq  ;;  %v3841_v4 = vld [vmem:[%s6494_s8 + $0xc8] sm:$0xff]  ;;  %v5014_v19 = vpack.c.bf16 %v3935_v14, %v3934_v9 }
 0x21f   : > { %v3611_v37 = vadd.f32 %v3610_v3, %v3321_v39  ;;  %v3322_v60 = vmax.f32 %v3058_v28, 0.0 }
 0x220   : > { %v3472_v7 = vadd.f32 %v3471_v45, %v3470_v38  ;;  %v3727_v32 = vshrl.u32 %v3726_v27, 7  ;;  %v3824_v45 = vld [vmem:[%s6494_s8 + $0x40] sm:$0xff] }
 0x221   : > { %v3612_v52 = vadd.f32 %v3611_v37, %v3322_v60  ;;  %v3840_v37 = vld [vmem:[%s6494_s8 + $0xc0] sm:$0xff] }
 0x222   : > { %v3654_v51 = vsel %vm3633_vm4, %v3472_v7, %v6191_v44  ;;  %v3832_v44 = vld [vmem:[%s6494_s8 + $0x80] sm:$0xff]  ;;  %v3728_v13 = vsub.s32 0, %v3727_v32  ;;  %v3732_v49 = vsub.s32 1, %v3727_v32  ;;  %v4985_v60 = vpack.c.bf16 %v3841_v4, %v3840_v37  ;;  %v3826_v7 = vld [vmem:[%s6494_s8 + $0x50] sm:$0xff] }
 0x223   : > { %v3613_v42 = vadd.f32 %v3612_v52, %v3323_v1  ;;  %v3655_v59 = vsel %vm3635_vm5, %v3509_v35, %v3654_v51  ;;  %v4969_v6 = vpack.c.bf16 %v3833_v62, %v3832_v44  ;;  %v4987_v1 = vpack.c.bf16 %v3825_v20, %v3824_v45  ;;  %v3842_v52 = vld [vmem:[%s6494_s8 + $0xd0] sm:$0xff]  ;;  %v3844_v35 = vld [vmem:[%s6494_s8 + $0xe0] sm:$0xff] }
 0x224   : > { %v3656_v26 = vsel %vm3637_vm6, %v3546_v40, %v3655_v59  ;;  %v3729_v5 = vrot.slane %v3724_v23, %v3728_v13  ;;  %v3733_v16 = vrot.slane %v3724_v23, %v3732_v49  ;;  %v3845_v40 = vld [vmem:[%s6494_s8 + $0xe8] sm:$0xff]  ;;  %v3926_v62 = vld [vmem:[%s6496_s10] sm:$0xff]  ;;  %v3940_v32 = vld [vmem:[%s6496_s10 + $0x70] sm:$0xff]  ;;  %v5280_v49 = vmov 0.0  }
 0x225   : > { %v3614_v57 = vadd.f32 %v3613_v42, %v3324_v55  ;;  %v3657_v61 = vsel %vm3639_vm7, %v3583_v58, %v3656_v26  ;;  %4970 = vmatprep.subr.bf16.mxu0 %v4969_v6  ;;  %v4989_v55 = vpack.c.bf16 %v3843_v21, %v3842_v52  ;;  %v3827_v42 = vld [vmem:[%s6494_s8 + $0x58] sm:$0xff]  ;;  %v3828_v58 = vld [vmem:[%s6494_s8 + $0x60] sm:$0xff]  ;;  %v3829_v59 = vld [vmem:[%s6494_s8 + $0x68] sm:$0xff] }
 0x226   : > { %v4991_v51 = vpack.c.bf16 %v3827_v42, %v3826_v7  ;;  %v3846_v26 = vld [vmem:[%s6494_s8 + $0xf0] sm:$0xff]  ;;  %v3941_v13 = vld [vmem:[%s6496_s10 + $0x78] sm:$0xff] }
 0x227   : > { %v3615_v36 = vrot.slane %v3614_v57, 4  ;;  %v5023_v23 = vpack.c.bf16 %v3941_v13, %v3940_v32 }
 0x229   : > { %v3616_v12 = vadd.f32 %v3615_v36, %v3614_v57  ;;  %v4993_v57 = vpack.c.bf16 %v3845_v40, %v3844_v35  ;;  %v3847_v36 = vld [vmem:[%s6494_s8 + $0xf8] sm:$0xff] }
 0x22b   : > { %v3617_v0 = vrot.slane %v3616_v12, 2 }
 0x22d   : > { %v3618_v29 = vadd.f32 %v3617_v0, %v3616_v12  ;;  %v4997_v12 = vpack.c.bf16 %v3847_v36, %v3846_v26  ;;  %v3830_v0 = vld [vmem:[%s6494_s8 + $0x70] sm:$0xff] }
 0x22f   : > { %v3619_v50 = vrot.slane %v3618_v29, 1 }
 0x231   : > { %v3620_v54 = vadd.f32 %v3619_v50, %v3618_v29  ;;  %v3831_v29 = vld [vmem:[%s6494_s8 + $0x78] sm:$0xff] }
 0x232   : > { %v4999_v50 = vpack.c.bf16 %v3831_v29, %v3830_v0 }
 0x233   : > { %v3658_v46 = vsel %vm3641_vm8, %v3620_v54, %v3657_v61  ;;  %v4995_v61 = vpack.c.bf16 %v3829_v59, %v3828_v58  ;;  %v5278_v54 = vmov 0.0|0.0  }
 0x234   : > { %3800 = vmatprep.mubr.f32.mxu0 %v3658_v46 }
 0x235   : > { %3801 = vmatmul.mubr.f32.vlgmr.msra.gmra.mrb[120].mxu0 %v5802_v43  ;;  %v3834_v43 = vld [vmem:[%s6494_s8 + $0x90] sm:$0xff] }
 0x236   : > { %v4973_v18 = vpack.c.bf16 %v3835_v11, %v3834_v43  ;;  %4972 = vmatpush3.bf16.msra.mxu0 %v4971_v8  ;;  %v5002_v11 = vpack.c.bf16 %v3927_v33, %v3926_v62  ;;  %v3928_v8 = vld [vmem:[%s6496_s10 + $0x10] sm:$0xff] }
 0x238   : > { %4974 = vmatprep.subr.bf16.mxu0 %v4973_v18  ;;  %v3929_v18 = vld [vmem:[%s6496_s10 + $0x18] sm:$0xff] }
 0x239   : > { %v5005_v10 = vpack.c.bf16 %v3929_v18, %v3928_v8 }
 0x23a   : > { %4976 = vmatpush3.bf16.msra.mxu0 %v4975_v2  ;;  %v3932_v2 = vld [vmem:[%s6496_s10 + $0x30] sm:$0xff] }
 0x23b   : > { %4978 = vmatprep.subr.bf16.mxu0 %v4977_v25  ;;  %v3933_v25 = vld [vmem:[%s6496_s10 + $0x38] sm:$0xff] }
 0x23c   : > { %v5011_v31 = vpack.c.bf16 %v3933_v25, %v3932_v2 }
 0x23e   : > { %4980 = vmatpush3.bf16.msra.mxu0 %v4979_v63  ;;  %v3936_v63 = vld [vmem:[%s6496_s10 + $0x50] sm:$0xff] }
 0x23f   : > { %4982 = vmatprep.subr.bf16.mxu0 %v4981_v48  ;;  %v3937_v48 = vld [vmem:[%s6496_s10 + $0x58] sm:$0xff] }
 0x240   : > { %v5017_v30 = vpack.c.bf16 %v3937_v48, %v3936_v63 }
 0x242   : > { %4984 = vmatpush3.bf16.msra.mxu0 %v4983_v34  ;;  %v3939_v34 = vld [vmem:[%s6496_s10 + $0x68] sm:$0xff] }
 0x243   : > { %4986 = vmatprep.subr.bf16.mxu0 %v4985_v60  ;;  %v5020_v27 = vpack.c.bf16 %v3939_v34, %v3938_v56 }
 0x246   : > { %4988 = vmatpush3.bf16.msra.mxu0 %v4987_v1 }
 0x247   : > { %4990 = vmatprep.subr.bf16.mxu0 %v4989_v55 }
 0x24a   : > { %4992 = vmatpush3.bf16.msra.mxu0 %v4991_v51 }
 0x24b   : > { %4994 = vmatprep.subr.bf16.mxu0 %v4993_v57 }
 0x24e   : > { %4996 = vmatpush3.bf16.msra.mxu0 %v4995_v61 }
 0x24f   : > { %4998 = vmatprep.subr.bf16.mxu0 %v4997_v12 }
 0x252   : > { %5000 = vmatpush3.bf16.msra.mxu0 %v4999_v50 }
 0x253   : > { %5001 = vmatprep.subr.bf16.mxu0 %v5278_v54 }
 0x308   : > { %v3802_v17 = vpop.f32.mrb[120].mxu0 }
 0x309   : > { %v3803_v24 = vadd.f32 %v3802_v17, %v3729_v5  ;;  %v3804_v39 = vpop.f32.mrb[121].mxu0 }
 0x30a   : > { %v3805_v3 = vadd.f32 %v3804_v39, %v3733_v16  ;;  %v4393_v16 = vld [vmem:[%s6495_s9] ss:$0 sm:$0xff] }
 0x30b   : > { %v3807_v28 = vmul.f32 %v3803_v24, %v3803_v24 }
 0x30c   : > { %v3808_v38 = vmul.f32 %v3805_v3, %v3805_v3 }
 0x30e   : > { %v3809_v41 = vadd.f32 %v3808_v38, %v3807_v28  ;;  %v4394_v28 = vld [vmem:[%s6497_s11] ss:$0 sm:$0xff] }
 0x310   : > { %3810 = vadd.xlane.f32.xlu0 %v3809_v41 }
 0x39d   : > { %v3811_v46 = vpop.xlane.xlu0 %3810 }
 0x39e   : > { %v3812_v44 = vmax.f32 %v3811_v46, 1e-24 }
 0x3a0   : > { %5210 = vrsqrt.f32 %v3812_v44 }
 0x3aa   : > { %v5211_v6 = vpop.eup %5210 }
 0x3ab   : > { %v3815_v47 = vmul.f32 %v5211_v6, %v3805_v3  ;;  %v3814_v43 = vmul.f32 %v5211_v6, %v3803_v24 }
 0x3ad   : > { %3919 = vmatprep.mubr.f32.mxu0 %v3815_v47 }
 0x3ae   : > { %3920 = vmatmul.mubr.f32.vlgmr.msra.gmra.mrb[122].mxu0 %v3814_v43 }
 0x3af   : > { %5003 = vmatpush3.bf16.msra.mxu0 %v5002_v11  ;;  %4902 = vmatprep.mubr.msk.f32.mxu0 %vm5279_vm9, %v5280_v49 }
 0x3b0   : > { %5004 = vmatprep.subr.bf16.mxu0 %v5278_v54 }
 0x3b3   : > { %5006 = vmatpush3.bf16.msra.mxu0 %v5005_v10 }
 0x3b4   : > { %5007 = vmatprep.subr.bf16.mxu0 %v5278_v54 }
 0x3b7   : > { %5009 = vmatpush3.bf16.msra.mxu0 %v5008_v15 }
 0x3b8   : > { %5010 = vmatprep.subr.bf16.mxu0 %v5278_v54 }
 0x3bb   : > { %5012 = vmatpush3.bf16.msra.mxu0 %v5011_v31 }
 0x3bc   : > { %5013 = vmatprep.subr.bf16.mxu0 %v5278_v54 }
 0x3bf   : > { %5015 = vmatpush3.bf16.msra.mxu0 %v5014_v19 }
 0x3c0   : > { %5016 = vmatprep.subr.bf16.mxu0 %v5278_v54 }
 0x3c3   : > { %5018 = vmatpush3.bf16.msra.mxu0 %v5017_v30 }
 0x3c4   : > { %5019 = vmatprep.subr.bf16.mxu0 %v5278_v54 }
 0x3c7   : > { %5021 = vmatpush3.bf16.msra.mxu0 %v5020_v27 }
 0x3c8   : > { %5022 = vmatprep.subr.bf16.mxu0 %v5278_v54 }
 0x3cb   : > { %5024 = vmatpush3.bf16.msra.mxu0 %v5023_v23 }
 0x481   : > { %v4572_v5 = vpop.f32.mrb[122].mxu0 }
 0x482   : > { %v4573_v17 = vpop.f32.mrb[123].mxu0 }
 0x483   : > { %v4574_v24 = vadd.f32 %v4573_v17, %v4572_v5 }
 0x485   : > { %v3922_v39 = vadd.f32 %v4574_v24, %v4393_v16 }
 0x487   : > { %v3925_v3 = vmax.f32 %v3922_v39, 0.0 }
 0x489   : > { %4903 = vmatmul.mubr.f32.vlgmr.msra.gmra.mrb[124].mxu0 %v3925_v3 }
 0x55c   : > { %v4015_v38 = vpop.f32.mrb[124].mxu0 }
 0x55d   : > { %v4016_v41 = vadd.f32 %v4394_v28, %v4015_v38  ;;  %v4904_v37 = vpop.f32.mrb[125].mxu0 }
 0x55f   : > { %4019 = vst [vmem:[%s427_s19] sm:$0xff] %v4016_v41 }
 0x560   : > { %5227 = shalt.err (!%p5224_p3)
}
 0x561   : > { %s5228_s28 = scalar_lea.hbm %s6444_s17, 128  ;;  %s5232_s20 = scalar_lea.hbm %s6498_s12, 256 }
 0x562   : > { %p5229_p4 = scmp.ne.s32.totalorder %s6444_s17, %s5228_s28  ;;  %p5233_p9 = scmp.lt.u32.totalorder %s6444_s17, %s6498_s12 }
 0x563   : > { %p5234_p10 = scmp.lt.u32.totalorder %s5232_s20, %s5228_s28  ;;  %p5236_p12 = scmp.lt.u32.totalorder %s5228_s28, %s6444_s17 }
 0x564   : > { %p5230_p7 = pnand %p5229_p4, %p5385_p5 }
 0x565   : > { %p5235_p11 = por %p5234_p10, %p5233_p9 }
 0x566   : > { %p5231_p8 = pneg %p5230_p7 }
 0x567   : > { %p5237_p13 = por %p5236_p12, %p5235_p11 }
 0x569   : > { %p5238_p0 = pnand %p5237_p13, %p5231_p8 }
 0x56b   : > { %5241 = shalt.err (!%p5238_p0)
}
 0x56c   : > { %5029 = dma.vmem_to_hbm [thread:$0]  (%p5385_p5), %s6446_s30, 128, %s6444_s17, %s4021_s26  }
 0x56d PF: > { %p5035_p1 = scmp.ge.s32.totalorder %s5276_s24, 2  ;;  %s4046_s15 = sand.u32 1, %s5264_s21  }
 0x56e   : > { %s4047_s29 = scalar_lea.sflag [#allocation3], %s4046_s15 }
 0x56f   : > { %p5032_p2 = pnand %p5035_p1, %p5389_p6 }
 0x571   : > { %5259 = dma.done.wait (!%p5032_p2), %s4047_s29, 128  }
 0x572   : > { %5261 = vsyncadd (!%p5032_p2), %s4047_s29, 4294967168  ;;  %s6504_s16 = sld [smem:[#allocation5_spill]]  ;;  %p22_p3 = scmp.ge.s32.totalorder %s5372_s27, 4  }
 0x573   : > { %s6505_s21 = smov %s5268_s22  ;;  %s6506_s22 = smov %s5272_s23 }
 0x574   : > { %s6508_s24 = smov %s5372_s27  ;;  %24 = sbr.rel (!%p22_p3) target bundleno = 5 (0x5), region = 106 }
 0x578   : > { %s6507_s23 = smov %s6504_s16 }
 0x57b   :  { %4052 = vsyncpa [#allocation3], 1 }
 0x57c   :  { %4054 = vsyncpa [#allocation3 + $0x1], 1 }

</bundles_post_ra>
